<compile_context>
chip_gen: v7x
topology: tpu7x:2x2x1
jax: 0.10.0
libtpu: 0.0.40
codegen_flags: <defaults>
</compile_context>

<pallas_src>
import functools

import jax
import jax.numpy as jnp
from jax import lax
from jax.experimental import pallas as pl
from jax.experimental.pallas import tpu as pltpu


# ---------------------------------------------------------------------------
# In-kernel helpers
# ---------------------------------------------------------------------------

def _ln(x, g, b, eps):
    """Row-wise LayerNorm over the last (channel) axis, f32 statistics."""
    mu = jnp.mean(x, axis=-1, keepdims=True)
    var = jnp.mean(jnp.square(x - mu), axis=-1, keepdims=True)
    return (x - mu) * lax.rsqrt(var + eps) * g + b


def _softmax_rows(s):
    """Max-subtracted softmax along last axis; divide via approx EUP reciprocal."""
    m = jnp.max(s, axis=-1, keepdims=True)
    p = jnp.exp(s - m)
    denom = jnp.sum(p, axis=-1, keepdims=True)
    return p * pl.reciprocal(denom, approx=True)


def _mm(a, b):
    """bf16 MXU matmul with f32 accumulation."""
    return jnp.dot(a.astype(jnp.bfloat16), b.astype(jnp.bfloat16),
                   preferred_element_type=jnp.float32)


def _mm_nt(a, b):
    """a @ b^T (contract last axes) in bf16, f32 accumulation; no explicit transpose."""
    return lax.dot_general(a.astype(jnp.bfloat16), b.astype(jnp.bfloat16),
                           (((1,), (1,)), ((), ())),
                           preferred_element_type=jnp.float32)


# ---------------------------------------------------------------------------
# Fused encoder (AIFI) kernel: q/k/v proj + attention + out proj + residual +
# LayerNorm + FFN + LayerNorm, all VMEM-resident, one single invocation.
#   tok_ref : (B*N, C)     tokens, batch folded into rows
#   pos_ref : (N, C)       2D sincos positional embedding
#   wqkv_ref: (3, C, rd)   bf16, [wq, wk, wv] stacked on a free leading axis
#   wo/w1/w2: bf16 weights
#   vec_ref : (10, W) f32  [bq, bk, bv, bo, b1, b2, ln1_g, ln1_b, ln2_g, ln2_b]
# ---------------------------------------------------------------------------

def _aifi_fused_kernel(tok_ref, pos_ref, wqkv_ref, wo_ref, w1_ref, w2_ref,
                       vec_ref, o_ref, *, nb, n, rd, c, mlp, scale, eps):
    t = tok_ref[...].astype(jnp.float32)                      # (B*N, C) f32
    pos = pos_ref[...].astype(jnp.float32)                    # (N, C)
    tp = t + jnp.concatenate([pos] * nb, axis=0)              # pos added to q/k path only

    vec = vec_ref[...]                                        # (10, W) f32, one DMA
    bq, bk, bv = vec[0:1, :rd], vec[1:2, :rd], vec[2:3, :rd]
    bo, b1, b2 = vec[3:4, :c], vec[4:5, :mlp], vec[5:6, :c]
    g1, be1 = vec[6:7, :c], vec[7:8, :c]
    g2, be2 = vec[8:9, :c], vec[9:10, :c]

    wq, wk, wv = wqkv_ref[0], wqkv_ref[1], wqkv_ref[2]        # (C, rd) bf16 each

    # Batch-folded projections (B*N rows feed the MXU); scale folded into q.
    q = (_mm(tp, wq) + bq) * scale                            # (B*N, rd) f32
    k = _mm(tp, wk) + bk                                      # (B*N, rd)
    v = _mm(t, wv) + bv                                       # (B*N, rd)

    # Per-batch attention (static unroll; row slices are sublane-aligned).
    attn_parts = []
    for b in range(nb):
        rows = slice(b * n, (b + 1) * n)
        s = _mm_nt(q[rows], k[rows])                          # (N, N) f32
        p = _softmax_rows(s)
        attn_parts.append(_mm(p, v[rows]))                    # (N, rd) f32
    attn = jnp.concatenate(attn_parts, axis=0)                # (B*N, rd)

    ao = _mm(attn, wo_ref[...]) + bo                          # (B*N, C)
    x1 = _ln(t + ao, g1, be1, eps)
    h1 = jnp.maximum(_mm(x1, w1_ref[...]) + b1, 0.0)          # (B*N, mlp)
    h2 = _mm(h1, w2_ref[...]) + b2                            # (B*N, C)
    x2 = _ln(x1 + h2, g2, be2, eps)

    o_ref[...] = x2.astype(o_ref.dtype)


# ---------------------------------------------------------------------------
# Fused decoder (CrossAttention) kernel: q (last frame) / k,v (full temporal
# memory) projections + attention + output projection + residual.
#   mem_ref : (B*T*N, C)   memory tokens, batch & time folded into rows
#   w_ref   : (4, C, C)    bf16, [wq, wk, wv, wp] stacked on a free leading axis
#   b_ref   : (4, C) f32   [bq, bk, bv, bp]
# ---------------------------------------------------------------------------

def _cross_attn_fused_kernel(mem_ref, w_ref, b_ref, o_ref, *, nb, t_len, n, scale):
    mem = mem_ref[...].astype(jnp.float32)                    # (B*T*N, C) f32
    wq, wk, wv, wp = w_ref[0], w_ref[1], w_ref[2], w_ref[3]   # (C, C) bf16 each
    bvec = b_ref[...]                                         # (4, C) f32
    bq, bk, bv, bp = bvec[0:1], bvec[1:2], bvec[2:3], bvec[3:4]

    # K/V projections folded over batch & time (B*T*N rows).
    k = _mm(mem, wk) + bk                                     # (B*T*N, C)
    v = _mm(mem, wv) + bv                                     # (B*T*N, C)

    # Last-frame rows sliced straight out of the memory block (no separate HBM array).
    cur = jnp.concatenate(
        [mem[(b * t_len + t_len - 1) * n:(b * t_len + t_len) * n] for b in range(nb)],
        axis=0)                                               # (B*N, C) f32
    q = (_mm(cur, wq) + bq) * scale                           # (B*N, C)

    attn_parts = []
    for b in range(nb):
        qr = slice(b * n, (b + 1) * n)
        kr = slice(b * t_len * n, (b + 1) * t_len * n)
        s = _mm_nt(q[qr], k[kr])                              # (N, T*N) f32
        p = _softmax_rows(s)
        attn_parts.append(_mm(p, v[kr]))                      # (N, C)
    attn = jnp.concatenate(attn_parts, axis=0)                # (B*N, C)

    proj = _mm(attn, wp) + bp
    o_ref[...] = (cur + proj).astype(o_ref.dtype)


# ---------------------------------------------------------------------------
# Glue (pure JAX): positional embedding, parameter init / packing, wrappers
# ---------------------------------------------------------------------------

def build_2d_sincos_pos_embed(h, w, dim, temperature=10000.0):
    assert dim % 4 == 0, "channel dim must be divisible by 4 for 2D sincos pos embed"
    gh, gw = jnp.meshgrid(
        jnp.arange(h, dtype=jnp.float32),
        jnp.arange(w, dtype=jnp.float32),
        indexing="ij",
    )
    pos_dim = dim // 4
    omega = jnp.arange(pos_dim, dtype=jnp.float32) / pos_dim
    omega = 1.0 / (temperature ** omega)
    out_h = gh.reshape(-1, 1) * omega.reshape(1, -1)
    out_w = gw.reshape(-1, 1) * omega.reshape(1, -1)
    return jnp.concatenate(
        [jnp.sin(out_h), jnp.cos(out_h), jnp.sin(out_w), jnp.cos(out_w)], axis=1
    )  # (h*w, dim); constant-folds under jit


def _init_linear(key, cin, cout):
    kw, kb = jax.random.split(key)
    s = 1.0 / float(cin) ** 0.5
    w = jax.random.normal(kw, (cin, cout), jnp.float32) * s
    b = jax.random.normal(kb, (cout,), jnp.float32) * 0.01
    return w, b


def init_ltam_params(key, in_channels, frame_len):
    """Natural (PyTorch-like) f32 parameters."""
    del frame_len  # decoder projections are frame-count independent
    reduce_dim = in_channels // 4
    mlp_channel = in_channels  # out_channels == in_channels in LTAM.__init__
    keys = jax.random.split(key, 10)

    enc = {}
    enc["wq"], enc["bq"] = _init_linear(keys[0], in_channels, reduce_dim)
    enc["wk"], enc["bk"] = _init_linear(keys[1], in_channels, reduce_dim)
    enc["wv"], enc["bv"] = _init_linear(keys[2], in_channels, reduce_dim)
    enc["wo"], enc["bo"] = _init_linear(keys[3], reduce_dim, in_channels)
    enc["w1"], enc["b1"] = _init_linear(keys[4], in_channels, mlp_channel)
    enc["w2"], enc["b2"] = _init_linear(keys[5], mlp_channel, in_channels)
    enc["ln1_g"] = jnp.ones((in_channels,), jnp.float32)
    enc["ln1_b"] = jnp.zeros((in_channels,), jnp.float32)
    enc["ln2_g"] = jnp.ones((in_channels,), jnp.float32)
    enc["ln2_b"] = jnp.zeros((in_channels,), jnp.float32)

    dec = {}
    dec["wq"], dec["bq"] = _init_linear(keys[6], in_channels, in_channels)
    dec["wk"], dec["bk"] = _init_linear(keys[7], in_channels, in_channels)
    dec["wv"], dec["bv"] = _init_linear(keys[8], in_channels, in_channels)
    dec["wp"], dec["bp"] = _init_linear(keys[9], in_channels, in_channels)

    return {"encoder": enc, "decoder": dec}


def _pack_rows(rows, width):
    padded = [jnp.pad(r.reshape(-1).astype(jnp.float32), (0, width - r.size))
              for r in rows]
    return jnp.stack(padded, axis=0)


def pack_ltam_params(p):
    """One-time packing into kernel-ready form: bf16 stacked weights + f32 bias/LN slabs."""
    enc, dec = p["encoder"], p["decoder"]
    c, rd = enc["wq"].shape
    mlp = enc["w1"].shape[1]
    width = max(rd, c, mlp)

    enc_packed = {
        "wqkv": jnp.stack([enc["wq"], enc["wk"], enc["wv"]], axis=0).astype(jnp.bfloat16),
        "wo": enc["wo"].astype(jnp.bfloat16),
        "w1": enc["w1"].astype(jnp.bfloat16),
        "w2": enc["w2"].astype(jnp.bfloat16),
        "vec": _pack_rows(
            [enc["bq"], enc["bk"], enc["bv"], enc["bo"], enc["b1"], enc["b2"],
             enc["ln1_g"], enc["ln1_b"], enc["ln2_g"], enc["ln2_b"]], width),
    }
    dec_packed = {
        "w": jnp.stack([dec["wq"], dec["wk"], dec["wv"], dec["wp"]], axis=0).astype(jnp.bfloat16),
        "b": jnp.stack([dec["bq"], dec["bk"], dec["bv"], dec["bp"]], axis=0).astype(jnp.float32),
    }
    return {"encoder": enc_packed, "decoder": dec_packed}


def _vmem_specs(n):
    return [pl.BlockSpec(memory_space=pltpu.MemorySpace.VMEM) for _ in range(n)]


def aifi_forward(p, x):
    """AIFI encoder: one fused, un-gridded Pallas kernel. x: (B,C,H,W) -> (B,C,H,W)."""
    b, c, h, w = x.shape
    n = h * w
    rd = p["wqkv"].shape[2]
    mlp = p["w1"].shape[1]

    tokens = x.reshape(b, c, n).transpose(0, 2, 1).reshape(b * n, c)  # single relayout in
    pos = build_2d_sincos_pos_embed(h, w, c)                          # (N, C)
    scale = 1.0 / float(rd) ** 0.5

    out = pl.pallas_call(
        functools.partial(_aifi_fused_kernel, nb=b, n=n, rd=rd, c=c, mlp=mlp,
                          scale=scale, eps=1e-5),
        out_shape=jax.ShapeDtypeStruct((b * n, c), x.dtype),
        in_specs=_vmem_specs(7),
        out_specs=pl.BlockSpec(memory_space=pltpu.MemorySpace.VMEM),
    )(tokens, pos, p["wqkv"], p["wo"], p["w1"], p["w2"], p["vec"])

    return out.reshape(b, n, c).transpose(0, 2, 1).reshape(b, c, h, w)  # single relayout out


def cross_attention_forward(p, q_x):
    """Temporal cross-attention: one fused, un-gridded Pallas kernel.
    q_x: (B,T,C,H,W) -> (B,C,H,W)."""
    b, t, c, h, w = q_x.shape
    n = h * w

    mem = q_x.reshape(b, t, c, n).transpose(0, 1, 3, 2).reshape(b * t * n, c)  # single relayout in
    scale = 1.0 / float(c) ** 0.5

    out = pl.pallas_call(
        functools.partial(_cross_attn_fused_kernel, nb=b, t_len=t, n=n, scale=scale),
        out_shape=jax.ShapeDtypeStruct((b * n, c), q_x.dtype),
        in_specs=_vmem_specs(3),
        out_specs=pl.BlockSpec(memory_space=pltpu.MemorySpace.VMEM),
    )(mem, p["w"], p["b"])

    return out.reshape(b, n, c).transpose(0, 2, 1).reshape(b, c, h, w)


def ltam_forward(params, enc_x, q_x):
    enc_out = aifi_forward(params["encoder"], enc_x)
    dec_out = cross_attention_forward(params["decoder"], q_x)
    return enc_out, dec_out


if __name__ == "__main__":
    B, C, H, W = 2, 16, 8, 8      # C = cfg.BACKBONE.OUT_CHANNELS[2]
    T = 4                         # frame_len

    key = jax.random.PRNGKey(0)
    k_params, k_enc, k_q = jax.random.split(key, 3)

    params = pack_ltam_params(init_ltam_params(k_params, C, T))
    enc_x = jax.random.normal(k_enc, (B, C, H, W), jnp.float32)
    q_x = jax.random.normal(k_q, (B, T, C, H, W), jnp.float32)

    enc_out, dec_out = jax.jit(ltam_forward)(params, enc_x, q_x)
    jax.block_until_ready((enc_out, dec_out))

    assert enc_out.shape == (B, C, H, W)
    assert dec_out.shape == (B, C, H, W)
    assert bool(jnp.all(jnp.isfinite(enc_out))) and bool(jnp.all(jnp.isfinite(dec_out)))
    print("KERNEL_OK")
</pallas_src>

<mosaic_0001>
module attributes {stable_mosaic.version = 11 : i64} {
  func.func @_aifi_fused_kernel(%arg0: memref<128x16xf32, #tpu.memory_space<vmem>>, %arg1: memref<64x16xf32, #tpu.memory_space<vmem>>, %arg2: memref<3x16x4xbf16, #tpu.memory_space<vmem>>, %arg3: memref<4x16xbf16, #tpu.memory_space<vmem>>, %arg4: memref<16x16xbf16, #tpu.memory_space<vmem>>, %arg5: memref<16x16xbf16, #tpu.memory_space<vmem>>, %arg6: memref<10x16xf32, #tpu.memory_space<vmem>>, %arg7: memref<128x16xf32, #tpu.memory_space<vmem>>) attributes {dimension_semantics = [], scalar_prefetch = 0 : i64, scratch_operands = 0 : i64, tpu.core_type = #tpu.core_type<tc>} {
    %c0 = arith.constant 0 : index
    %c0_0 = arith.constant 0 : index
    %0 = vector.load %arg0[%c0, %c0_0] : memref<128x16xf32, #tpu.memory_space<vmem>>, vector<128x16xf32>
    %c0_1 = arith.constant 0 : index
    %c0_2 = arith.constant 0 : index
    %1 = vector.load %arg1[%c0_1, %c0_2] : memref<64x16xf32, #tpu.memory_space<vmem>>, vector<64x16xf32>
    %2 = tpu.concatenate %1, %1 in 0 : vector<64x16xf32>, vector<64x16xf32> -> vector<128x16xf32>
    %3 = arith.addf %0, %2 : vector<128x16xf32>
    %c0_3 = arith.constant 0 : index
    %c0_4 = arith.constant 0 : index
    %4 = vector.load %arg6[%c0_3, %c0_4] : memref<10x16xf32, #tpu.memory_space<vmem>>, vector<10x16xf32>
    %5 = vector.extract_strided_slice %4 {offsets = [0, 0], sizes = [1, 4], strides = [1, 1]} : vector<10x16xf32> to vector<1x4xf32>
    %6 = vector.extract_strided_slice %4 {offsets = [1, 0], sizes = [1, 4], strides = [1, 1]} : vector<10x16xf32> to vector<1x4xf32>
    %7 = vector.extract_strided_slice %4 {offsets = [2, 0], sizes = [1, 4], strides = [1, 1]} : vector<10x16xf32> to vector<1x4xf32>
    %8 = vector.extract_strided_slice %4 {offsets = [3, 0], sizes = [1, 16], strides = [1, 1]} : vector<10x16xf32> to vector<1x16xf32>
    %9 = vector.extract_strided_slice %4 {offsets = [4, 0], sizes = [1, 16], strides = [1, 1]} : vector<10x16xf32> to vector<1x16xf32>
    %10 = vector.extract_strided_slice %4 {offsets = [5, 0], sizes = [1, 16], strides = [1, 1]} : vector<10x16xf32> to vector<1x16xf32>
    %11 = vector.extract_strided_slice %4 {offsets = [6, 0], sizes = [1, 16], strides = [1, 1]} : vector<10x16xf32> to vector<1x16xf32>
    %12 = vector.extract_strided_slice %4 {offsets = [7, 0], sizes = [1, 16], strides = [1, 1]} : vector<10x16xf32> to vector<1x16xf32>
    %13 = vector.extract_strided_slice %4 {offsets = [8, 0], sizes = [1, 16], strides = [1, 1]} : vector<10x16xf32> to vector<1x16xf32>
    %14 = vector.extract_strided_slice %4 {offsets = [9, 0], sizes = [1, 16], strides = [1, 1]} : vector<10x16xf32> to vector<1x16xf32>
    %c0_5 = arith.constant 0 : index
    %c0_6 = arith.constant 0 : index
    %c0_7 = arith.constant 0 : index
    %15 = vector.load %arg2[%c0_5, %c0_6, %c0_7] : memref<3x16x4xbf16, #tpu.memory_space<vmem>>, vector<1x16x4xbf16>
    %16 = vector.shape_cast %15 : vector<1x16x4xbf16> to vector<16x4xbf16>
    %c1 = arith.constant 1 : index
    %c0_8 = arith.constant 0 : index
    %c0_9 = arith.constant 0 : index
    %17 = vector.load %arg2[%c1, %c0_8, %c0_9] : memref<3x16x4xbf16, #tpu.memory_space<vmem>>, vector<1x16x4xbf16>
    %18 = vector.shape_cast %17 : vector<1x16x4xbf16> to vector<16x4xbf16>
    %c2 = arith.constant 2 : index
    %c0_10 = arith.constant 0 : index
    %c0_11 = arith.constant 0 : index
    %19 = vector.load %arg2[%c2, %c0_10, %c0_11] : memref<3x16x4xbf16, #tpu.memory_space<vmem>>, vector<1x16x4xbf16>
    %20 = vector.shape_cast %19 : vector<1x16x4xbf16> to vector<16x4xbf16>
    %21 = arith.truncf %3 : vector<128x16xf32> to vector<128x16xbf16>
    %cst = arith.constant dense<0.000000e+00> : vector<128x4xf32>
    %22 = tpu.matmul %21, %16, %cst {dimension_numbers = #tpu.dot_dimension_numbers<[1], [0], [0], [1], [0, 0, 1, 1], [], []>} : vector<128x16xbf16>, vector<16x4xbf16>, vector<128x4xf32> -> vector<128x4xf32>
    %23 = vector.broadcast %5 : vector<1x4xf32> to vector<128x4xf32>
    %24 = arith.addf %22, %23 : vector<128x4xf32>
    %cst_12 = arith.constant 5.000000e-01 : f32
    %25 = vector.broadcast %cst_12 : f32 to vector<128x4xf32>
    %26 = arith.mulf %24, %25 : vector<128x4xf32>
    %27 = arith.truncf %3 : vector<128x16xf32> to vector<128x16xbf16>
    %cst_13 = arith.constant dense<0.000000e+00> : vector<128x4xf32>
    %28 = tpu.matmul %27, %18, %cst_13 {dimension_numbers = #tpu.dot_dimension_numbers<[1], [0], [0], [1], [0, 0, 1, 1], [], []>} : vector<128x16xbf16>, vector<16x4xbf16>, vector<128x4xf32> -> vector<128x4xf32>
    %29 = vector.broadcast %6 : vector<1x4xf32> to vector<128x4xf32>
    %30 = arith.addf %28, %29 : vector<128x4xf32>
    %31 = arith.truncf %0 : vector<128x16xf32> to vector<128x16xbf16>
    %cst_14 = arith.constant dense<0.000000e+00> : vector<128x4xf32>
    %32 = tpu.matmul %31, %20, %cst_14 {dimension_numbers = #tpu.dot_dimension_numbers<[1], [0], [0], [1], [0, 0, 1, 1], [], []>} : vector<128x16xbf16>, vector<16x4xbf16>, vector<128x4xf32> -> vector<128x4xf32>
    %33 = vector.broadcast %7 : vector<1x4xf32> to vector<128x4xf32>
    %34 = arith.addf %32, %33 : vector<128x4xf32>
    %35 = vector.extract_strided_slice %26 {offsets = [0, 0], sizes = [64, 4], strides = [1, 1]} : vector<128x4xf32> to vector<64x4xf32>
    %36 = vector.extract_strided_slice %30 {offsets = [0, 0], sizes = [64, 4], strides = [1, 1]} : vector<128x4xf32> to vector<64x4xf32>
    %37 = arith.truncf %35 : vector<64x4xf32> to vector<64x4xbf16>
    %38 = arith.truncf %36 : vector<64x4xf32> to vector<64x4xbf16>
    %cst_15 = arith.constant dense<0.000000e+00> : vector<64x64xf32>
    %39 = tpu.matmul %37, %38, %cst_15 {dimension_numbers = #tpu.dot_dimension_numbers<[1], [1], [0], [0], [0, 0, 1, 0], [], []>} : vector<64x4xbf16>, vector<64x4xbf16>, vector<64x64xf32> -> vector<64x64xf32>
    %cst_16 = arith.constant dense<0xFF800000> : vector<64xf32>
    %40 = vector.multi_reduction <maximumf>, %39, %cst_16 [1] : vector<64x64xf32> to vector<64xf32>
    %41 = vector.shape_cast %40 : vector<64xf32> to vector<64x1xf32>
    %42 = vector.broadcast %41 : vector<64x1xf32> to vector<64x64xf32>
    %43 = arith.subf %39, %42 : vector<64x64xf32>
    %44 = math.exp %43 : vector<64x64xf32>
    %cst_17 = arith.constant dense<0.000000e+00> : vector<64xf32>
    %45 = vector.multi_reduction <add>, %44, %cst_17 [1] : vector<64x64xf32> to vector<64xf32>
    %46 = vector.shape_cast %45 : vector<64xf32> to vector<64x1xf32>
    %47 = tpu.reciprocal %46 {approx = true} : vector<64x1xf32> -> vector<64x1xf32>
    %48 = vector.broadcast %47 : vector<64x1xf32> to vector<64x64xf32>
    %49 = arith.mulf %44, %48 : vector<64x64xf32>
    %50 = vector.extract_strided_slice %34 {offsets = [0, 0], sizes = [64, 4], strides = [1, 1]} : vector<128x4xf32> to vector<64x4xf32>
    %51 = arith.truncf %49 : vector<64x64xf32> to vector<64x64xbf16>
    %52 = arith.truncf %50 : vector<64x4xf32> to vector<64x4xbf16>
    %cst_18 = arith.constant dense<0.000000e+00> : vector<64x4xf32>
    %53 = tpu.matmul %51, %52, %cst_18 {dimension_numbers = #tpu.dot_dimension_numbers<[1], [0], [0], [1], [0, 0, 1, 1], [], []>} : vector<64x64xbf16>, vector<64x4xbf16>, vector<64x4xf32> -> vector<64x4xf32>
    %54 = vector.extract_strided_slice %26 {offsets = [64, 0], sizes = [64, 4], strides = [1, 1]} : vector<128x4xf32> to vector<64x4xf32>
    %55 = vector.extract_strided_slice %30 {offsets = [64, 0], sizes = [64, 4], strides = [1, 1]} : vector<128x4xf32> to vector<64x4xf32>
    %56 = arith.truncf %54 : vector<64x4xf32> to vector<64x4xbf16>
    %57 = arith.truncf %55 : vector<64x4xf32> to vector<64x4xbf16>
    %cst_19 = arith.constant dense<0.000000e+00> : vector<64x64xf32>
    %58 = tpu.matmul %56, %57, %cst_19 {dimension_numbers = #tpu.dot_dimension_numbers<[1], [1], [0], [0], [0, 0, 1, 0], [], []>} : vector<64x4xbf16>, vector<64x4xbf16>, vector<64x64xf32> -> vector<64x64xf32>
    %cst_20 = arith.constant dense<0xFF800000> : vector<64xf32>
    %59 = vector.multi_reduction <maximumf>, %58, %cst_20 [1] : vector<64x64xf32> to vector<64xf32>
    %60 = vector.shape_cast %59 : vector<64xf32> to vector<64x1xf32>
    %61 = vector.broadcast %60 : vector<64x1xf32> to vector<64x64xf32>
    %62 = arith.subf %58, %61 : vector<64x64xf32>
    %63 = math.exp %62 : vector<64x64xf32>
    %cst_21 = arith.constant dense<0.000000e+00> : vector<64xf32>
    %64 = vector.multi_reduction <add>, %63, %cst_21 [1] : vector<64x64xf32> to vector<64xf32>
    %65 = vector.shape_cast %64 : vector<64xf32> to vector<64x1xf32>
    %66 = tpu.reciprocal %65 {approx = true} : vector<64x1xf32> -> vector<64x1xf32>
    %67 = vector.broadcast %66 : vector<64x1xf32> to vector<64x64xf32>
    %68 = arith.mulf %63, %67 : vector<64x64xf32>
    %69 = vector.extract_strided_slice %34 {offsets = [64, 0], sizes = [64, 4], strides = [1, 1]} : vector<128x4xf32> to vector<64x4xf32>
    %70 = arith.truncf %68 : vector<64x64xf32> to vector<64x64xbf16>
    %71 = arith.truncf %69 : vector<64x4xf32> to vector<64x4xbf16>
    %cst_22 = arith.constant dense<0.000000e+00> : vector<64x4xf32>
    %72 = tpu.matmul %70, %71, %cst_22 {dimension_numbers = #tpu.dot_dimension_numbers<[1], [0], [0], [1], [0, 0, 1, 1], [], []>} : vector<64x64xbf16>, vector<64x4xbf16>, vector<64x4xf32> -> vector<64x4xf32>
    %73 = tpu.concatenate %53, %72 in 0 : vector<64x4xf32>, vector<64x4xf32> -> vector<128x4xf32>
    %c0_23 = arith.constant 0 : index
    %c0_24 = arith.constant 0 : index
    %74 = vector.load %arg3[%c0_23, %c0_24] : memref<4x16xbf16, #tpu.memory_space<vmem>>, vector<4x16xbf16>
    %75 = arith.truncf %73 : vector<128x4xf32> to vector<128x4xbf16>
    %cst_25 = arith.constant dense<0.000000e+00> : vector<128x16xf32>
    %76 = tpu.matmul %75, %74, %cst_25 {dimension_numbers = #tpu.dot_dimension_numbers<[1], [0], [0], [1], [0, 0, 1, 1], [], []>} : vector<128x4xbf16>, vector<4x16xbf16>, vector<128x16xf32> -> vector<128x16xf32>
    %77 = vector.broadcast %8 : vector<1x16xf32> to vector<128x16xf32>
    %78 = arith.addf %76, %77 : vector<128x16xf32>
    %79 = arith.addf %0, %78 : vector<128x16xf32>
    %cst_26 = arith.constant dense<0.000000e+00> : vector<128xf32>
    %80 = vector.multi_reduction <add>, %79, %cst_26 [1] : vector<128x16xf32> to vector<128xf32>
    %81 = vector.shape_cast %80 : vector<128xf32> to vector<128x1xf32>
    %cst_27 = arith.constant 1.600000e+01 : f32
    %82 = vector.broadcast %cst_27 : f32 to vector<128x1xf32>
    %83 = arith.divf %81, %82 : vector<128x1xf32>
    %84 = vector.broadcast %83 : vector<128x1xf32> to vector<128x16xf32>
    %85 = arith.subf %79, %84 : vector<128x16xf32>
    %86 = arith.mulf %85, %85 : vector<128x16xf32>
    %cst_28 = arith.constant dense<0.000000e+00> : vector<128xf32>
    %87 = vector.multi_reduction <add>, %86, %cst_28 [1] : vector<128x16xf32> to vector<128xf32>
    %88 = vector.shape_cast %87 : vector<128xf32> to vector<128x1xf32>
    %cst_29 = arith.constant 1.600000e+01 : f32
    %89 = vector.broadcast %cst_29 : f32 to vector<128x1xf32>
    %90 = arith.divf %88, %89 : vector<128x1xf32>
    %91 = vector.broadcast %83 : vector<128x1xf32> to vector<128x16xf32>
    %92 = arith.subf %79, %91 : vector<128x16xf32>
    %cst_30 = arith.constant 9.99999974E-6 : f32
    %93 = vector.broadcast %cst_30 : f32 to vector<128x1xf32>
    %94 = arith.addf %90, %93 : vector<128x1xf32>
    %95 = math.rsqrt %94 : vector<128x1xf32>
    %96 = vector.broadcast %95 : vector<128x1xf32> to vector<128x16xf32>
    %97 = arith.mulf %92, %96 : vector<128x16xf32>
    %98 = vector.broadcast %11 : vector<1x16xf32> to vector<128x16xf32>
    %99 = arith.mulf %97, %98 : vector<128x16xf32>
    %100 = vector.broadcast %12 : vector<1x16xf32> to vector<128x16xf32>
    %101 = arith.addf %99, %100 : vector<128x16xf32>
    %c0_31 = arith.constant 0 : index
    %c0_32 = arith.constant 0 : index
    %102 = vector.load %arg4[%c0_31, %c0_32] : memref<16x16xbf16, #tpu.memory_space<vmem>>, vector<16x16xbf16>
    %103 = arith.truncf %101 : vector<128x16xf32> to vector<128x16xbf16>
    %cst_33 = arith.constant dense<0.000000e+00> : vector<128x16xf32>
    %104 = tpu.matmul %103, %102, %cst_33 {dimension_numbers = #tpu.dot_dimension_numbers<[1], [0], [0], [1], [0, 0, 1, 1], [], []>} : vector<128x16xbf16>, vector<16x16xbf16>, vector<128x16xf32> -> vector<128x16xf32>
    %105 = vector.broadcast %9 : vector<1x16xf32> to vector<128x16xf32>
    %106 = arith.addf %104, %105 : vector<128x16xf32>
    %cst_34 = arith.constant 0.000000e+00 : f32
    %107 = vector.broadcast %cst_34 : f32 to vector<128x16xf32>
    %108 = arith.maximumf %106, %107 : vector<128x16xf32>
    %c0_35 = arith.constant 0 : index
    %c0_36 = arith.constant 0 : index
    %109 = vector.load %arg5[%c0_35, %c0_36] : memref<16x16xbf16, #tpu.memory_space<vmem>>, vector<16x16xbf16>
    %110 = arith.truncf %108 : vector<128x16xf32> to vector<128x16xbf16>
    %cst_37 = arith.constant dense<0.000000e+00> : vector<128x16xf32>
    %111 = tpu.matmul %110, %109, %cst_37 {dimension_numbers = #tpu.dot_dimension_numbers<[1], [0], [0], [1], [0, 0, 1, 1], [], []>} : vector<128x16xbf16>, vector<16x16xbf16>, vector<128x16xf32> -> vector<128x16xf32>
    %112 = vector.broadcast %10 : vector<1x16xf32> to vector<128x16xf32>
    %113 = arith.addf %111, %112 : vector<128x16xf32>
    %114 = arith.addf %101, %113 : vector<128x16xf32>
    %cst_38 = arith.constant dense<0.000000e+00> : vector<128xf32>
    %115 = vector.multi_reduction <add>, %114, %cst_38 [1] : vector<128x16xf32> to vector<128xf32>
    %116 = vector.shape_cast %115 : vector<128xf32> to vector<128x1xf32>
    %cst_39 = arith.constant 1.600000e+01 : f32
    %117 = vector.broadcast %cst_39 : f32 to vector<128x1xf32>
    %118 = arith.divf %116, %117 : vector<128x1xf32>
    %119 = vector.broadcast %118 : vector<128x1xf32> to vector<128x16xf32>
    %120 = arith.subf %114, %119 : vector<128x16xf32>
    %121 = arith.mulf %120, %120 : vector<128x16xf32>
    %cst_40 = arith.constant dense<0.000000e+00> : vector<128xf32>
    %122 = vector.multi_reduction <add>, %121, %cst_40 [1] : vector<128x16xf32> to vector<128xf32>
    %123 = vector.shape_cast %122 : vector<128xf32> to vector<128x1xf32>
    %cst_41 = arith.constant 1.600000e+01 : f32
    %124 = vector.broadcast %cst_41 : f32 to vector<128x1xf32>
    %125 = arith.divf %123, %124 : vector<128x1xf32>
    %126 = vector.broadcast %118 : vector<128x1xf32> to vector<128x16xf32>
    %127 = arith.subf %114, %126 : vector<128x16xf32>
    %cst_42 = arith.constant 9.99999974E-6 : f32
    %128 = vector.broadcast %cst_42 : f32 to vector<128x1xf32>
    %129 = arith.addf %125, %128 : vector<128x1xf32>
    %130 = math.rsqrt %129 : vector<128x1xf32>
    %131 = vector.broadcast %130 : vector<128x1xf32> to vector<128x16xf32>
    %132 = arith.mulf %127, %131 : vector<128x16xf32>
    %133 = vector.broadcast %13 : vector<1x16xf32> to vector<128x16xf32>
    %134 = arith.mulf %132, %133 : vector<128x16xf32>
    %135 = vector.broadcast %14 : vector<1x16xf32> to vector<128x16xf32>
    %136 = arith.addf %134, %135 : vector<128x16xf32>
    %c0_43 = arith.constant 0 : index
    %c0_44 = arith.constant 0 : index
    %137 = vector.load %arg7[%c0_43, %c0_44] : memref<128x16xf32, #tpu.memory_space<vmem>>, vector<128x16xf32>
    tpu.vector_store %arg7[%c0_43, %c0_44], %136 {strides = array<i32>} : memref<128x16xf32, #tpu.memory_space<vmem>>, vector<128x16xf32>,
    return
  }
}

module attributes {stable_mosaic.version = 11 : i64} {
  func.func @_cross_attn_fused_kernel(%arg0: memref<512x16xf32, #tpu.memory_space<vmem>>, %arg1: memref<4x16x16xbf16, #tpu.memory_space<vmem>>, %arg2: memref<4x16xf32, #tpu.memory_space<vmem>>, %arg3: memref<128x16xf32, #tpu.memory_space<vmem>>) attributes {dimension_semantics = [], scalar_prefetch = 0 : i64, scratch_operands = 0 : i64, tpu.core_type = #tpu.core_type<tc>} {
    %c0 = arith.constant 0 : index
    %c0_0 = arith.constant 0 : index
    %0 = vector.load %arg0[%c0, %c0_0] : memref<512x16xf32, #tpu.memory_space<vmem>>, vector<512x16xf32>
    %c0_1 = arith.constant 0 : index
    %c0_2 = arith.constant 0 : index
    %c0_3 = arith.constant 0 : index
    %1 = vector.load %arg1[%c0_1, %c0_2, %c0_3] : memref<4x16x16xbf16, #tpu.memory_space<vmem>>, vector<1x16x16xbf16>
    %2 = vector.shape_cast %1 : vector<1x16x16xbf16> to vector<16x16xbf16>
    %c1 = arith.constant 1 : index
    %c0_4 = arith.constant 0 : index
    %c0_5 = arith.constant 0 : index
    %3 = vector.load %arg1[%c1, %c0_4, %c0_5] : memref<4x16x16xbf16, #tpu.memory_space<vmem>>, vector<1x16x16xbf16>
    %4 = vector.shape_cast %3 : vector<1x16x16xbf16> to vector<16x16xbf16>
    %c2 = arith.constant 2 : index
    %c0_6 = arith.constant 0 : index
    %c0_7 = arith.constant 0 : index
    %5 = vector.load %arg1[%c2, %c0_6, %c0_7] : memref<4x16x16xbf16, #tpu.memory_space<vmem>>, vector<1x16x16xbf16>
    %6 = vector.shape_cast %5 : vector<1x16x16xbf16> to vector<16x16xbf16>
    %c3 = arith.constant 3 : index
    %c0_8 = arith.constant 0 : index
    %c0_9 = arith.constant 0 : index
    %7 = vector.load %arg1[%c3, %c0_8, %c0_9] : memref<4x16x16xbf16, #tpu.memory_space<vmem>>, vector<1x16x16xbf16>
    %8 = vector.shape_cast %7 : vector<1x16x16xbf16> to vector<16x16xbf16>
    %c0_10 = arith.constant 0 : index
    %c0_11 = arith.constant 0 : index
    %9 = vector.load %arg2[%c0_10, %c0_11] : memref<4x16xf32, #tpu.memory_space<vmem>>, vector<4x16xf32>
    %10 = vector.extract_strided_slice %9 {offsets = [0, 0], sizes = [1, 16], strides = [1, 1]} : vector<4x16xf32> to vector<1x16xf32>
    %11 = vector.extract_strided_slice %9 {offsets = [1, 0], sizes = [1, 16], strides = [1, 1]} : vector<4x16xf32> to vector<1x16xf32>
    %12 = vector.extract_strided_slice %9 {offsets = [2, 0], sizes = [1, 16], strides = [1, 1]} : vector<4x16xf32> to vector<1x16xf32>
    %13 = vector.extract_strided_slice %9 {offsets = [3, 0], sizes = [1, 16], strides = [1, 1]} : vector<4x16xf32> to vector<1x16xf32>
    %14 = arith.truncf %0 : vector<512x16xf32> to vector<512x16xbf16>
    %cst = arith.constant dense<0.000000e+00> : vector<512x16xf32>
    %15 = tpu.matmul %14, %4, %cst {dimension_numbers = #tpu.dot_dimension_numbers<[1], [0], [0], [1], [0, 0, 1, 1], [], []>} : vector<512x16xbf16>, vector<16x16xbf16>, vector<512x16xf32> -> vector<512x16xf32>
    %16 = vector.broadcast %11 : vector<1x16xf32> to vector<512x16xf32>
    %17 = arith.addf %15, %16 : vector<512x16xf32>
    %18 = arith.truncf %0 : vector<512x16xf32> to vector<512x16xbf16>
    %cst_12 = arith.constant dense<0.000000e+00> : vector<512x16xf32>
    %19 = tpu.matmul %18, %6, %cst_12 {dimension_numbers = #tpu.dot_dimension_numbers<[1], [0], [0], [1], [0, 0, 1, 1], [], []>} : vector<512x16xbf16>, vector<16x16xbf16>, vector<512x16xf32> -> vector<512x16xf32>
    %20 = vector.broadcast %12 : vector<1x16xf32> to vector<512x16xf32>
    %21 = arith.addf %19, %20 : vector<512x16xf32>
    %22 = vector.extract_strided_slice %0 {offsets = [192, 0], sizes = [64, 16], strides = [1, 1]} : vector<512x16xf32> to vector<64x16xf32>
    %23 = vector.extract_strided_slice %0 {offsets = [448, 0], sizes = [64, 16], strides = [1, 1]} : vector<512x16xf32> to vector<64x16xf32>
    %24 = tpu.concatenate %22, %23 in 0 : vector<64x16xf32>, vector<64x16xf32> -> vector<128x16xf32>
    %25 = arith.truncf %24 : vector<128x16xf32> to vector<128x16xbf16>
    %cst_13 = arith.constant dense<0.000000e+00> : vector<128x16xf32>
    %26 = tpu.matmul %25, %2, %cst_13 {dimension_numbers = #tpu.dot_dimension_numbers<[1], [0], [0], [1], [0, 0, 1, 1], [], []>} : vector<128x16xbf16>, vector<16x16xbf16>, vector<128x16xf32> -> vector<128x16xf32>
    %27 = vector.broadcast %10 : vector<1x16xf32> to vector<128x16xf32>
    %28 = arith.addf %26, %27 : vector<128x16xf32>
    %cst_14 = arith.constant 2.500000e-01 : f32
    %29 = vector.broadcast %cst_14 : f32 to vector<128x16xf32>
    %30 = arith.mulf %28, %29 : vector<128x16xf32>
    %31 = vector.extract_strided_slice %30 {offsets = [0, 0], sizes = [64, 16], strides = [1, 1]} : vector<128x16xf32> to vector<64x16xf32>
    %32 = vector.extract_strided_slice %17 {offsets = [0, 0], sizes = [256, 16], strides = [1, 1]} : vector<512x16xf32> to vector<256x16xf32>
    %33 = arith.truncf %31 : vector<64x16xf32> to vector<64x16xbf16>
    %34 = arith.truncf %32 : vector<256x16xf32> to vector<256x16xbf16>
    %cst_15 = arith.constant dense<0.000000e+00> : vector<64x256xf32>
    %35 = tpu.matmul %33, %34, %cst_15 {dimension_numbers = #tpu.dot_dimension_numbers<[1], [1], [0], [0], [0, 0, 1, 0], [], []>} : vector<64x16xbf16>, vector<256x16xbf16>, vector<64x256xf32> -> vector<64x256xf32>
    %cst_16 = arith.constant dense<0xFF800000> : vector<64xf32>
    %36 = vector.multi_reduction <maximumf>, %35, %cst_16 [1] : vector<64x256xf32> to vector<64xf32>
    %37 = vector.shape_cast %36 : vector<64xf32> to vector<64x1xf32>
    %38 = vector.broadcast %37 : vector<64x1xf32> to vector<64x256xf32>
    %39 = arith.subf %35, %38 : vector<64x256xf32>
    %40 = math.exp %39 : vector<64x256xf32>
    %cst_17 = arith.constant dense<0.000000e+00> : vector<64xf32>
    %41 = vector.multi_reduction <add>, %40, %cst_17 [1] : vector<64x256xf32> to vector<64xf32>
    %42 = vector.shape_cast %41 : vector<64xf32> to vector<64x1xf32>
    %43 = tpu.reciprocal %42 {approx = true} : vector<64x1xf32> -> vector<64x1xf32>
    %44 = vector.broadcast %43 : vector<64x1xf32> to vector<64x256xf32>
    %45 = arith.mulf %40, %44 : vector<64x256xf32>
    %46 = vector.extract_strided_slice %21 {offsets = [0, 0], sizes = [256, 16], strides = [1, 1]} : vector<512x16xf32> to vector<256x16xf32>
    %47 = arith.truncf %45 : vector<64x256xf32> to vector<64x256xbf16>
    %48 = arith.truncf %46 : vector<256x16xf32> to vector<256x16xbf16>
    %cst_18 = arith.constant dense<0.000000e+00> : vector<64x16xf32>
    %49 = tpu.matmul %47, %48, %cst_18 {dimension_numbers = #tpu.dot_dimension_numbers<[1], [0], [0], [1], [0, 0, 1, 1], [], []>} : vector<64x256xbf16>, vector<256x16xbf16>, vector<64x16xf32> -> vector<64x16xf32>
    %50 = vector.extract_strided_slice %30 {offsets = [64, 0], sizes = [64, 16], strides = [1, 1]} : vector<128x16xf32> to vector<64x16xf32>
    %51 = vector.extract_strided_slice %17 {offsets = [256, 0], sizes = [256, 16], strides = [1, 1]} : vector<512x16xf32> to vector<256x16xf32>
    %52 = arith.truncf %50 : vector<64x16xf32> to vector<64x16xbf16>
    %53 = arith.truncf %51 : vector<256x16xf32> to vector<256x16xbf16>
    %cst_19 = arith.constant dense<0.000000e+00> : vector<64x256xf32>
    %54 = tpu.matmul %52, %53, %cst_19 {dimension_numbers = #tpu.dot_dimension_numbers<[1], [1], [0], [0], [0, 0, 1, 0], [], []>} : vector<64x16xbf16>, vector<256x16xbf16>, vector<64x256xf32> -> vector<64x256xf32>
    %cst_20 = arith.constant dense<0xFF800000> : vector<64xf32>
    %55 = vector.multi_reduction <maximumf>, %54, %cst_20 [1] : vector<64x256xf32> to vector<64xf32>
    %56 = vector.shape_cast %55 : vector<64xf32> to vector<64x1xf32>
    %57 = vector.broadcast %56 : vector<64x1xf32> to vector<64x256xf32>
    %58 = arith.subf %54, %57 : vector<64x256xf32>
    %59 = math.exp %58 : vector<64x256xf32>
    %cst_21 = arith.constant dense<0.000000e+00> : vector<64xf32>
    %60 = vector.multi_reduction <add>, %59, %cst_21 [1] : vector<64x256xf32> to vector<64xf32>
    %61 = vector.shape_cast %60 : vector<64xf32> to vector<64x1xf32>
    %62 = tpu.reciprocal %61 {approx = true} : vector<64x1xf32> -> vector<64x1xf32>
    %63 = vector.broadcast %62 : vector<64x1xf32> to vector<64x256xf32>
    %64 = arith.mulf %59, %63 : vector<64x256xf32>
    %65 = vector.extract_strided_slice %21 {offsets = [256, 0], sizes = [256, 16], strides = [1, 1]} : vector<512x16xf32> to vector<256x16xf32>
    %66 = arith.truncf %64 : vector<64x256xf32> to vector<64x256xbf16>
    %67 = arith.truncf %65 : vector<256x16xf32> to vector<256x16xbf16>
    %cst_22 = arith.constant dense<0.000000e+00> : vector<64x16xf32>
    %68 = tpu.matmul %66, %67, %cst_22 {dimension_numbers = #tpu.dot_dimension_numbers<[1], [0], [0], [1], [0, 0, 1, 1], [], []>} : vector<64x256xbf16>, vector<256x16xbf16>, vector<64x16xf32> -> vector<64x16xf32>
    %69 = tpu.concatenate %49, %68 in 0 : vector<64x16xf32>, vector<64x16xf32> -> vector<128x16xf32>
    %70 = arith.truncf %69 : vector<128x16xf32> to vector<128x16xbf16>
    %cst_23 = arith.constant dense<0.000000e+00> : vector<128x16xf32>
    %71 = tpu.matmul %70, %8, %cst_23 {dimension_numbers = #tpu.dot_dimension_numbers<[1], [0], [0], [1], [0, 0, 1, 1], [], []>} : vector<128x16xbf16>, vector<16x16xbf16>, vector<128x16xf32> -> vector<128x16xf32>
    %72 = vector.broadcast %13 : vector<1x16xf32> to vector<128x16xf32>
    %73 = arith.addf %71, %72 : vector<128x16xf32>
    %74 = arith.addf %24, %73 : vector<128x16xf32>
    %c0_24 = arith.constant 0 : index
    %c0_25 = arith.constant 0 : index
    %75 = vector.load %arg3[%c0_24, %c0_25] : memref<128x16xf32, #tpu.memory_space<vmem>>, vector<128x16xf32>
    tpu.vector_store %arg3[%c0_24, %c0_25], %74 {strides = array<i32>} : memref<128x16xf32, #tpu.memory_space<vmem>>, vector<128x16xf32>,
    return
  }
}

</mosaic_0001>

<bundles_post_ra>
// kernel: mul.22
= control target key start
LH: loop header
LB: loop body
LE: loop exit
PB: predicated region body
PF: predicated region fallthrough
CT: control target
= control target key end

     0   :  { %s67_s10 = smov 56   ;;  %s68_s11 = smov 40   ;;  %vm3_vm0 = vcmask 64512   ;;  %vm9_vm1 = vcmask 523712   ;;  %vm15_vm2 = vcmask 458112   ;;  %vm21_vm3 = vcmask 392512   ;;  %s111_s0 = inlined_call_operand.vmem [shape: f32[8,8], index: 0, kind: input, shape index: {}]   ;;  %s112_s1 = inlined_call_operand.vmem [shape: f32[64], index: 1, kind: output, shape index: {}]  }
   0x1   :  { %v53_v0 = vld [vmem:[%s111_s0 + $0x7] sm:$0x1]   ;;  %v55_v1 = vld [vmem:[%s111_s0 + $0x5] sm:$0x1]   ;;  %v54_v2 = vld [vmem:[%s111_s0 + $0x6] sm:$0x1]  }
   0x2   :  { %7 = vrot.lane.b32.xlu0 %v53_v0, %s67_s10  ;;  %19 = vrot.lane.b32.xlu1 %v55_v1, %s68_s11  ;;  %v56_v3 = vld [vmem:[%s111_s0 + $0x4] sm:$0x1]   ;;  %v2_v4 = vld [vmem:[%s111_s0] sm:$0x1]   ;;  %s69_s18 = smov 48   ;;  %s70_s19 = smov 32  }
   0x3   :  { %4 = vst.msk [vmem:[#allocation0] sm:$0x1] %vm3_vm0, %v2_v4   ;;  %v57_v5 = vld [vmem:[%s111_s0 + $0x3] sm:$0x1]   ;;  %v58_v6 = vld [vmem:[%s111_s0 + $0x2] sm:$0x1]  }
   0x4   :  { %s71_s24 = smov 24   ;;  %s72_s25 = smov 16   ;;  %v59_v7 = vld [vmem:[%s111_s0 + $0x1] sm:$0x1]   ;;  %vm27_vm4 = vcmask 326912   ;;  %vm33_vm5 = vcmask 261312  }
   0x5   :  { %s73_s0 = smov 8   ;;  %vm39_vm6 = vcmask 195712   ;;  %vm45_vm7 = vcmask 130112  }
   0x6   :  { %13 = vrot.lane.b32.xlu0 %v54_v2, %s69_s18  ;;  %25 = vrot.lane.b32.xlu1 %v56_v3, %s70_s19 }
   0xa   :  { %31 = vrot.lane.b32.xlu0 %v57_v5, %s71_s24  ;;  %37 = vrot.lane.b32.xlu1 %v58_v6, %s72_s25 }
   0xe   :  { %43 = vrot.lane.b32.xlu0 %v59_v7, %s73_s0 }
  0x74   :  { %v8_v8 = vpop.permute.xlu0 %7   ;;  %v20_v9 = vpop.permute.xlu1 %19  }
  0x75   :  { %10 = vst.msk [vmem:[#allocation0] sm:$0x1] %vm9_vm1, %v8_v8  }
  0x78   :  { %v14_v10 = vpop.permute.xlu0 %13   ;;  %v26_v11 = vpop.permute.xlu1 %25  }
  0x79   :  { %16 = vst.msk [vmem:[#allocation0] sm:$0x1] %vm15_vm2, %v14_v10  }
  0x7a   :  { %22 = vst.msk [vmem:[#allocation0] sm:$0x1] %vm21_vm3, %v20_v9  }
  0x7b   :  { %28 = vst.msk [vmem:[#allocation0] sm:$0x1] %vm27_vm4, %v26_v11  }
  0x7c   :  { %v32_v12 = vpop.permute.xlu0 %31   ;;  %v38_v13 = vpop.permute.xlu1 %37  }
  0x7d   :  { %34 = vst.msk [vmem:[#allocation0] sm:$0x1] %vm33_vm5, %v32_v12  }
  0x7e   :  { %40 = vst.msk [vmem:[#allocation0] sm:$0x1] %vm39_vm6, %v38_v13  }
  0x80   :  { %v44_v14 = vpop.permute.xlu0 %43  }
  0x81   :  { %46 = vst.msk [vmem:[#allocation0] sm:$0x1] %vm45_vm7, %v44_v14  }
  0x88   :  { %v50_v15 = vld [vmem:[#allocation0] sm:$0x1] }
  0x89   :  { %52 = vst [vmem:[%s112_s1] sm:$0x1] %v50_v15 }

// kernel: ltam_forward.2
= control target key start
LH: loop header
LB: loop body
LE: loop exit
PB: predicated region body
PF: predicated region fallthrough
CT: control target
= control target key end

     0   :  { %12 = vsyncpa [#allocation3], 0  ;;  %s3828_s0 = inlined_call_operand.hbm [shape: f32[128,16], index: 0, kind: input, shape index: {}]   ;;  %s3829_s1 = inlined_call_operand.vmem [shape: f32[64,16], index: 1, kind: input, shape index: {}]   ;;  %s3830_s2 = inlined_call_operand.vmem [shape: bf16[3,16,4], index: 2, kind: input, shape index: {}]   ;;  %s3831_s3 = inlined_call_operand.hbm [shape: bf16[4,16], index: 3, kind: input, shape index: {}]   ;;  %s3832_s4 = inlined_call_operand.hbm [shape: bf16[16,16], index: 4, kind: input, shape index: {}]   ;;  %s3833_s5 = inlined_call_operand.hbm [shape: bf16[16,16], index: 5, kind: input, shape index: {}]   ;;  %s3834_s6 = inlined_call_operand.hbm [shape: f32[10,16], index: 6, kind: input, shape index: {}]   ;;  %s3835_s7 = inlined_call_operand.hbm [shape: f32[128,16], index: 7, kind: output, shape index: {}]  }
   0x1   :  { %13 = vsyncpa [#allocation6], 0 }
   0x2   :  { %14 = vsyncpa [#allocation9], 0 }
   0x3   :  { %15 = vsyncpa [#allocation4], 0  ;;  %s2730_s24 = smov [#allocation5]   ;;  %s2590_s28 = scalar_lea.hbm %s3831_s3, 32 }
   0x4   :  { %s38_s25 = sshll.u32 %s2730_s24, 4  ;;  %p2591_p0 = scmp.ne.s32.totalorder %s3831_s3, %s2590_s28  ;;  %s39_s25 = int_to_ptr.vmem [resolvable:$true] %s38_s25 }
   0x5   :  { %p2594_p1 = scmp.lt.u32.totalorder %s2590_s28, %s3831_s3 }
   0x7   :  { %p2596_p2 = pnand %p2594_p1, %p2591_p0 }
   0x9   :  { %2599 = shalt.err (!%p2596_p2)
}
   0xa   :  { %s2600_s10 = scalar_lea.vmem %s39_s25, 32  ;;  %p2605_p4 = scmp.lt.s32.totalorder %s39_s25, %s39_s25 }
   0xb   :  { %p2601_p3 = scmp.ne.s32.totalorder %s39_s25, %s2600_s10  ;;  %p2606_p5 = scmp.lt.s32.totalorder %s2600_s10, %s2600_s10 }
   0xd   :  { %p2607_p6 = por %p2606_p5, %p2605_p4 }
   0xf   :  { %p2608_p7 = pnand %p2607_p6, %p2601_p3 }
  0x11   :  { %2611 = shalt.err (!%p2608_p7)
}
  0x12   :  { %41 = dma.hbm_to_vmem [thread:$0]  %s3831_s3, 32, %s39_s25, [#allocation6]  }
  0x13   :  { %s2731_s13 = smov [#allocation8]   ;;  %s2732_s15 = smov [#allocation2]  }
  0x14   :  { %s59_s14 = sshll.u32 %s2731_s13, 4  ;;  %s21_s16 = sshll.u32 %s2732_s15, 4  ;;  %s60_s14 = int_to_ptr.vmem [resolvable:$true] %s59_s14  ;;  %s22_s16 = int_to_ptr.vmem [resolvable:$true] %s21_s16 }
  0x15   :  { %s2612_s19 = scalar_lea.hbm %s3833_s5, 128 }
  0x16   :  { %p2613_p8 = scmp.ne.s32.totalorder %s3833_s5, %s2612_s19  ;;  %p2616_p9 = scmp.lt.u32.totalorder %s2612_s19, %s3833_s5 }
  0x18   :  { %p2618_p10 = pnand %p2616_p9, %p2613_p8 }
  0x1a   :  { %2621 = shalt.err (!%p2618_p10)
}
  0x1b   :  { %s2622_s3 = scalar_lea.vmem %s60_s14, 128  ;;  %p2627_p12 = scmp.lt.s32.totalorder %s60_s14, %s60_s14 }
  0x1c   :  { %p2623_p11 = scmp.ne.s32.totalorder %s60_s14, %s2622_s3  ;;  %p2628_p13 = scmp.lt.s32.totalorder %s2622_s3, %s2622_s3 }
  0x1e   :  { %p2629_p0 = por %p2628_p13, %p2627_p12 }
  0x20   :  { %p2630_p1 = pnand %p2629_p0, %p2623_p11 }
  0x22   :  { %2633 = shalt.err (!%p2630_p1)
}
  0x23   :  { %s2733_s24 = smov 64   ;;  %s2734_s25 = smov 4  }
  0x24   :  { %65 = dma.hbm_to_vmem [thread:$0]  %s3833_s5, 128, %s60_s14, [#allocation9], %s2733_s24, %s2733_s24, %s2734_s25  }
  0x25   :  { %s2634_s30 = scalar_lea.hbm %s3828_s0, 2048 }
  0x26   :  { %p2635_p2 = scmp.ne.s32.totalorder %s3828_s0, %s2634_s30  ;;  %p2638_p3 = scmp.lt.u32.totalorder %s2634_s30, %s3828_s0 }
  0x28   :  { %p2640_p4 = pnand %p2638_p3, %p2635_p2 }
  0x2a   :  { %2643 = shalt.err (!%p2640_p4)
}
  0x2b   :  { %s2644_s12 = scalar_lea.vmem %s22_s16, 2048  ;;  %p2649_p6 = scmp.lt.s32.totalorder %s22_s16, %s22_s16 }
  0x2c   :  { %p2645_p5 = scmp.ne.s32.totalorder %s22_s16, %s2644_s12  ;;  %p2650_p7 = scmp.lt.s32.totalorder %s2644_s12, %s2644_s12 }
  0x2e   :  { %p2651_p8 = por %p2650_p7, %p2649_p6 }
  0x30   :  { %p2652_p9 = pnand %p2651_p8, %p2645_p5 }
  0x32   :  { %2655 = shalt.err (!%p2652_p9)
}
  0x33   :  { %s2735_s5 = smov 128   ;;  %s2736_s13 = smov 8  }
  0x34   :  { %27 = dma.hbm_to_vmem [thread:$0]  %s3828_s0, 2048, %s22_s16, [#allocation3], %s2735_s5, %s2735_s5, %s2736_s13  }
  0x35   :  { %s2737_s17 = smov [#allocation7]   ;;  %s2738_s19 = smov [#allocation10]  }
  0x36   :  { %s47_s18 = sshll.u32 %s2737_s17, 4  ;;  %s71_s20 = sshll.u32 %s2738_s19, 4  ;;  %s48_s18 = int_to_ptr.vmem [resolvable:$true] %s47_s18  ;;  %s72_s20 = int_to_ptr.vmem [resolvable:$true] %s71_s20 }
  0x37   :  { %s2656_s23 = scalar_lea.hbm %s3832_s4, 128 }
  0x38   :  { %p2657_p10 = scmp.ne.s32.totalorder %s3832_s4, %s2656_s23  ;;  %p2660_p11 = scmp.lt.u32.totalorder %s2656_s23, %s3832_s4 }
  0x3a   :  { %p2662_p12 = pnand %p2660_p11, %p2657_p10 }
  0x3c   :  { %2665 = shalt.err (!%p2662_p12)
}
  0x3d   :  { %s2666_s0 = scalar_lea.vmem %s48_s18, 128  ;;  %p2671_p0 = scmp.lt.s32.totalorder %s48_s18, %s48_s18 }
  0x3e   :  { %p2667_p13 = scmp.ne.s32.totalorder %s48_s18, %s2666_s0  ;;  %p2672_p1 = scmp.lt.s32.totalorder %s2666_s0, %s2666_s0 }
  0x40   :  { %p2673_p2 = por %p2672_p1, %p2671_p0 }
  0x42   :  { %p2674_p3 = pnand %p2673_p2, %p2667_p13 }
  0x44   :  { %2677 = shalt.err (!%p2674_p3)
}
  0x45   :  { %53 = dma.hbm_to_vmem [thread:$0]  %s3832_s4, 128, %s48_s18, [#allocation6], %s2733_s24, %s2733_s24, %s2734_s25  }
  0x46   :  { %s2678_s9 = scalar_lea.hbm %s3834_s6, 256 }
  0x47   :  { %p2679_p4 = scmp.ne.s32.totalorder %s3834_s6, %s2678_s9  ;;  %p2682_p5 = scmp.lt.u32.totalorder %s2678_s9, %s3834_s6 }
  0x49   :  { %p2684_p6 = pnand %p2682_p5, %p2679_p4 }
  0x4b   :  { %2687 = shalt.err (!%p2684_p6)
}
  0x4c   :  { %s2688_s15 = scalar_lea.vmem %s72_s20, 256  ;;  %p2693_p8 = scmp.lt.s32.totalorder %s72_s20, %s72_s20 }
  0x4d   :  { %p2689_p7 = scmp.ne.s32.totalorder %s72_s20, %s2688_s15  ;;  %p2694_p9 = scmp.lt.s32.totalorder %s2688_s15, %s2688_s15 }
  0x4f   :  { %p2695_p10 = por %p2694_p9, %p2693_p8 }
  0x51   :  { %p2696_p11 = pnand %p2695_p10, %p2689_p7 }
  0x53   :  { %2699 = shalt.err (!%p2696_p11)
}
  0x54   :  { %77 = dma.hbm_to_vmem [thread:$0]  %s3834_s6, 256, %s72_s20, [#allocation9], %s2735_s5, %s2735_s5, %s2736_s13  }
  0x55   :  { %2722 = dma.done.wait [#allocation3], 2048  }
  0x56   :  { %2723 = vsyncadd [#allocation3], 4294965248 }
  0x57   :  { %2724 = dma.done.wait [#allocation6], 160  }
  0x58   :  { %2725 = vsyncadd [#allocation6], 4294967136 }
  0x59   :  { %2726 = dma.done.wait [#allocation9], 384  }
  0x5a   :  { %2727 = vsyncadd [#allocation9], 4294966912  ;;  %v2440_v0 = vld [vmem:[%s3830_s2] sm:$0xff]   ;;  %v2857_v2 = vld [vmem:[#allocation2 + $0x8] sm:$0xff]  ;;  %vm162_vm0 = vcmask 130048   ;;  %v152_v59 = vlaneseq  ;;  %vm554_vm1 = vcmask 31744  }
  0x5b   :  { %v2855_v1 = vld [vmem:[#allocation2] sm:$0xff]  ;;  %2419 = vmatprep.subr.bf16.mxu1 %v2440_v0  ;;  %v2861_v4 = vld [vmem:[#allocation2 + $0x48] sm:$0xff]  ;;  %2247 = vmatprep.subr.bf16.mxu0 %v2440_v0  ;;  %v96_v11 = vld [vmem:[#allocation2 + $0x10] sm:$0xff]  ;;  %vm644_vm2 = vcmask 523264   ;;  %vm1125_vm3 = vcmask 1041408  }
  0x5c   :  { %v2859_v3 = vld [vmem:[#allocation2 + $0x40] sm:$0xff]  ;;  %v111_v6 = vld [vmem:[%s3829_s1 + $0x8] sm:$0xff]  ;;  %2420 = vmatpush3.bf16.msra.mxu1 %v2440_v0  ;;  %v97_v12 = vld [vmem:[#allocation2 + $0x18] sm:$0xff]  ;;  %2248 = vmatpush3.bf16.msra.mxu0 %v2440_v0  ;;  %v407_v50 = vpack.c.bf16 %v2857_v2, %v2855_v1  ;;  %v2937_v60 = vshrl.u32 %v152_v59, 7 }
  0x5d   :  { %v110_v5 = vld [vmem:[%s3829_s1] sm:$0xff]  ;;  %v119_v8 = vadd.f32 %v111_v6, %v2857_v2  ;;  %v127_v10 = vadd.f32 %v111_v6, %v2861_v4  ;;  %v2873_v13 = vld [vmem:[#allocation2 + $0x50] sm:$0xff]  ;;  %v2875_v14 = vld [vmem:[#allocation2 + $0x58] sm:$0xff]  ;;  %v408_v52 = vpack.c.bf16 %v97_v12, %v96_v11  ;;  %v411_v55 = vpack.c.bf16 %v2861_v4, %v2859_v3 }
  0x5e   :  { %v118_v7 = vadd.f32 %v110_v5, %v2855_v1  ;;  %v126_v9 = vadd.f32 %v110_v5, %v2859_v3  ;;  %v112_v15 = vld [vmem:[%s3829_s1 + $0x10] sm:$0xff]  ;;  %v113_v16 = vld [vmem:[%s3829_s1 + $0x18] sm:$0xff]  ;;  %v2441_v21 = vld [vmem:[%s3830_s2 + $0x8] sm:$0xff]   ;;  %v412_v56 = vpack.c.bf16 %v2875_v14, %v2873_v13  ;;  %v154_v61 = vsub.s32 0, %v2937_v60 }
  0x5f   :  { %v120_v18 = vadd.f32 %v112_v15, %v96_v11  ;;  %v121_v19 = vadd.f32 %v113_v16, %v97_v12  ;;  %v128_v20 = vadd.f32 %v112_v15, %v2873_v13  ;;  %v129_v22 = vadd.f32 %v113_v16, %v2875_v14  ;;  %v2888_v23 = vld [vmem:[#allocation2 + $0x60] sm:$0xff]  ;;  %v107_v24 = vld [vmem:[#allocation2 + $0x68] sm:$0xff]  ;;  %2265 = vmatprep.subr.bf16.mxu1 %v2441_v21  ;;  %v108_v30 = vld [vmem:[#allocation2 + $0x70] sm:$0xff] }
  0x60   :  { %v148_v17 = vpack.c.bf16 %v127_v10, %v126_v9  ;;  %v114_v25 = vld [vmem:[%s3829_s1 + $0x20] sm:$0xff]  ;;  %v144_v26 = vpack.c.bf16 %v119_v8, %v118_v7  ;;  %v115_v28 = vld [vmem:[%s3829_s1 + $0x28] sm:$0xff]  ;;  %v109_v31 = vld [vmem:[#allocation2 + $0x78] sm:$0xff]  ;;  %v413_v57 = vpack.c.bf16 %v107_v24, %v2888_v23 }
  0x61   :  { %v145_v27 = vpack.c.bf16 %v121_v19, %v120_v18  ;;  %v130_v29 = vadd.f32 %v114_v25, %v2888_v23  ;;  %v149_v32 = vpack.c.bf16 %v129_v22, %v128_v20  ;;  %v131_v33 = vadd.f32 %v115_v28, %v107_v24  ;;  %v116_v34 = vld [vmem:[%s3829_s1 + $0x30] sm:$0xff]  ;;  %v117_v35 = vld [vmem:[%s3829_s1 + $0x38] sm:$0xff]  ;;  %v98_v36 = vld [vmem:[#allocation2 + $0x20] sm:$0xff]  ;;  %s2739_s1 = smov [#allocation11]  }
  0x62   :  { %2257 = vmatprep.mubr.msk.bf16.mxu1 %vm162_vm0, %v148_v17  ;;  %2249 = vmatprep.mubr.msk.bf16.mxu0 %vm162_vm0, %v144_v26  ;;  %v99_v37 = vld [vmem:[#allocation2 + $0x28] sm:$0xff]  ;;  %v122_v38 = vadd.f32 %v114_v25, %v98_v36  ;;  %v100_v39 = vld [vmem:[#allocation2 + $0x30] sm:$0xff]  ;;  %v101_v40 = vld [vmem:[#allocation2 + $0x38] sm:$0xff]  ;;  %v132_v42 = vadd.f32 %v116_v34, %v108_v30  ;;  %v133_v43 = vadd.f32 %v117_v35, %v109_v31 }
  0x63   :  { %2250 = vmatmul.mubr.msk.bf16.vlgmr.msra.gmra.mrb[0].mxu0 %vm162_vm0, %v145_v27  ;;  %2258 = vmatmul.mubr.msk.bf16.vlgmr.msra.gmra.mrb[0].mxu1 %vm162_vm0, %v149_v32  ;;  %v150_v41 = vpack.c.bf16 %v131_v33, %v130_v29  ;;  %v123_v44 = vadd.f32 %v115_v28, %v99_v37  ;;  %v2442_v45 = vld [vmem:[%s3830_s2 + $0x10] sm:$0xff]   ;;  %v124_v46 = vadd.f32 %v116_v34, %v100_v39  ;;  %s2074_s2 = sshll.u32 %s2739_s1, 4  ;;  %s2075_s2 = int_to_ptr.vmem [resolvable:$true] %s2074_s2 }
  0x64   :  { %2266 = vmatpush3.bf16.msra.mxu1 %v2441_v21  ;;  %v125_v47 = vadd.f32 %v117_v35, %v101_v40  ;;  %2283 = vmatprep.subr.bf16.mxu0 %v2442_v45  ;;  %v151_v49 = vpack.c.bf16 %v133_v43, %v132_v42  ;;  %v409_v53 = vpack.c.bf16 %v99_v37, %v98_v36  ;;  %v2940_v62 = vld [vmem:[#allocation10] sm:$0xff]  ;;  %v417_v36 = vsub.s32 2, %v2937_v60  ;;  %s2700_s14 = scalar_lea.vmem %s2075_s2, 2048  ;;  %p2705_p13 = scmp.lt.s32.totalorder %s2075_s2, %s2075_s2 }
  0x65   :  { %2261 = vmatprep.mubr.msk.bf16.mxu1 %vm162_vm0, %v150_v41  ;;  %v146_v48 = vpack.c.bf16 %v123_v44, %v122_v38  ;;  %2284 = vmatpush3.bf16.msra.mxu0 %v2442_v45  ;;  %v410_v54 = vpack.c.bf16 %v101_v40, %v100_v39  ;;  %v414_v58 = vpack.c.bf16 %v109_v31, %v108_v30  ;;  %v302_v44 = vsub.s32 1, %v2937_v60  ;;  %p2701_p12 = scmp.ne.s32.totalorder %s2075_s2, %s2700_s14  ;;  %p2706_p0 = scmp.lt.s32.totalorder %s2700_s14, %s2700_s14 }
  0x66   :  { %v147_v51 = vpack.c.bf16 %v125_v47, %v124_v46  ;;  %v155_v63 = vrot.slane %v2940_v62, %v154_v61 }
  0x67   :  { %2253 = vmatprep.mubr.msk.bf16.mxu0 %vm162_vm0, %v146_v48  ;;  %p2707_p1 = por %p2706_p0, %p2705_p13 }
  0x69   :  { %p2708_p2 = pnand %p2707_p1, %p2701_p12 }
  0x6b   :  { %2254 = vmatmul.mubr.msk.bf16.gmra.mrb[4].mxu0 %vm162_vm0, %v147_v51  ;;  %2262 = vmatmul.mubr.msk.bf16.gmra.mrb[4].mxu1 %vm162_vm0, %v151_v49 }
  0x6c   :  { %2285 = vmatprep.mubr.msk.bf16.mxu0 %vm162_vm0, %v407_v50  ;;  %2267 = vmatprep.mubr.msk.bf16.mxu1 %vm162_vm0, %v144_v26 }
  0x73   :  { %2286 = vmatmul.mubr.msk.bf16.vlgmr.msra.gmra.mrb[8].mxu0 %vm162_vm0, %v408_v52  ;;  %2268 = vmatmul.mubr.msk.bf16.vlgmr.msra.gmra.mrb[8].mxu1 %vm162_vm0, %v145_v27  ;;  %v2974_v52 = vrot.slane %v2940_v62, %v417_v36 }
  0x74   :  { %2289 = vmatprep.mubr.msk.bf16.mxu0 %vm162_vm0, %v409_v53  ;;  %2271 = vmatprep.mubr.msk.bf16.mxu1 %vm162_vm0, %v146_v48 }
  0x7b   :  { %2290 = vmatmul.mubr.msk.bf16.gmra.mrb[12].mxu0 %vm162_vm0, %v410_v54  ;;  %2272 = vmatmul.mubr.msk.bf16.gmra.mrb[12].mxu1 %vm162_vm0, %v147_v51 }
  0x7c   :  { %2275 = vmatprep.mubr.msk.bf16.mxu1 %vm162_vm0, %v148_v17  ;;  %2293 = vmatprep.mubr.msk.bf16.mxu0 %vm162_vm0, %v411_v55 }
  0x83   :  { %2276 = vmatmul.mubr.msk.bf16.gmra.mrb[16].mxu1 %vm162_vm0, %v149_v32  ;;  %2294 = vmatmul.mubr.msk.bf16.gmra.mrb[16].mxu0 %vm162_vm0, %v412_v56 }
  0x84   :  { %2279 = vmatprep.mubr.msk.bf16.mxu1 %vm162_vm0, %v150_v41  ;;  %2297 = vmatprep.mubr.msk.bf16.mxu0 %vm162_vm0, %v413_v57  ;;  %v2987_v57 = vrot.slane %v2940_v62, %v302_v44 }
  0x8b   :  { %2280 = vmatmul.mubr.msk.bf16.gmra.mrb[20].mxu1 %vm162_vm0, %v151_v49  ;;  %2298 = vmatmul.mubr.msk.bf16.gmra.mrb[20].mxu0 %vm162_vm0, %v414_v58 }
 0x136   :  { %v2251_v0 = vpop.f32.mrb[0].mxu0  ;;  %v2259_v1 = vpop.f32.mrb[0].mxu1 }
 0x137   :  { %v230_v2 = vadd.f32 %v2251_v0, %v155_v63  ;;  %v221_v3 = vpop.f32.mrb[1].mxu0  ;;  %v262_v4 = vadd.f32 %v2259_v1, %v155_v63  ;;  %v253_v5 = vpop.f32.mrb[1].mxu1 }
 0x138   :  { %v222_v6 = vadd.f32 %v221_v3, %v155_v63  ;;  %v2252_v7 = vpop.f32.mrb[2].mxu0  ;;  %v254_v8 = vadd.f32 %v253_v5, %v155_v63  ;;  %v2260_v9 = vpop.f32.mrb[2].mxu1 }
 0x139   :  { %v2945_v10 = vmul.f32 0.5, %v230_v2  ;;  %v233_v11 = vadd.f32 %v2252_v7, %v155_v63  ;;  %v224_v12 = vpop.f32.mrb[3].mxu0  ;;  %v265_v13 = vadd.f32 %v2260_v9, %v155_v63  ;;  %v256_v14 = vpop.f32.mrb[3].mxu1  ;;  %v2949_v19 = vmul.f32 0.5, %v262_v4 }
 0x13a   :  { %v284_v15 = vmul.f32 0.5, %v222_v6  ;;  %v225_v16 = vadd.f32 %v224_v12, %v155_v63  ;;  %v257_v17 = vadd.f32 %v256_v14, %v155_v63  ;;  %v292_v22 = vmul.f32 0.5, %v254_v8 }
 0x13b   :  { %v2947_v18 = vmul.f32 0.5, %v233_v11  ;;  %v2951_v20 = vmul.f32 0.5, %v265_v13 }
 0x13c   :  { %v285_v21 = vmul.f32 0.5, %v225_v16  ;;  %v293_v23 = vmul.f32 0.5, %v257_v17 }
 0x13d   :  { %v547_v24 = vpack.c.bf16 %v2947_v18, %v2945_v10  ;;  %v819_v25 = vpack.c.bf16 %v2951_v20, %v2949_v19 }
 0x13e   :  { %v546_v26 = vpack.c.bf16 %v285_v21, %v284_v15  ;;  %v2255_v27 = vpop.f32.mrb[4].mxu0  ;;  %v818_v28 = vpack.c.bf16 %v293_v23, %v292_v22  ;;  %v2263_v29 = vpop.f32.mrb[4].mxu1 }
 0x13f   :  { %v246_v30 = vadd.f32 %v2255_v27, %v155_v63  ;;  %v237_v31 = vpop.f32.mrb[5].mxu0  ;;  %v278_v32 = vadd.f32 %v2263_v29, %v155_v63  ;;  %v269_v33 = vpop.f32.mrb[5].mxu1 }
 0x140   :  { %2309 = vmatprep.mubr.msk.bf16.mxu1 %vm554_vm1, %v546_v26  ;;  %v238_v34 = vadd.f32 %v237_v31, %v155_v63  ;;  %v2256_v35 = vpop.f32.mrb[6].mxu0  ;;  %v270_v37 = vadd.f32 %v269_v33, %v155_v63  ;;  %v2264_v38 = vpop.f32.mrb[6].mxu1  ;;  %2341 = vmatprep.mubr.msk.bf16.mxu0 %vm554_vm1, %v818_v28 }
 0x141   :  { %v2960_v39 = vmul.f32 0.5, %v246_v30  ;;  %v249_v40 = vadd.f32 %v2256_v35, %v155_v63  ;;  %v240_v41 = vpop.f32.mrb[7].mxu0  ;;  %v281_v42 = vadd.f32 %v2264_v38, %v155_v63  ;;  %v272_v43 = vpop.f32.mrb[7].mxu1  ;;  %v2967_v49 = vmul.f32 0.5, %v278_v32 }
 0x142   :  { %v2963_v45 = vmul.f32 0.5, %v238_v34  ;;  %v241_v46 = vadd.f32 %v240_v41, %v155_v63  ;;  %v273_v47 = vadd.f32 %v272_v43, %v155_v63  ;;  %v2976_v53 = vmul.f32 0.5, %v270_v37 }
 0x143   :  { %v2965_v48 = vmul.f32 0.5, %v249_v40  ;;  %v2969_v50 = vmul.f32 0.5, %v281_v42 }
 0x144   :  { %v2971_v51 = vmul.f32 0.5, %v241_v46  ;;  %v2978_v54 = vmul.f32 0.5, %v273_v47 }
 0x145   :  { %v549_v55 = vpack.c.bf16 %v2965_v48, %v2960_v39  ;;  %v821_v56 = vpack.c.bf16 %v2969_v50, %v2967_v49 }
 0x146   :  { %v548_v58 = vpack.c.bf16 %v2971_v51, %v2963_v45  ;;  %v2287_v59 = vpop.f32.mrb[8].mxu0  ;;  %v820_v63 = vpack.c.bf16 %v2978_v54, %v2976_v53  ;;  %v2269_v0 = vpop.f32.mrb[8].mxu1 }
 0x147   :  { %v492_v1 = vadd.f32 %v2287_v59, %v2974_v52  ;;  %v483_v2 = vpop.f32.mrb[9].mxu0  ;;  %v344_v3 = vpop.f32.mrb[9].mxu1  ;;  %v353_v9 = vadd.f32 %v2269_v0, %v2987_v57 }
 0x148   :  { %v484_v4 = vadd.f32 %v483_v2, %v2974_v52  ;;  %v2288_v5 = vpop.f32.mrb[10].mxu0  ;;  %v2270_v6 = vpop.f32.mrb[10].mxu1  ;;  %v345_v14 = vadd.f32 %v344_v3, %v2987_v57 }
 0x149   :  { %v495_v7 = vadd.f32 %v2288_v5, %v2974_v52  ;;  %v486_v8 = vpop.f32.mrb[11].mxu0  ;;  %v356_v11 = vadd.f32 %v2270_v6, %v2987_v57  ;;  %v347_v12 = vpop.f32.mrb[11].mxu1 }
 0x14a   :  { %v487_v13 = vadd.f32 %v486_v8, %v2974_v52  ;;  %v348_v15 = vadd.f32 %v347_v12, %v2987_v57 }
 0x14b   :  { %v3001_v16 = vpack.c.bf16 %v495_v7, %v492_v1  ;;  %v551_v17 = vpack.c.bf16 %v356_v11, %v353_v9 }
 0x14c   :  { %v3003_v21 = vpack.c.bf16 %v487_v13, %v484_v4  ;;  %v550_v22 = vpack.c.bf16 %v348_v15, %v345_v14 }
 0x14d   :  { %v571_v1 = vsel %vm554_vm1, %v551_v17, 0 }
 0x14e   :  { %v2291_v23 = vpop.f32.mrb[12].mxu0  ;;  %v2273_v26 = vpop.f32.mrb[12].mxu1  ;;  %2421 = vmatprep.subr.msk.bf16.mxu1 %vm554_vm1, %v550_v22  ;;  %v568_v27 = vsel %vm554_vm1, %v550_v22, 0 }
 0x14f   :  { %v508_v28 = vadd.f32 %v2291_v23, %v2974_v52  ;;  %v499_v29 = vpop.f32.mrb[13].mxu0  ;;  %v369_v30 = vadd.f32 %v2273_v26, %v2987_v57  ;;  %v360_v31 = vpop.f32.mrb[13].mxu1  ;;  %2302 = vmatpush3.bf16.xpose.msra.mxu1 %v568_v27 }
 0x150   :  { %v500_v32 = vadd.f32 %v499_v29, %v2974_v52  ;;  %v2292_v33 = vpop.f32.mrb[14].mxu0  ;;  %v361_v34 = vadd.f32 %v360_v31, %v2987_v57  ;;  %v2274_v35 = vpop.f32.mrb[14].mxu1  ;;  %2422 = vmatprep.subr.msk.bf16.mxu1 %vm554_vm1, %v551_v17 }
 0x151   :  { %v511_v36 = vadd.f32 %v2292_v33, %v2974_v52  ;;  %v502_v37 = vpop.f32.mrb[15].mxu0  ;;  %v372_v38 = vadd.f32 %v2274_v35, %v2987_v57  ;;  %v363_v40 = vpop.f32.mrb[15].mxu1 }
 0x152   :  { %v503_v41 = vadd.f32 %v502_v37, %v2974_v52  ;;  %v364_v42 = vadd.f32 %v363_v40, %v2987_v57 }
 0x153   :  { %v740_v43 = vpack.c.bf16 %v511_v36, %v508_v28  ;;  %v553_v46 = vpack.c.bf16 %v372_v38, %v369_v30 }
 0x154   :  { %v739_v47 = vpack.c.bf16 %v503_v41, %v500_v32  ;;  %v552_v59 = vpack.c.bf16 %v364_v42, %v361_v34 }
 0x155   :  { %v577_v31 = vsel %vm554_vm1, %v553_v46, 0 }
 0x156   :  { %v2277_v0 = vpop.f32.mrb[16].mxu1  ;;  %v574_v12 = vsel %vm554_vm1, %v552_v59, 0  ;;  %v2295_v18 = vpop.f32.mrb[16].mxu0 }
 0x157   :  { %v385_v2 = vadd.f32 %v2277_v0, %v2987_v57  ;;  %v376_v3 = vpop.f32.mrb[17].mxu1  ;;  %2304 = vmatpush3.bf16.xpose.msra.mxu1 %v571_v1  ;;  %v515_v39 = vpop.f32.mrb[17].mxu0 }
 0x158   :  { %v377_v4 = vadd.f32 %v376_v3, %v2987_v57  ;;  %v2278_v5 = vpop.f32.mrb[18].mxu1  ;;  %2423 = vmatprep.subr.msk.bf16.mxu1 %vm554_vm1, %v552_v59  ;;  %v516_v45 = vadd.f32 %v515_v39, %v2974_v52  ;;  %v2296_v48 = vpop.f32.mrb[18].mxu0 }
 0x159   :  { %v388_v6 = vadd.f32 %v2278_v5, %v2987_v57  ;;  %v379_v7 = vpop.f32.mrb[19].mxu1  ;;  %v527_v19 = vadd.f32 %v2296_v48, %v2974_v52  ;;  %v518_v20 = vpop.f32.mrb[19].mxu0 }
 0x15a   :  { %v380_v8 = vadd.f32 %v379_v7, %v2987_v57 }
 0x15b   :  { %v823_v9 = vpack.c.bf16 %v388_v6, %v385_v2 }
 0x15c   :  { %v822_v11 = vpack.c.bf16 %v380_v8, %v377_v4 }
 0x15d   :  { %v842_v32 = vsel %vm554_vm1, %v823_v9, 0 }
 0x15e   :  { %2425 = vmatprep.subr.msk.bf16.mxu0 %vm554_vm1, %v822_v11  ;;  %v839_v13 = vsel %vm554_vm1, %v822_v11, 0  ;;  %v2281_v14 = vpop.f32.mrb[20].mxu1  ;;  %v2299_v54 = vpop.f32.mrb[20].mxu0 }
 0x15f   :  { %2306 = vmatpush3.bf16.xpose.msra.mxu1 %v574_v12  ;;  %2334 = vmatpush3.bf16.xpose.msra.mxu0 %v839_v13  ;;  %v401_v15 = vadd.f32 %v2281_v14, %v2987_v57  ;;  %v392_v17 = vpop.f32.mrb[21].mxu1  ;;  %v540_v49 = vadd.f32 %v2299_v54, %v2974_v52  ;;  %v531_v50 = vpop.f32.mrb[21].mxu0 }
 0x160   :  { %2424 = vmatprep.subr.msk.bf16.mxu1 %vm554_vm1, %v553_v46  ;;  %2426 = vmatprep.subr.msk.bf16.mxu0 %vm554_vm1, %v823_v9  ;;  %v393_v22 = vadd.f32 %v392_v17, %v2987_v57  ;;  %v2282_v23 = vpop.f32.mrb[22].mxu1 }
 0x161   :  { %v404_v26 = vadd.f32 %v2282_v23, %v2987_v57  ;;  %v395_v27 = vpop.f32.mrb[23].mxu1 }
 0x162   :  { %v396_v28 = vadd.f32 %v395_v27, %v2987_v57 }
 0x163   :  { %v825_v29 = vpack.c.bf16 %v404_v26, %v401_v15 }
 0x164   :  { %v824_v30 = vpack.c.bf16 %v396_v28, %v393_v22 }
 0x165   :  { %v848_v10 = vsel %vm554_vm1, %v825_v29, 0 }
 0x166   :  { %v845_v33 = vsel %vm554_vm1, %v824_v30, 0 }
 0x167   :  { %2308 = vmatpush3.bf16.xpose.msra.mxu1 %v577_v31  ;;  %2336 = vmatpush3.bf16.xpose.msra.mxu0 %v842_v32 }
 0x168   :  { %2427 = vmatprep.subr.msk.bf16.mxu0 %vm554_vm1, %v824_v30  ;;  %2317 = vmatprep.subr.bf16.mxu1 %v3003_v21 }
 0x16e   :  { %2310 = vmatmul.mubr.msk.bf16.vlgmr.msra.gmra.mrb[24].mxu1 %vm554_vm1, %v547_v24  ;;  %v524_v24 = vadd.f32 %v2295_v18, %v2974_v52 }
 0x16f   :  { %2338 = vmatpush3.bf16.xpose.msra.mxu0 %v845_v33  ;;  %2313 = vmatprep.mubr.msk.bf16.mxu1 %vm554_vm1, %v548_v58 }
 0x170   :  { %2428 = vmatprep.subr.msk.bf16.mxu0 %vm554_vm1, %v825_v29  ;;  %2318 = vmatpush3.bf16.msra.mxu1 %v3003_v21  ;;  %v3069_v51 = vpack.c.bf16 %v527_v19, %v524_v24 }
 0x171   :  { %2319 = vmatprep.subr.bf16.mxu1 %v3001_v16 }
 0x174   :  { %2320 = vmatpush3.bf16.msra.mxu1 %v3001_v16 }
 0x175   :  { %2321 = vmatprep.subr.bf16.mxu1 %v739_v47 }
 0x176   :  { %2314 = vmatmul.mubr.msk.bf16.gmra.mrb[28].mxu1 %vm554_vm1, %v549_v55  ;;  %v532_v55 = vadd.f32 %v531_v50, %v2974_v52 }
 0x177   :  { %2340 = vmatpush3.bf16.xpose.msra.mxu0 %v848_v10 }
 0x178   :  { %2322 = vmatpush3.bf16.msra.mxu1 %v739_v47 }
 0x179   :  { %2323 = vmatprep.subr.bf16.mxu1 %v740_v43 }
 0x17c   :  { %2324 = vmatpush3.bf16.msra.mxu1 %v740_v43 }
 0x17e   :  { %2342 = vmatmul.mubr.msk.bf16.vlgmr.msra.gmra.mrb[24].mxu0 %vm554_vm1, %v819_v25  ;;  %v519_v25 = vadd.f32 %v518_v20, %v2974_v52 }
 0x17f   :  { %2345 = vmatprep.mubr.msk.bf16.mxu0 %vm554_vm1, %v820_v63 }
 0x180   :  { %v3071_v53 = vpack.c.bf16 %v519_v25, %v516_v45 }
 0x182   :  { %2349 = vmatprep.subr.bf16.mxu1 %v3071_v53 }
 0x186   :  { %2346 = vmatmul.mubr.msk.bf16.gmra.mrb[28].mxu0 %vm554_vm1, %v821_v56  ;;  %v2300_v56 = vpop.f32.mrb[22].mxu0 }
 0x187   :  { %v543_v57 = vadd.f32 %v2300_v56, %v2974_v52  ;;  %v534_v58 = vpop.f32.mrb[23].mxu0 }
 0x188   :  { %v535_v63 = vadd.f32 %v534_v58, %v2974_v52 }
 0x189   :  { %v3078_v16 = vpack.c.bf16 %v543_v57, %v540_v49 }
 0x18a   :  { %v3080_v21 = vpack.c.bf16 %v535_v63, %v532_v55 }
 0x241   :  { %v2311_v34 = vpop.f32.mrb[24].mxu1 }
 0x242   :  { %v613_v35 = vpop.f32.mrb[25].mxu1  ;;  %v651_v36 = vsel %vm644_vm2, %v2311_v34, -inf }
 0x243   :  { %652 = vmax.xlane.f32.xlu1 %v651_v36  ;;  %v2312_v37 = vpop.f32.mrb[26].mxu1  ;;  %v645_v38 = vsel %vm644_vm2, %v613_v35, -inf }
 0x244   :  { %646 = vmax.xlane.f32.xlu0 %v645_v38  ;;  %v616_v40 = vpop.f32.mrb[27].mxu1  ;;  %v654_v41 = vsel %vm644_vm2, %v2312_v37, -inf }
 0x245   :  { %v648_v52 = vsel %vm644_vm2, %v616_v40, -inf }
 0x247   :  { %655 = vmax.xlane.f32.xlu1 %v654_v41 }
 0x248   :  { %649 = vmax.xlane.f32.xlu0 %v648_v52 }
 0x249   :  { %v3086_v42 = vpop.f32.mrb[28].mxu1 }
 0x24a   :  { %v629_v43 = vpop.f32.mrb[29].mxu1  ;;  %v663_v1 = vsel %vm644_vm2, %v3086_v42, -inf }
 0x24b   :  { %v3088_v46 = vpop.f32.mrb[30].mxu1  ;;  %v657_v47 = vsel %vm644_vm2, %v629_v43, -inf }
 0x24c   :  { %658 = vmax.xlane.f32.xlu0 %v657_v47  ;;  %v632_v59 = vpop.f32.mrb[31].mxu1  ;;  %v666_v3 = vsel %vm644_vm2, %v3088_v46, -inf }
 0x24d   :  { %v660_v0 = vsel %vm644_vm2, %v632_v59, -inf }
 0x24e   :  { %661 = vmax.xlane.f32.xlu1 %v660_v0 }
 0x250   :  { %664 = vmax.xlane.f32.xlu0 %v663_v1 }
 0x251   :  { %v3094_v2 = vpop.f32.mrb[24].mxu0 }
 0x252   :  { %v3098_v4 = vpop.f32.mrb[25].mxu0  ;;  %667 = vmax.xlane.f32.xlu1 %v666_v3  ;;  %v921_v9 = vsel %vm644_vm2, %v3094_v2, -inf }
 0x253   :  { %v3100_v5 = vpop.f32.mrb[26].mxu0  ;;  %v915_v6 = vsel %vm644_vm2, %v3098_v4, -inf }
 0x254   :  { %v3104_v7 = vpop.f32.mrb[27].mxu0  ;;  %916 = vmax.xlane.f32.xlu0 %v915_v6  ;;  %v924_v12 = vsel %vm644_vm2, %v3100_v5, -inf }
 0x255   :  { %v918_v8 = vsel %vm644_vm2, %v3104_v7, -inf }
 0x256   :  { %919 = vmax.xlane.f32.xlu1 %v918_v8 }
 0x258   :  { %922 = vmax.xlane.f32.xlu0 %v921_v9 }
 0x259   :  { %v3110_v11 = vpop.f32.mrb[28].mxu0 }
 0x25a   :  { %v3114_v13 = vpop.f32.mrb[29].mxu0  ;;  %925 = vmax.xlane.f32.xlu1 %v924_v12  ;;  %v933_v23 = vsel %vm644_vm2, %v3110_v11, -inf }
 0x25b   :  { %v3116_v14 = vpop.f32.mrb[30].mxu0  ;;  %v927_v15 = vsel %vm644_vm2, %v3114_v13, -inf }
 0x25c   :  { %v3120_v17 = vpop.f32.mrb[31].mxu0  ;;  %928 = vmax.xlane.f32.xlu0 %v927_v15  ;;  %v936_v26 = vsel %vm644_vm2, %v3116_v14, -inf }
 0x25d   :  { %v930_v22 = vsel %vm644_vm2, %v3120_v17, -inf }
 0x25e   :  { %931 = vmax.xlane.f32.xlu1 %v930_v22 }
 0x260   :  { %934 = vmax.xlane.f32.xlu0 %v933_v23 }
 0x262   :  { %937 = vmax.xlane.f32.xlu1 %v936_v26 }
 0x2d0   :  { %v653_v27 = vpop.xlane.xlu1 %652 }
 0x2d1   :  { %v671_v28 = vsub.f32 %v2311_v34, %v653_v27  ;;  %v647_v29 = vpop.xlane.xlu0 %646 }
 0x2d2   :  { %v669_v30 = vsub.f32 %v613_v35, %v647_v29 }
 0x2d3   :  { %v681_v31 = vmul.f32 1.442695, %v671_v28 }
 0x2d4   :  { %v677_v32 = vmul.f32 1.442695, %v669_v30  ;;  %v656_v33 = vpop.xlane.xlu1 %655 }
 0x2d5   :  { %v672_v10 = vsub.f32 %v2312_v37, %v656_v33  ;;  %v650_v18 = vpop.xlane.xlu0 %649 }
 0x2d6   :  { %2445 = vpow2.f32 %v677_v32  ;;  %v670_v24 = vsub.f32 %v616_v40, %v650_v18 }
 0x2d7   :  { %2447 = vpow2.f32 %v681_v31  ;;  %v683_v39 = vmul.f32 1.442695, %v672_v10 }
 0x2d8   :  { %v679_v45 = vmul.f32 1.442695, %v670_v24 }
 0x2d9   :  { %v659_v48 = vpop.xlane.xlu0 %658 }
 0x2da   :  { %2449 = vpow2.f32 %v679_v45  ;;  %v673_v19 = vsub.f32 %v629_v43, %v659_v48 }
 0x2db   :  { %v662_v20 = vpop.xlane.xlu1 %661  ;;  %2451 = vpow2.f32 %v683_v39 }
 0x2dc   :  { %v685_v25 = vmul.f32 1.442695, %v673_v19  ;;  %v674_v54 = vsub.f32 %v632_v59, %v662_v20 }
 0x2dd   :  { %v665_v49 = vpop.xlane.xlu0 %664 }
 0x2de   :  { %2453 = vpow2.f32 %v685_v25  ;;  %v687_v50 = vmul.f32 1.442695, %v674_v54  ;;  %v675_v55 = vsub.f32 %v3086_v42, %v665_v49 }
 0x2df   :  { %v668_v56 = vpop.xlane.xlu1 %667 }
 0x2e0   :  { %v3129_v57 = vpop.eup %2445  ;;  %2455 = vpow2.f32 %v687_v50  ;;  %v689_v58 = vmul.f32 1.442695, %v675_v55  ;;  %v676_v63 = vsub.f32 %v3088_v46, %v668_v56 }
 0x2e1   :  { %v917_v34 = vpop.xlane.xlu0 %916  ;;  %v693_v35 = vsel %vm644_vm2, %v3129_v57, 0.0  ;;  %v3134_v36 = vpop.eup %2447 }
 0x2e2   :  { %2457 = vpow2.f32 %v689_v58  ;;  %v691_v37 = vmul.f32 1.442695, %v676_v63  ;;  %v939_v38 = vsub.f32 %v3098_v4, %v917_v34  ;;  %694 = vadd.xlane.f32.xlu0 %v693_v35  ;;  %v699_v46 = vsel %vm644_vm2, %v3134_v36, 0.0  ;;  %v1088_v35 = vld [vmem:[#allocation5] sm:$0x3] }
 0x2e3   :  { %v920_v40 = vpop.xlane.xlu1 %919  ;;  %2429 = vmatprep.subr.msk.bf16.mxu0 %vm1125_vm3, %v1088_v35 }
 0x2e4   :  { %v3137_v41 = vpop.eup %2449  ;;  %2459 = vpow2.f32 %v691_v37  ;;  %v947_v52 = vmul.f32 1.442695, %v939_v38  ;;  %v940_v42 = vsub.f32 %v3104_v7, %v920_v40  ;;  %v1127_v37 = vsel %vm1125_vm3, %v1088_v35, 0 }
 0x2e5   :  { %v923_v43 = vpop.xlane.xlu0 %922  ;;  %v696_v47 = vsel %vm644_vm2, %v3137_v41, 0.0  ;;  %v3144_v59 = vpop.eup %2451  ;;  %2366 = vmatpush3.bf16.msra.mxu0 %v1127_v37 }
 0x2e6   :  { %2461 = vpow2.f32 %v947_v52  ;;  %v949_v0 = vmul.f32 1.442695, %v940_v42  ;;  %v941_v1 = vsub.f32 %v3094_v2, %v923_v43  ;;  %700 = vadd.xlane.f32.xlu0 %v699_v46  ;;  %697 = vadd.xlane.f32.xlu1 %v696_v47  ;;  %v702_v12 = vsel %vm644_vm2, %v3144_v59, 0.0 }
 0x2e7   :  { %v926_v3 = vpop.xlane.xlu1 %925 }
 0x2e8   :  { %v3147_v4 = vpop.eup %2453  ;;  %2463 = vpow2.f32 %v949_v0  ;;  %v951_v6 = vmul.f32 1.442695, %v941_v1  ;;  %v942_v7 = vsub.f32 %v3100_v5, %v926_v3 }
 0x2e9   :  { %v929_v8 = vpop.xlane.xlu0 %928  ;;  %v705_v9 = vsel %vm644_vm2, %v3147_v4, 0.0 }
 0x2ea   :  { %v3154_v15 = vpop.eup %2455  ;;  %2465 = vpow2.f32 %v951_v6  ;;  %v953_v2 = vmul.f32 1.442695, %v942_v7  ;;  %v943_v22 = vsub.f32 %v3114_v13, %v929_v8  ;;  %706 = vadd.xlane.f32.xlu0 %v705_v9  ;;  %703 = vadd.xlane.f32.xlu1 %v702_v12 }
 0x2eb   :  { %v932_v23 = vpop.xlane.xlu1 %931  ;;  %v708_v30 = vsel %vm644_vm2, %v3154_v15, 0.0 }
 0x2ec   :  { %v3157_v26 = vpop.eup %2457  ;;  %2467 = vpow2.f32 %v953_v2  ;;  %v955_v5 = vmul.f32 1.442695, %v943_v22  ;;  %v944_v27 = vsub.f32 %v3120_v17, %v932_v23 }
 0x2ed   :  { %v935_v28 = vpop.xlane.xlu0 %934  ;;  %v711_v29 = vsel %vm644_vm2, %v3157_v26, 0.0 }
 0x2ee   :  { %v3164_v31 = vpop.eup %2459  ;;  %2469 = vpow2.f32 %v955_v5  ;;  %v957_v13 = vmul.f32 1.442695, %v944_v27  ;;  %v945_v32 = vsub.f32 %v3110_v11, %v935_v28  ;;  %712 = vadd.xlane.f32.xlu0 %v711_v29  ;;  %709 = vadd.xlane.f32.xlu1 %v708_v30 }
 0x2ef   :  { %v938_v33 = vpop.xlane.xlu1 %937  ;;  %v714_v39 = vsel %vm644_vm2, %v3164_v31, 0.0 }
 0x2f0   :  { %v3167_v10 = vpop.eup %2461  ;;  %2471 = vpow2.f32 %v957_v13  ;;  %v959_v17 = vmul.f32 1.442695, %v945_v32  ;;  %v946_v18 = vsub.f32 %v3116_v14, %v938_v33 }
 0x2f1   :  { %v963_v24 = vsel %vm644_vm2, %v3167_v10, 0.0 }
 0x2f2   :  { %v3174_v45 = vpop.eup %2463  ;;  %2473 = vpow2.f32 %v959_v17  ;;  %v961_v48 = vmul.f32 1.442695, %v946_v18  ;;  %964 = vadd.xlane.f32.xlu0 %v963_v24  ;;  %715 = vadd.xlane.f32.xlu1 %v714_v39 }
 0x2f3   :  { %v966_v14 = vsel %vm644_vm2, %v3174_v45, 0.0 }
 0x2f4   :  { %v3176_v11 = vpop.eup %2465  ;;  %2475 = vpow2.f32 %v961_v48 }
 0x2f5   :  { %v969_v19 = vsel %vm644_vm2, %v3176_v11, 0.0 }
 0x2f6   :  { %v3182_v20 = vpop.eup %2467  ;;  %970 = vadd.xlane.f32.xlu0 %v969_v19  ;;  %967 = vadd.xlane.f32.xlu1 %v966_v14 }
 0x2f7   :  { %v972_v49 = vsel %vm644_vm2, %v3182_v20, 0.0 }
 0x2f8   :  { %v3184_v25 = vpop.eup %2469 }
 0x2f9   :  { %v975_v54 = vsel %vm644_vm2, %v3184_v25, 0.0 }
 0x2fa   :  { %v3190_v50 = vpop.eup %2471  ;;  %976 = vadd.xlane.f32.xlu0 %v975_v54  ;;  %973 = vadd.xlane.f32.xlu1 %v972_v49 }
 0x2fb   :  { %v978_v58 = vsel %vm644_vm2, %v3190_v50, 0.0 }
 0x2fc   :  { %v3192_v55 = vpop.eup %2473 }
 0x2fd   :  { %v981_v56 = vsel %vm644_vm2, %v3192_v55, 0.0 }
 0x2fe   :  { %v3198_v63 = vpop.eup %2475  ;;  %982 = vadd.xlane.f32.xlu0 %v981_v56  ;;  %979 = vadd.xlane.f32.xlu1 %v978_v58 }
 0x2ff   :  { %v984_v34 = vsel %vm644_vm2, %v3198_v63, 0.0 }
 0x302   :  { %985 = vadd.xlane.f32.xlu1 %v984_v34 }
 0x36f   :  { %v695_v38 = vpop.xlane.xlu0 %694 }
 0x370   :  { %2477 = vrcp.f32 %v695_v38 }
 0x373   :  { %v701_v40 = vpop.xlane.xlu0 %700  ;;  %v698_v52 = vpop.xlane.xlu1 %697 }
 0x374   :  { %2479 = vrcp.f32 %v698_v52 }
 0x375   :  { %2481 = vrcp.f32 %v701_v40 }
 0x377   :  { %v707_v42 = vpop.xlane.xlu0 %706  ;;  %v704_v43 = vpop.xlane.xlu1 %703 }
 0x378   :  { %2483 = vrcp.f32 %v704_v43 }
 0x379   :  { %2485 = vrcp.f32 %v707_v42 }
 0x37a   :  { %v2478_v0 = vpop.eup %2477 }
 0x37b   :  { %v713_v46 = vpop.xlane.xlu0 %712  ;;  %v710_v47 = vpop.xlane.xlu1 %709  ;;  %v725_v7 = vmul.f32 %v2478_v0, %v3129_v57 }
 0x37c   :  { %2487 = vrcp.f32 %v710_v47 }
 0x37d   :  { %2489 = vrcp.f32 %v713_v46 }
 0x37e   :  { %v2480_v1 = vpop.eup %2479 }
 0x37f   :  { %v965_v3 = vpop.xlane.xlu0 %964  ;;  %v716_v6 = vpop.xlane.xlu1 %715  ;;  %v726_v8 = vmul.f32 %v2480_v1, %v3137_v41 }
 0x380   :  { %v2482_v9 = vpop.eup %2481  ;;  %2491 = vrcp.f32 %v716_v6 }
 0x381   :  { %v733_v12 = vpack.c.bf16 %v726_v8, %v725_v7  ;;  %2493 = vrcp.f32 %v965_v3  ;;  %v727_v5 = vmul.f32 %v2482_v9, %v3134_v36 }
 0x382   :  { %v2484_v2 = vpop.eup %2483 }
 0x383   :  { %v971_v22 = vpop.xlane.xlu0 %970  ;;  %v968_v23 = vpop.xlane.xlu1 %967  ;;  %v728_v27 = vmul.f32 %v2484_v2, %v3144_v59  ;;  %2325 = vmatprep.mubr.msk.bf16.mxu1 %vm644_vm2, %v733_v12 }
 0x384   :  { %v2486_v28 = vpop.eup %2485  ;;  %2495 = vrcp.f32 %v968_v23 }
 0x385   :  { %v734_v29 = vpack.c.bf16 %v728_v27, %v727_v5  ;;  %2497 = vrcp.f32 %v971_v22  ;;  %v729_v13 = vmul.f32 %v2486_v28, %v3147_v4  ;;  %v1099_v28 = vsub.s32 3, %v2937_v60 }
 0x386   :  { %v2488_v30 = vpop.eup %2487 }
 0x387   :  { %v977_v57 = vpop.xlane.xlu0 %976  ;;  %v974_v41 = vpop.xlane.xlu1 %973  ;;  %2326 = vmatmul.mubr.msk.bf16.vlgmr.msra.gmra.mrb[32].mxu1 %vm644_vm2, %v734_v29  ;;  %v730_v32 = vmul.f32 %v2488_v30, %v3154_v15  ;;  %v3243_v29 = vrot.slane %v2940_v62, %v1099_v28  ;;  %v2574_v62 = vld [vmem:[#allocation2 + $0x8] sm:$0xff] }
 0x388   :  { %v2490_v33 = vpop.eup %2489  ;;  %2350 = vmatpush3.bf16.msra.mxu1 %v3071_v53  ;;  %2499 = vrcp.f32 %v974_v41 }
 0x389   :  { %2351 = vmatprep.subr.bf16.mxu1 %v3069_v51  ;;  %v735_v36 = vpack.c.bf16 %v730_v32, %v729_v13  ;;  %2501 = vrcp.f32 %v977_v57  ;;  %v731_v24 = vmul.f32 %v2490_v33, %v3157_v26 }
 0x38a   :  { %v2492_v59 = vpop.eup %2491 }
 0x38b   :  { %v983_v17 = vpop.xlane.xlu0 %982  ;;  %v980_v18 = vpop.xlane.xlu1 %979  ;;  %2329 = vmatprep.mubr.msk.bf16.mxu1 %vm644_vm2, %v735_v36  ;;  %v732_v39 = vmul.f32 %v2492_v59, %v3164_v31 }
 0x38c   :  { %v2494_v4 = vpop.eup %2493  ;;  %2352 = vmatpush3.bf16.msra.mxu1 %v3069_v51  ;;  %2503 = vrcp.f32 %v980_v18 }
 0x38d   :  { %2505 = vrcp.f32 %v983_v17  ;;  %2353 = vmatprep.subr.bf16.mxu1 %v3080_v21  ;;  %v736_v53 = vpack.c.bf16 %v732_v39, %v731_v24  ;;  %v995_v19 = vmul.f32 %v2494_v4, %v3167_v10  ;;  %v2573_v17 = vld [vmem:[#allocation2] sm:$0xff]  ;;  %v2575_v4 = vld [vmem:[#allocation2 + $0x10] sm:$0xff] }
 0x38e   :  { %v2496_v15 = vpop.eup %2495 }
 0x38f   :  { %v986_v48 = vpop.xlane.xlu1 %985  ;;  %2330 = vmatmul.mubr.msk.bf16.gmra.mrb[36].mxu1 %vm644_vm2, %v736_v53  ;;  %v996_v14 = vmul.f32 %v2496_v15, %v3174_v45  ;;  %v2498_v26 = vpop.eup %2497 }
 0x390   :  { %2507 = vrcp.f32 %v986_v48  ;;  %2354 = vmatpush3.bf16.msra.mxu1 %v3080_v21  ;;  %v997_v54 = vmul.f32 %v2498_v26, %v3176_v11 }
 0x391   :  { %2355 = vmatprep.subr.bf16.mxu1 %v3078_v16  ;;  %v1003_v51 = vpack.c.bf16 %v996_v14, %v995_v19  ;;  %v2576_v19 = vld [vmem:[#allocation2 + $0x18] sm:$0xff] }
 0x392   :  { %v2500_v31 = vpop.eup %2499 }
 0x393   :  { %v998_v49 = vmul.f32 %v2500_v31, %v3182_v20  ;;  %2357 = vmatprep.mubr.msk.bf16.mxu1 %vm644_vm2, %v1003_v51  ;;  %v2502_v56 = vpop.eup %2501 }
 0x394   :  { %2356 = vmatpush3.bf16.msra.mxu1 %v3078_v16  ;;  %v999_v21 = vmul.f32 %v2502_v56, %v3184_v25 }
 0x395   :  { %v1004_v58 = vpack.c.bf16 %v998_v49, %v997_v54 }
 0x396   :  { %v2504_v10 = vpop.eup %2503 }
 0x397   :  { %v2506_v34 = vpop.eup %2505  ;;  %2358 = vmatmul.mubr.msk.bf16.vlgmr.msra.gmra.mrb[40].mxu1 %vm644_vm2, %v1004_v58  ;;  %v1000_v45 = vmul.f32 %v2504_v10, %v3190_v50 }
 0x398   :  { %v1001_v11 = vmul.f32 %v2506_v34, %v3192_v55 }
 0x399   :  { %v1005_v37 = vpack.c.bf16 %v1000_v45, %v999_v21  ;;  %v2577_v21 = vld [vmem:[#allocation2 + $0x20] sm:$0xff] }
 0x39a   :  { %v2508_v35 = vpop.eup %2507 }
 0x39b   :  { %v1002_v20 = vmul.f32 %v2508_v35, %v3198_v63  ;;  %2361 = vmatprep.mubr.msk.bf16.mxu1 %vm644_vm2, %v1005_v37  ;;  %v2578_v37 = vld [vmem:[#allocation2 + $0x28] sm:$0xff] }
 0x39d   :  { %v1006_v38 = vpack.c.bf16 %v1002_v20, %v1001_v11  ;;  %v2579_v20 = vld [vmem:[#allocation2 + $0x30] sm:$0xff] }
 0x39f   :  { %2362 = vmatmul.mubr.msk.bf16.gmra.mrb[44].mxu1 %vm644_vm2, %v1006_v38 }
 0x45a   :  { %v2327_v16 = vpop.f32.mrb[32].mxu1 }
 0x45b   :  { %v787_v40 = vpop.f32.mrb[33].mxu1 }
 0x45c   :  { %v2328_v52 = vpop.f32.mrb[34].mxu1 }
 0x45d   :  { %v1090_v42 = vpack.c.bf16 %v2328_v52, %v2327_v16  ;;  %v790_v43 = vpop.f32.mrb[35].mxu1  ;;  %v2580_v52 = vld [vmem:[#allocation2 + $0x38] sm:$0xff] }
 0x45e   :  { %v1089_v46 = vpack.c.bf16 %v790_v43, %v787_v40 }
 0x460   :  { %2367 = vmatprep.mubr.msk.bf16.mxu0 %vm554_vm1, %v1089_v46 }
 0x461   :  { %2368 = vmatmul.mubr.msk.bf16.vlgmr.msra.gmra.mrb[32].mxu0 %vm554_vm1, %v1090_v42 }
 0x462   :  { %v2331_v25 = vpop.f32.mrb[36].mxu1 }
 0x463   :  { %v803_v50 = vpop.f32.mrb[37].mxu1 }
 0x464   :  { %v2332_v55 = vpop.f32.mrb[38].mxu1 }
 0x465   :  { %v1092_v47 = vpack.c.bf16 %v2332_v55, %v2331_v25  ;;  %v806_v63 = vpop.f32.mrb[39].mxu1 }
 0x466   :  { %v1091_v0 = vpack.c.bf16 %v806_v63, %v803_v50 }
 0x468   :  { %2371 = vmatprep.mubr.msk.bf16.mxu0 %vm554_vm1, %v1091_v0 }
 0x469   :  { %2372 = vmatmul.mubr.msk.bf16.gmra.mrb[36].mxu0 %vm554_vm1, %v1092_v47 }
 0x46a   :  { %v2359_v1 = vpop.f32.mrb[40].mxu1 }
 0x46b   :  { %v1057_v3 = vpop.f32.mrb[41].mxu1 }
 0x46c   :  { %v2360_v6 = vpop.f32.mrb[42].mxu1 }
 0x46d   :  { %v1094_v7 = vpack.c.bf16 %v2360_v6, %v2359_v1  ;;  %v1060_v8 = vpop.f32.mrb[43].mxu1 }
 0x46e   :  { %v1093_v9 = vpack.c.bf16 %v1060_v8, %v1057_v3  ;;  %v2581_v3 = vld [vmem:[#allocation2 + $0x40] sm:$0xff]  ;;  %v2582_v8 = vld [vmem:[#allocation2 + $0x48] sm:$0xff] }
 0x470   :  { %2375 = vmatprep.mubr.msk.bf16.mxu0 %vm554_vm1, %v1093_v9 }
 0x471   :  { %2376 = vmatmul.mubr.msk.bf16.gmra.mrb[40].mxu0 %vm554_vm1, %v1094_v7 }
 0x472   :  { %v2363_v12 = vpop.f32.mrb[44].mxu1 }
 0x473   :  { %v1073_v2 = vpop.f32.mrb[45].mxu1 }
 0x474   :  { %v2364_v22 = vpop.f32.mrb[46].mxu1 }
 0x475   :  { %v1096_v23 = vpack.c.bf16 %v2364_v22, %v2363_v12  ;;  %v1076_v5 = vpop.f32.mrb[47].mxu1  ;;  %v2583_v12 = vld [vmem:[#allocation2 + $0x50] sm:$0xff] }
 0x476   :  { %v1095_v27 = vpack.c.bf16 %v1076_v5, %v1073_v2  ;;  %v2584_v5 = vld [vmem:[#allocation2 + $0x58] sm:$0xff] }
 0x478   :  { %2379 = vmatprep.mubr.msk.bf16.mxu0 %vm554_vm1, %v1095_v27 }
 0x479   :  { %2380 = vmatmul.mubr.msk.bf16.gmra.mrb[44].mxu0 %vm554_vm1, %v1096_v23 }
 0x534   :  { %v2369_v30 = vpop.f32.mrb[32].mxu0 }
 0x535   :  { %v1163_v57 = vpop.f32.mrb[33].mxu0  ;;  %v1172_v41 = vadd.f32 %v2369_v30, %v3243_v29 }
 0x536   :  { %v1164_v13 = vadd.f32 %v1163_v57, %v3243_v29  ;;  %v2370_v32 = vpop.f32.mrb[34].mxu0 }
 0x537   :  { %v1166_v33 = vpop.f32.mrb[35].mxu0  ;;  %v1175_v36 = vadd.f32 %v2370_v32, %v3243_v29  ;;  %v3255_v53 = vadd.f32 %v2575_v4, %v1172_v41  ;;  %v2586_v4 = vld [vmem:[#allocation2 + $0x68] sm:$0xff] }
 0x538   :  { %v1167_v59 = vadd.f32 %v1166_v33, %v3243_v29  ;;  %v3249_v18 = vadd.f32 %v2573_v17, %v1164_v13  ;;  %v2585_v17 = vld [vmem:[#allocation2 + $0x60] sm:$0xff] }
 0x539   :  { %v3259_v14 = vadd.f32 %v2576_v19, %v1175_v36  ;;  %v1248_v49 = vsel %vm162_vm0, %v3255_v53, 0.0 }
 0x53a   :  { %v1242_v24 = vsel %vm162_vm0, %v3249_v18, 0.0  ;;  %v3253_v39 = vadd.f32 %v2574_v62, %v1167_v59 }
 0x53b   :  { %1243 = vadd.xlane.f32.xlu0 %v1242_v24  ;;  %v1251_v34 = vsel %vm162_vm0, %v3259_v14, 0.0 }
 0x53c   :  { %v2373_v15 = vpop.f32.mrb[36].mxu0  ;;  %v1245_v48 = vsel %vm162_vm0, %v3253_v39, 0.0 }
 0x53d   :  { %1246 = vadd.xlane.f32.xlu1 %v1245_v48  ;;  %v1179_v26 = vpop.f32.mrb[37].mxu0  ;;  %v1188_v51 = vadd.f32 %v2373_v15, %v3243_v29  ;;  %v2587_v48 = vld [vmem:[#allocation2 + $0x70] sm:$0xff] }
 0x53e   :  { %v1180_v31 = vadd.f32 %v1179_v26, %v3243_v29  ;;  %v2374_v54 = vpop.f32.mrb[38].mxu0  ;;  %v2588_v26 = vld [vmem:[#allocation2 + $0x78] sm:$0xff] }
 0x53f   :  { %1249 = vadd.xlane.f32.xlu0 %v1248_v49  ;;  %v1182_v56 = vpop.f32.mrb[39].mxu0  ;;  %v1191_v58 = vadd.f32 %v2374_v54, %v3243_v29  ;;  %v3275_v38 = vadd.f32 %v2579_v20, %v1188_v51 }
 0x540   :  { %v1183_v10 = vadd.f32 %v1182_v56, %v3243_v29  ;;  %v3269_v45 = vadd.f32 %v2577_v21, %v1180_v31 }
 0x541   :  { %1252 = vadd.xlane.f32.xlu1 %v1251_v34  ;;  %v3279_v42 = vadd.f32 %v2580_v52, %v1191_v58  ;;  %v1260_v55 = vsel %vm162_vm0, %v3275_v38, 0.0 }
 0x542   :  { %v1254_v35 = vsel %vm162_vm0, %v3269_v45, 0.0  ;;  %v3273_v11 = vadd.f32 %v2578_v37, %v1183_v10 }
 0x543   :  { %1255 = vadd.xlane.f32.xlu0 %v1254_v35  ;;  %v1263_v1 = vsel %vm162_vm0, %v3279_v42, 0.0 }
 0x544   :  { %v2377_v16 = vpop.f32.mrb[40].mxu0  ;;  %v1257_v40 = vsel %vm162_vm0, %v3273_v11, 0.0 }
 0x545   :  { %1258 = vadd.xlane.f32.xlu1 %v1257_v40  ;;  %v1195_v43 = vpop.f32.mrb[41].mxu0  ;;  %v1204_v46 = vadd.f32 %v2377_v16, %v3243_v29 }
 0x546   :  { %v1196_v25 = vadd.f32 %v1195_v43, %v3243_v29  ;;  %v2378_v50 = vpop.f32.mrb[42].mxu0 }
 0x547   :  { %1261 = vadd.xlane.f32.xlu0 %v1260_v55  ;;  %v1198_v47 = vpop.f32.mrb[43].mxu0  ;;  %v1207_v63 = vadd.f32 %v2378_v50, %v3243_v29  ;;  %v3295_v2 = vadd.f32 %v2583_v12, %v1204_v46 }
 0x548   :  { %v1199_v0 = vadd.f32 %v1198_v47, %v3243_v29  ;;  %v3289_v6 = vadd.f32 %v2581_v3, %v1196_v25 }
 0x549   :  { %1264 = vadd.xlane.f32.xlu1 %v1263_v1  ;;  %v3299_v27 = vadd.f32 %v2584_v5, %v1207_v63  ;;  %v1272_v13 = vsel %vm162_vm0, %v3295_v2, 0.0 }
 0x54a   :  { %v1266_v7 = vsel %vm162_vm0, %v3289_v6, 0.0  ;;  %v3293_v9 = vadd.f32 %v2582_v8, %v1199_v0 }
 0x54b   :  { %1267 = vadd.xlane.f32.xlu0 %v1266_v7  ;;  %v1275_v59 = vsel %vm162_vm0, %v3299_v27, 0.0 }
 0x54c   :  { %v2381_v22 = vpop.f32.mrb[44].mxu0  ;;  %v1269_v23 = vsel %vm162_vm0, %v3293_v9, 0.0 }
 0x54d   :  { %1270 = vadd.xlane.f32.xlu1 %v1269_v23  ;;  %v1211_v28 = vpop.f32.mrb[45].mxu0  ;;  %v1220_v30 = vadd.f32 %v2381_v22, %v3243_v29 }
 0x54e   :  { %v1212_v57 = vadd.f32 %v1211_v28, %v3243_v29  ;;  %v2382_v41 = vpop.f32.mrb[46].mxu0 }
 0x54f   :  { %1273 = vadd.xlane.f32.xlu0 %v1272_v13  ;;  %v1214_v32 = vpop.f32.mrb[47].mxu0  ;;  %v1223_v33 = vadd.f32 %v2382_v41, %v3243_v29  ;;  %v3315_v19 = vadd.f32 %v2587_v48, %v1220_v30 }
 0x550   :  { %v1215_v36 = vadd.f32 %v1214_v32, %v3243_v29  ;;  %v3309_v24 = vadd.f32 %v2585_v17, %v1212_v57 }
 0x551   :  { %1276 = vadd.xlane.f32.xlu1 %v1275_v59  ;;  %v3319_v51 = vadd.f32 %v2588_v26, %v1223_v33  ;;  %v1284_v31 = vsel %vm162_vm0, %v3315_v19, 0.0 }
 0x552   :  { %v1278_v62 = vsel %vm162_vm0, %v3309_v24, 0.0  ;;  %v3313_v15 = vadd.f32 %v2586_v4, %v1215_v36 }
 0x553   :  { %1279 = vadd.xlane.f32.xlu0 %v1278_v62  ;;  %v1287_v54 = vsel %vm162_vm0, %v3319_v51, 0.0 }
 0x554   :  { %v1281_v29 = vsel %vm162_vm0, %v3313_v15, 0.0 }
 0x555   :  { %1282 = vadd.xlane.f32.xlu1 %v1281_v29 }
 0x557   :  { %1285 = vadd.xlane.f32.xlu0 %v1284_v31 }
 0x559   :  { %1288 = vadd.xlane.f32.xlu1 %v1287_v54 }
 0x5c8   :  { %v1244_v49 = vpop.xlane.xlu0 %1243 }
 0x5c9   :  { %v1291_v56 = vmul.f32 0.0625, %v1244_v49 }
 0x5ca   :  { %v1247_v58 = vpop.xlane.xlu1 %1246 }
 0x5cb   :  { %v3326_v10 = vsub.f32 %v3249_v18, %v1291_v56  ;;  %v1292_v34 = vmul.f32 0.0625, %v1247_v58 }
 0x5cc   :  { %v1250_v21 = vpop.xlane.xlu0 %1249 }
 0x5cd   :  { %v3329_v35 = vsub.f32 %v3253_v39, %v1292_v34  ;;  %v1293_v37 = vmul.f32 0.0625, %v1250_v21  ;;  %v1323_v20 = vmul.f32 %v3326_v10, %v3326_v10 }
 0x5ce   :  { %v1253_v16 = vpop.xlane.xlu1 %1252 }
 0x5cf   :  { %v3334_v40 = vsub.f32 %v3255_v53, %v1293_v37  ;;  %v1294_v52 = vmul.f32 0.0625, %v1253_v16  ;;  %v1339_v43 = vsel %vm162_vm0, %v1323_v20, 0.0  ;;  %v1324_v18 = vmul.f32 %v3329_v35, %v3329_v35 }
 0x5d0   :  { %v1256_v46 = vpop.xlane.xlu0 %1255  ;;  %1340 = vadd.xlane.f32.xlu0 %v1339_v43 }
 0x5d1   :  { %v3340_v25 = vsub.f32 %v3259_v14, %v1294_v52  ;;  %v1295_v39 = vmul.f32 0.0625, %v1256_v46  ;;  %v1342_v50 = vsel %vm162_vm0, %v1324_v18, 0.0  ;;  %v1325_v55 = vmul.f32 %v3334_v40, %v3334_v40 }
 0x5d2   :  { %1343 = vadd.xlane.f32.xlu1 %v1342_v50  ;;  %v1259_v53 = vpop.xlane.xlu1 %1258 }
 0x5d3   :  { %v3346_v47 = vsub.f32 %v3269_v45, %v1295_v39  ;;  %v1296_v63 = vmul.f32 0.0625, %v1259_v53  ;;  %v1345_v0 = vsel %vm162_vm0, %v1325_v55, 0.0  ;;  %v1326_v1 = vmul.f32 %v3340_v25, %v3340_v25 }
 0x5d4   :  { %v1262_v3 = vpop.xlane.xlu0 %1261  ;;  %1346 = vadd.xlane.f32.xlu0 %v1345_v0 }
 0x5d5   :  { %v3352_v14 = vsub.f32 %v3273_v11, %v1296_v63  ;;  %v1297_v7 = vmul.f32 0.0625, %v1262_v3  ;;  %v1348_v8 = vsel %vm162_vm0, %v1326_v1, 0.0  ;;  %v1327_v12 = vmul.f32 %v3346_v47, %v3346_v47 }
 0x5d6   :  { %1349 = vadd.xlane.f32.xlu1 %v1348_v8  ;;  %v1265_v45 = vpop.xlane.xlu1 %1264 }
 0x5d7   :  { %v3358_v22 = vsub.f32 %v3275_v38, %v1297_v7  ;;  %v1298_v23 = vmul.f32 0.0625, %v1265_v45  ;;  %v1351_v5 = vsel %vm162_vm0, %v1327_v12, 0.0  ;;  %v1328_v28 = vmul.f32 %v3352_v14, %v3352_v14  ;;  %v2443_v7 = vld [vmem:[#allocation7] sm:$0xff]  }
 0x5d8   :  { %v1268_v30 = vpop.xlane.xlu0 %1267  ;;  %1352 = vadd.xlane.f32.xlu0 %v1351_v5  ;;  %2383 = vmatprep.subr.bf16.mxu1 %v2443_v7 }
 0x5d9   :  { %v3364_v11 = vsub.f32 %v3279_v42, %v1298_v23  ;;  %v1299_v57 = vmul.f32 0.0625, %v1268_v30  ;;  %v1354_v41 = vsel %vm162_vm0, %v1328_v28, 0.0  ;;  %v1329_v13 = vmul.f32 %v3358_v22, %v3358_v22  ;;  %2384 = vmatpush3.bf16.msra.mxu1 %v2443_v7 }
 0x5da   :  { %1355 = vadd.xlane.f32.xlu1 %v1354_v41  ;;  %v1271_v38 = vpop.xlane.xlu1 %1270 }
 0x5db   :  { %v3370_v32 = vsub.f32 %v3289_v6, %v1299_v57  ;;  %v1300_v33 = vmul.f32 0.0625, %v1271_v38  ;;  %v1357_v36 = vsel %vm162_vm0, %v1329_v13, 0.0  ;;  %v1330_v59 = vmul.f32 %v3364_v11, %v3364_v11 }
 0x5dc   :  { %v1274_v17 = vpop.xlane.xlu0 %1273  ;;  %1358 = vadd.xlane.f32.xlu0 %v1357_v36 }
 0x5dd   :  { %v3376_v42 = vsub.f32 %v3293_v9, %v1300_v33  ;;  %v1301_v62 = vmul.f32 0.0625, %v1274_v17  ;;  %v1360_v4 = vsel %vm162_vm0, %v1330_v59, 0.0  ;;  %v1331_v48 = vmul.f32 %v3370_v32, %v3370_v32 }
 0x5de   :  { %1361 = vadd.xlane.f32.xlu1 %v1360_v4  ;;  %v1277_v6 = vpop.xlane.xlu1 %1276  ;;  %v1453_v17 = vsub.s32 6, %v2937_v60 }
 0x5df   :  { %v3382_v29 = vsub.f32 %v3295_v2, %v1301_v62  ;;  %v1302_v26 = vmul.f32 0.0625, %v1277_v6  ;;  %v1363_v31 = vsel %vm162_vm0, %v1331_v48, 0.0  ;;  %v1332_v54 = vmul.f32 %v3376_v42, %v3376_v42 }
 0x5e0   :  { %1364 = vadd.xlane.f32.xlu0 %v1363_v31  ;;  %v1280_v9 = vpop.xlane.xlu0 %1279 }
 0x5e1   :  { %v3388_v49 = vsub.f32 %v3299_v27, %v1302_v26  ;;  %v1303_v56 = vmul.f32 0.0625, %v1280_v9  ;;  %v1366_v58 = vsel %vm162_vm0, %v1332_v54, 0.0  ;;  %v1333_v34 = vmul.f32 %v3382_v29, %v3382_v29  ;;  %v3422_v54 = vld [vmem:[#allocation10] sm:$0xff] }
 0x5e2   :  { %1367 = vadd.xlane.f32.xlu1 %v1366_v58  ;;  %v1283_v2 = vpop.xlane.xlu1 %1282  ;;  %v3425_v9 = vrot.slane %v3422_v54, %v1453_v17 }
 0x5e3   :  { %v3394_v21 = vsub.f32 %v3309_v24, %v1303_v56  ;;  %v1304_v37 = vmul.f32 0.0625, %v1283_v2  ;;  %v1369_v20 = vsel %vm162_vm0, %v1333_v34, 0.0  ;;  %v1334_v16 = vmul.f32 %v3388_v49, %v3388_v49 }
 0x5e4   :  { %1370 = vadd.xlane.f32.xlu0 %v1369_v20  ;;  %v1286_v27 = vpop.xlane.xlu0 %1285  ;;  %v1473_v56 = vsub.s32 7, %v2937_v60 }
 0x5e5   :  { %v3400_v52 = vsub.f32 %v3313_v15, %v1304_v37  ;;  %v1305_v43 = vmul.f32 0.0625, %v1286_v27  ;;  %v1372_v18 = vsel %vm162_vm0, %v1334_v16, 0.0  ;;  %v1335_v46 = vmul.f32 %v3394_v21, %v3394_v21 }
 0x5e6   :  { %1373 = vadd.xlane.f32.xlu1 %v1372_v18  ;;  %v1289_v24 = vpop.xlane.xlu1 %1288 }
 0x5e7   :  { %v3406_v39 = vsub.f32 %v3315_v19, %v1305_v43  ;;  %v1306_v50 = vmul.f32 0.0625, %v1289_v24  ;;  %v1375_v55 = vsel %vm162_vm0, %v1335_v46, 0.0  ;;  %v1336_v53 = vmul.f32 %v3400_v52, %v3400_v52 }
 0x5e8   :  { %1376 = vadd.xlane.f32.xlu0 %v1375_v55  ;;  %v3431_v24 = vrot.slane %v3422_v54, %v1473_v56 }
 0x5e9   :  { %v3412_v15 = vsub.f32 %v3319_v51, %v1306_v50  ;;  %v1378_v63 = vsel %vm162_vm0, %v1336_v53, 0.0  ;;  %v1337_v0 = vmul.f32 %v3406_v39, %v3406_v39  ;;  %v2444_v51 = vld [vmem:[#allocation8] sm:$0xff]  }
 0x5ea   :  { %1379 = vadd.xlane.f32.xlu1 %v1378_v63  ;;  %2401 = vmatprep.subr.bf16.mxu0 %v2444_v51 }
 0x5eb   :  { %v1381_v1 = vsel %vm162_vm0, %v1337_v0, 0.0  ;;  %v1338_v19 = vmul.f32 %v3412_v15, %v3412_v15  ;;  %2402 = vmatpush3.bf16.msra.mxu0 %v2444_v51 }
 0x5ec   :  { %1382 = vadd.xlane.f32.xlu0 %v1381_v1 }
 0x5ed   :  { %v1384_v3 = vsel %vm162_vm0, %v1338_v19, 0.0 }
 0x5ee   :  { %1385 = vadd.xlane.f32.xlu1 %v1384_v3 }
 0x65d   :  { %v1341_v8 = vpop.xlane.xlu0 %1340 }
 0x65e   :  { %v1387_v12 = vmul.f32 0.0625, %v1341_v8 }
 0x65f   :  { %v1344_v45 = vpop.xlane.xlu1 %1343 }
 0x660   :  { %v1403_v23 = vadd.f32 1e-05, %v1387_v12  ;;  %v1388_v5 = vmul.f32 0.0625, %v1344_v45 }
 0x661   :  { %v1347_v28 = vpop.xlane.xlu0 %1346 }
 0x662   :  { %2509 = vrsqrt.f32 %v1403_v23  ;;  %v1404_v30 = vadd.f32 1e-05, %v1388_v5  ;;  %v1389_v57 = vmul.f32 0.0625, %v1347_v28 }
 0x663   :  { %v1350_v41 = vpop.xlane.xlu1 %1349 }
 0x664   :  { %2511 = vrsqrt.f32 %v1404_v30  ;;  %v1405_v13 = vadd.f32 1e-05, %v1389_v57  ;;  %v1390_v38 = vmul.f32 0.0625, %v1350_v41 }
 0x665   :  { %v1353_v33 = vpop.xlane.xlu0 %1352 }
 0x666   :  { %2513 = vrsqrt.f32 %v1405_v13  ;;  %v1406_v36 = vadd.f32 1e-05, %v1390_v38  ;;  %v1391_v59 = vmul.f32 0.0625, %v1353_v33 }
 0x667   :  { %v1356_v62 = vpop.xlane.xlu1 %1355 }
 0x668   :  { %2515 = vrsqrt.f32 %v1406_v36  ;;  %v1407_v4 = vadd.f32 1e-05, %v1391_v59  ;;  %v1392_v48 = vmul.f32 0.0625, %v1356_v62 }
 0x669   :  { %v1359_v6 = vpop.xlane.xlu0 %1358 }
 0x66a   :  { %2517 = vrsqrt.f32 %v1407_v4  ;;  %v1408_v26 = vadd.f32 1e-05, %v1392_v48  ;;  %v1393_v31 = vmul.f32 0.0625, %v1359_v6 }
 0x66b   :  { %v1362_v58 = vpop.xlane.xlu1 %1361 }
 0x66c   :  { %v2510_v34 = vpop.eup %2509  ;;  %2519 = vrsqrt.f32 %v1408_v26  ;;  %v1409_v2 = vadd.f32 1e-05, %v1393_v31  ;;  %v1394_v37 = vmul.f32 0.0625, %v1362_v58 }
 0x66d   :  { %v1435_v20 = vmul.f32 %v2510_v34, %v3326_v10  ;;  %v1365_v16 = vpop.xlane.xlu0 %1364 }
 0x66e   :  { %v2512_v27 = vpop.eup %2511  ;;  %2521 = vrsqrt.f32 %v1409_v2  ;;  %v1410_v43 = vadd.f32 1e-05, %v1394_v37  ;;  %v1395_v18 = vmul.f32 0.0625, %v1365_v16 }
 0x66f   :  { %v1436_v46 = vmul.f32 %v2512_v27, %v3329_v35  ;;  %v1368_v50 = vpop.xlane.xlu1 %1367  ;;  %v1455_v55 = vmul.f32 %v3425_v9, %v1435_v20 }
 0x670   :  { %v2514_v53 = vpop.eup %2513  ;;  %2523 = vrsqrt.f32 %v1410_v43  ;;  %v1411_v63 = vadd.f32 1e-05, %v1395_v18  ;;  %v1396_v0 = vmul.f32 0.0625, %v1368_v50 }
 0x671   :  { %v1437_v1 = vmul.f32 %v2514_v53, %v3334_v40  ;;  %v1371_v10 = vpop.xlane.xlu0 %1370  ;;  %v1456_v19 = vmul.f32 %v3425_v9, %v1436_v46  ;;  %v3439_v45 = vadd.f32 %v3431_v24, %v1455_v55 }
 0x672   :  { %v2516_v3 = vpop.eup %2515  ;;  %2525 = vrsqrt.f32 %v1411_v63  ;;  %v1412_v7 = vadd.f32 1e-05, %v1396_v0  ;;  %v1397_v51 = vmul.f32 0.0625, %v1371_v10 }
 0x673   :  { %v1457_v35 = vmul.f32 %v3425_v9, %v1437_v1  ;;  %v1438_v8 = vmul.f32 %v2516_v3, %v3340_v25  ;;  %v1374_v12 = vpop.xlane.xlu1 %1373  ;;  %v3442_v23 = vadd.f32 %v3431_v24, %v1456_v19 }
 0x674   :  { %v2518_v5 = vpop.eup %2517  ;;  %2527 = vrsqrt.f32 %v1412_v7  ;;  %v1413_v40 = vadd.f32 1e-05, %v1397_v51  ;;  %v1398_v28 = vmul.f32 0.0625, %v1374_v12 }
 0x675   :  { %v1458_v30 = vmul.f32 %v3425_v9, %v1438_v8  ;;  %v1439_v57 = vmul.f32 %v2518_v5, %v3346_v47  ;;  %v1377_v41 = vpop.xlane.xlu0 %1376  ;;  %v1493_v13 = vpack.c.bf16 %v3442_v23, %v3439_v45  ;;  %v3449_v36 = vadd.f32 %v3431_v24, %v1457_v35 }
 0x676   :  { %v2520_v25 = vpop.eup %2519  ;;  %2529 = vrsqrt.f32 %v1413_v40  ;;  %v1414_v38 = vadd.f32 1e-05, %v1398_v28  ;;  %v1399_v33 = vmul.f32 0.0625, %v1377_v41 }
 0x677   :  { %v3452_v59 = vadd.f32 %v3431_v24, %v1458_v30  ;;  %v1440_v17 = vmul.f32 %v2520_v25, %v3352_v14  ;;  %2385 = vmatprep.mubr.msk.bf16.mxu1 %vm162_vm0, %v1493_v13  ;;  %v1380_v62 = vpop.xlane.xlu1 %1379  ;;  %v1459_v47 = vmul.f32 %v3425_v9, %v1439_v57 }
 0x678   :  { %v2522_v4 = vpop.eup %2521  ;;  %2531 = vrsqrt.f32 %v1414_v38  ;;  %v1415_v48 = vadd.f32 1e-05, %v1399_v33  ;;  %v1400_v6 = vmul.f32 0.0625, %v1380_v62 }
 0x679   :  { %v1441_v26 = vmul.f32 %v2522_v4, %v3358_v22  ;;  %v1383_v31 = vpop.xlane.xlu0 %1382  ;;  %v1494_v56 = vpack.c.bf16 %v3452_v59, %v3449_v36  ;;  %v1460_v58 = vmul.f32 %v3425_v9, %v1440_v17  ;;  %v3464_v16 = vadd.f32 %v3431_v24, %v1459_v47 }
 0x67a   :  { %v2524_v34 = vpop.eup %2523  ;;  %2533 = vrsqrt.f32 %v1415_v48  ;;  %v1416_v14 = vadd.f32 1e-05, %v1400_v6  ;;  %v1401_v2 = vmul.f32 0.0625, %v1383_v31 }
 0x67b   :  { %v1442_v37 = vmul.f32 %v2524_v34, %v3364_v11  ;;  %2386 = vmatmul.mubr.msk.bf16.vlgmr.msra.gmra.mrb[48].mxu1 %vm162_vm0, %v1494_v56  ;;  %v1386_v20 = vpop.xlane.xlu1 %1385  ;;  %v3467_v22 = vadd.f32 %v3431_v24, %v1460_v58  ;;  %v1461_v27 = vmul.f32 %v3425_v9, %v1441_v26  ;;  %v1503_v56 = vsub.s32 4, %v2937_v60 }
 0x67c   :  { %v2526_v43 = vpop.eup %2525  ;;  %2535 = vrsqrt.f32 %v1416_v14  ;;  %v1417_v18 = vadd.f32 1e-05, %v1401_v2  ;;  %v1402_v46 = vmul.f32 0.0625, %v1386_v20 }
 0x67d   :  { %v1443_v50 = vmul.f32 %v2526_v43, %v3370_v32  ;;  %v1495_v11 = vpack.c.bf16 %v3467_v22, %v3464_v16  ;;  %v1462_v55 = vmul.f32 %v3425_v9, %v1442_v37  ;;  %v3477_v1 = vadd.f32 %v3431_v24, %v1461_v27 }
 0x67e   :  { %v2528_v53 = vpop.eup %2527  ;;  %2537 = vrsqrt.f32 %v1417_v18  ;;  %v1418_v63 = vadd.f32 1e-05, %v1402_v46  ;;  %v1504_v58 = vrot.slane %v3422_v54, %v1503_v56 }
 0x67f   :  { %v1444_v0 = vmul.f32 %v2528_v53, %v3376_v42  ;;  %2389 = vmatprep.mubr.msk.bf16.mxu1 %vm162_vm0, %v1495_v11  ;;  %v3480_v10 = vadd.f32 %v3431_v24, %v1462_v55  ;;  %v1463_v32 = vmul.f32 %v3425_v9, %v1443_v50 }
 0x680   :  { %v2530_v19 = vpop.eup %2529  ;;  %2539 = vrsqrt.f32 %v1418_v63 }
 0x681   :  { %v1445_v3 = vmul.f32 %v2530_v19, %v3382_v29  ;;  %v1496_v7 = vpack.c.bf16 %v3480_v10, %v3477_v1  ;;  %v1464_v51 = vmul.f32 %v3425_v9, %v1444_v0  ;;  %v3490_v8 = vadd.f32 %v3431_v24, %v1463_v32 }
 0x682   :  { %v2532_v42 = vpop.eup %2531 }
 0x683   :  { %v1446_v35 = vmul.f32 %v2532_v42, %v3388_v49  ;;  %2390 = vmatmul.mubr.msk.bf16.gmra.mrb[52].mxu1 %vm162_vm0, %v1496_v7  ;;  %v3493_v12 = vadd.f32 %v3431_v24, %v1464_v51  ;;  %v1465_v5 = vmul.f32 %v3425_v9, %v1445_v3 }
 0x684   :  { %v2534_v40 = vpop.eup %2533 }
 0x685   :  { %v1447_v29 = vmul.f32 %v2534_v40, %v3394_v21  ;;  %v1497_v28 = vpack.c.bf16 %v3493_v12, %v3490_v8  ;;  %v1466_v30 = vmul.f32 %v3425_v9, %v1446_v35  ;;  %v3503_v41 = vadd.f32 %v3431_v24, %v1465_v5 }
 0x686   :  { %v2536_v57 = vpop.eup %2535 }
 0x687   :  { %v1448_v49 = vmul.f32 %v2536_v57, %v3400_v52  ;;  %2393 = vmatprep.mubr.msk.bf16.mxu1 %vm162_vm0, %v1497_v28  ;;  %v3506_v13 = vadd.f32 %v3431_v24, %v1466_v30  ;;  %v1467_v25 = vmul.f32 %v3425_v9, %v1447_v29 }
 0x688   :  { %v2538_v38 = vpop.eup %2537 }
 0x689   :  { %v1449_v21 = vmul.f32 %v2538_v38, %v3406_v39  ;;  %v1498_v33 = vpack.c.bf16 %v3506_v13, %v3503_v41  ;;  %v1468_v17 = vmul.f32 %v3425_v9, %v1448_v49  ;;  %v3516_v47 = vadd.f32 %v3431_v24, %v1467_v25 }
 0x68a   :  { %v2540_v62 = vpop.eup %2539 }
 0x68b   :  { %v1450_v52 = vmul.f32 %v2540_v62, %v3412_v15  ;;  %2394 = vmatmul.mubr.msk.bf16.gmra.mrb[56].mxu1 %vm162_vm0, %v1498_v33  ;;  %v3519_v4 = vadd.f32 %v3431_v24, %v1468_v17  ;;  %v1469_v48 = vmul.f32 %v3425_v9, %v1449_v21 }
 0x68d   :  { %v1499_v39 = vpack.c.bf16 %v3519_v4, %v3516_v47  ;;  %v1470_v6 = vmul.f32 %v3425_v9, %v1450_v52  ;;  %v3527_v26 = vadd.f32 %v3431_v24, %v1469_v48 }
 0x68f   :  { %2397 = vmatprep.mubr.msk.bf16.mxu1 %vm162_vm0, %v1499_v39  ;;  %v3530_v15 = vadd.f32 %v3431_v24, %v1470_v6 }
 0x691   :  { %v1500_v31 = vpack.c.bf16 %v3530_v15, %v3527_v26 }
 0x693   :  { %2398 = vmatmul.mubr.msk.bf16.gmra.mrb[60].mxu1 %vm162_vm0, %v1500_v31 }
 0x74e   :  { %v2387_v34 = vpop.f32.mrb[48].mxu1 }
 0x74f   :  { %v1578_v14 = vadd.f32 %v2387_v34, %v1504_v58  ;;  %v1569_v9 = vpop.f32.mrb[49].mxu1 }
 0x750   :  { %v1570_v2 = vadd.f32 %v1569_v9, %v1504_v58  ;;  %v2388_v37 = vpop.f32.mrb[50].mxu1 }
 0x751   :  { %v1581_v20 = vadd.f32 %v2388_v37, %v1504_v58  ;;  %v1572_v27 = vpop.f32.mrb[51].mxu1  ;;  %v1634_v18 = vmax.f32 %v1578_v14, 0.0 }
 0x752   :  { %v1573_v43 = vadd.f32 %v1572_v27, %v1504_v58  ;;  %v1632_v46 = vmax.f32 %v1570_v2, 0.0 }
 0x753   :  { %v1635_v24 = vmax.f32 %v1581_v20, 0.0 }
 0x754   :  { %v1633_v50 = vmax.f32 %v1573_v43, 0.0 }
 0x755   :  { %v1651_v11 = vpack.c.bf16 %v1635_v24, %v1634_v18 }
 0x756   :  { %v1650_v55 = vpack.c.bf16 %v1633_v50, %v1632_v46  ;;  %v2391_v53 = vpop.f32.mrb[52].mxu1 }
 0x757   :  { %v1594_v63 = vadd.f32 %v2391_v53, %v1504_v58  ;;  %v1585_v0 = vpop.f32.mrb[53].mxu1 }
 0x758   :  { %v1586_v32 = vadd.f32 %v1585_v0, %v1504_v58  ;;  %v2392_v19 = vpop.f32.mrb[54].mxu1  ;;  %2403 = vmatprep.mubr.msk.bf16.mxu0 %vm162_vm0, %v1650_v55  ;;  %v1660_v55 = vsub.s32 5, %v2937_v60 }
 0x759   :  { %v1597_v3 = vadd.f32 %v2392_v19, %v1504_v58  ;;  %v1588_v7 = vpop.f32.mrb[55].mxu1  ;;  %2404 = vmatmul.mubr.msk.bf16.vlgmr.msra.gmra.mrb[48].mxu0 %vm162_vm0, %v1651_v11  ;;  %v1638_v42 = vmax.f32 %v1594_v63, 0.0 }
 0x75a   :  { %v1589_v51 = vadd.f32 %v1588_v7, %v1504_v58  ;;  %v1636_v5 = vmax.f32 %v1586_v32, 0.0  ;;  %v3547_v53 = vrot.slane %v3422_v54, %v1660_v55 }
 0x75b   :  { %v1639_v35 = vmax.f32 %v1597_v3, 0.0 }
 0x75c   :  { %v1637_v40 = vmax.f32 %v1589_v51, 0.0 }
 0x75d   :  { %v1653_v29 = vpack.c.bf16 %v1639_v35, %v1638_v42 }
 0x75e   :  { %v1652_v28 = vpack.c.bf16 %v1637_v40, %v1636_v5  ;;  %v2395_v30 = vpop.f32.mrb[56].mxu1 }
 0x75f   :  { %v1610_v57 = vadd.f32 %v2395_v30, %v1504_v58  ;;  %v1601_v49 = vpop.f32.mrb[57].mxu1 }
 0x760   :  { %v1602_v25 = vadd.f32 %v1601_v49, %v1504_v58  ;;  %v2396_v38 = vpop.f32.mrb[58].mxu1  ;;  %2407 = vmatprep.mubr.msk.bf16.mxu0 %vm162_vm0, %v1652_v28 }
 0x761   :  { %v1613_v21 = vadd.f32 %v2396_v38, %v1504_v58  ;;  %v1604_v33 = vpop.f32.mrb[59].mxu1  ;;  %2408 = vmatmul.mubr.msk.bf16.gmra.mrb[52].mxu0 %vm162_vm0, %v1653_v29  ;;  %v1642_v62 = vmax.f32 %v1610_v57, 0.0 }
 0x762   :  { %v1605_v17 = vadd.f32 %v1604_v33, %v1504_v58  ;;  %v1640_v48 = vmax.f32 %v1602_v25, 0.0 }
 0x763   :  { %v1643_v52 = vmax.f32 %v1613_v21, 0.0 }
 0x764   :  { %v1641_v39 = vmax.f32 %v1605_v17, 0.0 }
 0x765   :  { %v1655_v6 = vpack.c.bf16 %v1643_v52, %v1642_v62 }
 0x766   :  { %v1654_v31 = vpack.c.bf16 %v1641_v39, %v1640_v48  ;;  %v2399_v56 = vpop.f32.mrb[60].mxu1 }
 0x767   :  { %v1626_v34 = vadd.f32 %v2399_v56, %v1504_v58  ;;  %v1617_v14 = vpop.f32.mrb[61].mxu1 }
 0x768   :  { %v1618_v9 = vadd.f32 %v1617_v14, %v1504_v58  ;;  %v2400_v2 = vpop.f32.mrb[62].mxu1  ;;  %2411 = vmatprep.mubr.msk.bf16.mxu0 %vm162_vm0, %v1654_v31 }
 0x769   :  { %v1629_v37 = vadd.f32 %v2400_v2, %v1504_v58  ;;  %v1620_v20 = vpop.f32.mrb[63].mxu1  ;;  %2412 = vmatmul.mubr.msk.bf16.gmra.mrb[56].mxu0 %vm162_vm0, %v1655_v6  ;;  %v1646_v43 = vmax.f32 %v1626_v34, 0.0 }
 0x76a   :  { %v1621_v27 = vadd.f32 %v1620_v20, %v1504_v58  ;;  %v1644_v24 = vmax.f32 %v1618_v9, 0.0 }
 0x76b   :  { %v1647_v18 = vmax.f32 %v1629_v37, 0.0 }
 0x76c   :  { %v1645_v46 = vmax.f32 %v1621_v27, 0.0 }
 0x76d   :  { %v1657_v50 = vpack.c.bf16 %v1647_v18, %v1646_v43 }
 0x76e   :  { %v1656_v11 = vpack.c.bf16 %v1645_v46, %v1644_v24 }
 0x770   :  { %2415 = vmatprep.mubr.msk.bf16.mxu0 %vm162_vm0, %v1656_v11 }
 0x771   :  { %2416 = vmatmul.mubr.msk.bf16.gmra.mrb[60].mxu0 %vm162_vm0, %v1657_v50 }
 0x82c   :  { %v2405_v63 = vpop.f32.mrb[48].mxu0 }
 0x82d   :  { %v1735_v0 = vadd.f32 %v2405_v63, %v3547_v53  ;;  %v1726_v32 = vpop.f32.mrb[49].mxu0 }
 0x82e   :  { %v1727_v58 = vadd.f32 %v1726_v32, %v3547_v53  ;;  %v2406_v19 = vpop.f32.mrb[50].mxu0 }
 0x82f   :  { %v1738_v3 = vadd.f32 %v2406_v19, %v3547_v53  ;;  %v1729_v7 = vpop.f32.mrb[51].mxu0  ;;  %v3553_v51 = vadd.f32 %v1735_v0, %v3449_v36 }
 0x830   :  { %v1730_v42 = vadd.f32 %v1729_v7, %v3547_v53  ;;  %v3562_v5 = vadd.f32 %v1727_v58, %v3439_v45 }
 0x831   :  { %v1811_v35 = vsel %vm162_vm0, %v3553_v51, 0.0  ;;  %v3559_v54 = vadd.f32 %v1738_v3, %v3452_v59 }
 0x832   :  { %1812 = vadd.xlane.f32.xlu0 %v1811_v35  ;;  %v3567_v29 = vadd.f32 %v1730_v42, %v3442_v23  ;;  %v1805_v57 = vsel %vm162_vm0, %v3562_v5, 0.0 }
 0x833   :  { %v1814_v40 = vsel %vm162_vm0, %v3559_v54, 0.0 }
 0x834   :  { %1815 = vadd.xlane.f32.xlu1 %v1814_v40  ;;  %v2409_v36 = vpop.f32.mrb[52].mxu0  ;;  %v1808_v38 = vsel %vm162_vm0, %v3567_v29, 0.0 }
 0x835   :  { %v1751_v28 = vadd.f32 %v2409_v36, %v3547_v53  ;;  %v1742_v30 = vpop.f32.mrb[53].mxu0 }
 0x836   :  { %v1743_v59 = vadd.f32 %v1742_v30, %v3547_v53  ;;  %1806 = vadd.xlane.f32.xlu0 %v1805_v57  ;;  %v2410_v45 = vpop.f32.mrb[54].mxu0 }
 0x837   :  { %v1754_v49 = vadd.f32 %v2410_v45, %v3547_v53  ;;  %v1745_v25 = vpop.f32.mrb[55].mxu0  ;;  %v3577_v23 = vadd.f32 %v1751_v28, %v3477_v1 }
 0x838   :  { %v1746_v21 = vadd.f32 %v1745_v25, %v3547_v53  ;;  %1809 = vadd.xlane.f32.xlu1 %v1808_v38  ;;  %v3586_v62 = vadd.f32 %v1743_v59, %v3464_v16 }
 0x839   :  { %v1823_v33 = vsel %vm162_vm0, %v3577_v23, 0.0  ;;  %v3583_v17 = vadd.f32 %v1754_v49, %v3480_v10 }
 0x83a   :  { %1824 = vadd.xlane.f32.xlu0 %v1823_v33  ;;  %v3591_v48 = vadd.f32 %v1746_v21, %v3467_v22  ;;  %v1817_v31 = vsel %vm162_vm0, %v3586_v62, 0.0 }
 0x83b   :  { %v1826_v52 = vsel %vm162_vm0, %v3583_v17, 0.0 }
 0x83c   :  { %1827 = vadd.xlane.f32.xlu1 %v1826_v52  ;;  %v2413_v1 = vpop.f32.mrb[56].mxu0  ;;  %v1820_v14 = vsel %vm162_vm0, %v3591_v48, 0.0 }
 0x83d   :  { %v1767_v39 = vadd.f32 %v2413_v1, %v3547_v53  ;;  %v1758_v6 = vpop.f32.mrb[57].mxu0 }
 0x83e   :  { %v1759_v10 = vadd.f32 %v1758_v6, %v3547_v53  ;;  %1818 = vadd.xlane.f32.xlu0 %v1817_v31  ;;  %v2414_v16 = vpop.f32.mrb[58].mxu0 }
 0x83f   :  { %v1770_v56 = vadd.f32 %v2414_v16, %v3547_v53  ;;  %v1761_v34 = vpop.f32.mrb[59].mxu0  ;;  %v3601_v22 = vadd.f32 %v1767_v39, %v3503_v41 }
 0x840   :  { %v1762_v9 = vadd.f32 %v1761_v34, %v3547_v53  ;;  %1821 = vadd.xlane.f32.xlu1 %v1820_v14  ;;  %v3610_v20 = vadd.f32 %v1759_v10, %v3490_v8 }
 0x841   :  { %v1835_v2 = vsel %vm162_vm0, %v3601_v22, 0.0  ;;  %v3607_v37 = vadd.f32 %v1770_v56, %v3506_v13 }
 0x842   :  { %1836 = vadd.xlane.f32.xlu0 %v1835_v2  ;;  %v3615_v43 = vadd.f32 %v1762_v9, %v3493_v12  ;;  %v1829_v24 = vsel %vm162_vm0, %v3610_v20, 0.0 }
 0x843   :  { %v1838_v27 = vsel %vm162_vm0, %v3607_v37, 0.0 }
 0x844   :  { %1839 = vadd.xlane.f32.xlu1 %v1838_v27  ;;  %v2417_v41 = vpop.f32.mrb[60].mxu0  ;;  %v1832_v11 = vsel %vm162_vm0, %v3615_v43, 0.0 }
 0x845   :  { %v1774_v18 = vpop.f32.mrb[61].mxu0  ;;  %v1783_v46 = vadd.f32 %v2417_v41, %v3547_v53 }
 0x846   :  { %v1775_v13 = vadd.f32 %v1774_v18, %v3547_v53  ;;  %1830 = vadd.xlane.f32.xlu0 %v1829_v24  ;;  %v2418_v8 = vpop.f32.mrb[62].mxu0 }
 0x847   :  { %v1777_v50 = vpop.f32.mrb[63].mxu0  ;;  %v1786_v55 = vadd.f32 %v2418_v8, %v3547_v53  ;;  %v3634_v58 = vadd.f32 %v1783_v46, %v3527_v26 }
 0x848   :  { %v1778_v12 = vadd.f32 %v1777_v50, %v3547_v53  ;;  %1833 = vadd.xlane.f32.xlu1 %v1832_v11  ;;  %v3626_v63 = vadd.f32 %v1775_v13, %v3516_v47 }
 0x849   :  { %v3639_v3 = vadd.f32 %v1786_v55, %v3530_v15  ;;  %v1847_v47 = vsel %vm162_vm0, %v3634_v58, 0.0 }
 0x84a   :  { %v1841_v0 = vsel %vm162_vm0, %v3626_v63, 0.0  ;;  %v3631_v32 = vadd.f32 %v1778_v12, %v3519_v4 }
 0x84b   :  { %1842 = vadd.xlane.f32.xlu0 %v1841_v0  ;;  %v1850_v53 = vsel %vm162_vm0, %v3639_v3, 0.0 }
 0x84c   :  { %v1844_v19 = vsel %vm162_vm0, %v3631_v32, 0.0 }
 0x84d   :  { %1845 = vadd.xlane.f32.xlu1 %v1844_v19 }
 0x84f   :  { %1848 = vadd.xlane.f32.xlu0 %v1847_v47 }
 0x851   :  { %1851 = vadd.xlane.f32.xlu1 %v1850_v53 }
 0x8bf   :  { %v1813_v4 = vpop.xlane.xlu0 %1812 }
 0x8c0   :  { %v1855_v7 = vmul.f32 0.0625, %v1813_v4 }
 0x8c1   :  { %v1816_v26 = vpop.xlane.xlu1 %1815 }
 0x8c2   :  { %v3646_v42 = vsub.f32 %v3553_v51, %v1855_v7  ;;  %v1856_v35 = vmul.f32 0.0625, %v1816_v26 }
 0x8c3   :  { %v1807_v40 = vpop.xlane.xlu0 %1806 }
 0x8c4   :  { %v3649_v15 = vsub.f32 %v3559_v54, %v1856_v35  ;;  %v1853_v36 = vmul.f32 0.0625, %v1807_v40  ;;  %v1887_v28 = vmul.f32 %v3646_v42, %v3646_v42 }
 0x8c5   :  { %v1810_v30 = vpop.xlane.xlu1 %1809 }
 0x8c6   :  { %v3654_v57 = vsub.f32 %v3562_v5, %v1853_v36  ;;  %v1854_v59 = vmul.f32 0.0625, %v1810_v30  ;;  %v1907_v45 = vsel %vm162_vm0, %v1887_v28, 0.0  ;;  %v1888_v51 = vmul.f32 %v3649_v15, %v3649_v15 }
 0x8c7   :  { %v1825_v49 = vpop.xlane.xlu0 %1824  ;;  %1908 = vadd.xlane.f32.xlu0 %v1907_v45 }
 0x8c8   :  { %v3660_v25 = vsub.f32 %v3567_v29, %v1854_v59  ;;  %v1859_v54 = vmul.f32 0.0625, %v1825_v49  ;;  %v1910_v38 = vsel %vm162_vm0, %v1888_v51, 0.0  ;;  %v1885_v21 = vmul.f32 %v3654_v57, %v3654_v57 }
 0x8c9   :  { %1911 = vadd.xlane.f32.xlu1 %v1910_v38  ;;  %v1828_v5 = vpop.xlane.xlu1 %1827 }
 0x8ca   :  { %v3666_v33 = vsub.f32 %v3577_v23, %v1859_v54  ;;  %v1860_v52 = vmul.f32 0.0625, %v1828_v5  ;;  %v1901_v1 = vsel %vm162_vm0, %v1885_v21, 0.0  ;;  %v1886_v39 = vmul.f32 %v3660_v25, %v3660_v25 }
 0x8cb   :  { %v1819_v6 = vpop.xlane.xlu0 %1818  ;;  %1902 = vadd.xlane.f32.xlu0 %v1901_v1 }
 0x8cc   :  { %v3672_v29 = vsub.f32 %v3583_v17, %v1860_v52  ;;  %v1857_v31 = vmul.f32 0.0625, %v1819_v6  ;;  %v1904_v10 = vsel %vm162_vm0, %v1886_v39, 0.0  ;;  %v1891_v16 = vmul.f32 %v3666_v33, %v3666_v33 }
 0x8cd   :  { %1905 = vadd.xlane.f32.xlu1 %v1904_v10  ;;  %v1822_v23 = vpop.xlane.xlu1 %1821 }
 0x8ce   :  { %v3678_v56 = vsub.f32 %v3586_v62, %v1857_v31  ;;  %v1858_v34 = vmul.f32 0.0625, %v1822_v23  ;;  %v1919_v14 = vsel %vm162_vm0, %v1891_v16, 0.0  ;;  %v1892_v9 = vmul.f32 %v3672_v29, %v3672_v29 }
 0x8cf   :  { %v1837_v2 = vpop.xlane.xlu0 %1836  ;;  %1920 = vadd.xlane.f32.xlu0 %v1919_v14 }
 0x8d0   :  { %v3684_v17 = vsub.f32 %v3591_v48, %v1858_v34  ;;  %v1863_v27 = vmul.f32 0.0625, %v1837_v2  ;;  %v1922_v41 = vsel %vm162_vm0, %v1892_v9, 0.0  ;;  %v1889_v18 = vmul.f32 %v3678_v56, %v3678_v56 }
 0x8d1   :  { %1923 = vadd.xlane.f32.xlu1 %v1922_v41  ;;  %v1840_v62 = vpop.xlane.xlu1 %1839 }
 0x8d2   :  { %v3690_v24 = vsub.f32 %v3601_v22, %v1863_v27  ;;  %v1864_v46 = vmul.f32 0.0625, %v1840_v62  ;;  %v1913_v13 = vsel %vm162_vm0, %v1889_v18, 0.0  ;;  %v1890_v8 = vmul.f32 %v3684_v17, %v3684_v17 }
 0x8d3   :  { %v1831_v50 = vpop.xlane.xlu0 %1830  ;;  %1914 = vadd.xlane.f32.xlu0 %v1913_v13 }
 0x8d4   :  { %v3696_v48 = vsub.f32 %v3607_v37, %v1864_v46  ;;  %v1861_v11 = vmul.f32 0.0625, %v1831_v50  ;;  %v1916_v55 = vsel %vm162_vm0, %v1890_v8, 0.0  ;;  %v1895_v12 = vmul.f32 %v3690_v24, %v3690_v24  ;;  %v135_v8 = vld [vmem:[#allocation10 + $0x8] sm:$0x3] }
 0x8d5   :  { %1917 = vadd.xlane.f32.xlu1 %v1916_v55  ;;  %v1834_v22 = vpop.xlane.xlu1 %1833 }
 0x8d6   :  { %v3702_v0 = vsub.f32 %v3610_v20, %v1861_v11  ;;  %v1862_v19 = vmul.f32 0.0625, %v1834_v22  ;;  %v1931_v47 = vsel %vm162_vm0, %v1895_v12, 0.0  ;;  %v1896_v53 = vmul.f32 %v3696_v48, %v3696_v48 }
 0x8d7   :  { %1932 = vadd.xlane.f32.xlu0 %v1931_v47 }
 0x8d8   :  { %v3708_v37 = vsub.f32 %v3615_v43, %v1862_v19  ;;  %v1843_v4 = vpop.xlane.xlu0 %1842  ;;  %v1934_v7 = vsel %vm162_vm0, %v1896_v53, 0.0  ;;  %v1893_v26 = vmul.f32 %v3702_v0, %v3702_v0  ;;  %v3743_v19 = vrot.slane %v135_v8, %v154_v61 }
 0x8d9   :  { %v1865_v35 = vmul.f32 0.0625, %v1843_v4  ;;  %1935 = vadd.xlane.f32.xlu1 %v1934_v7 }
 0x8da   :  { %v1846_v20 = vpop.xlane.xlu1 %1845  ;;  %v1925_v40 = vsel %vm162_vm0, %v1893_v26, 0.0  ;;  %v1894_v36 = vmul.f32 %v3708_v37, %v3708_v37  ;;  %v3747_v26 = vrot.slane %v135_v8, %v302_v44 }
 0x8db   :  { %v3717_v28 = vsub.f32 %v3626_v63, %v1865_v35  ;;  %v1866_v30 = vmul.f32 0.0625, %v1846_v20  ;;  %1926 = vadd.xlane.f32.xlu0 %v1925_v40 }
 0x8dc   :  { %v1849_v43 = vpop.xlane.xlu0 %1848  ;;  %v1928_v59 = vsel %vm162_vm0, %v1894_v36, 0.0 }
 0x8dd   :  { %v3721_v45 = vsub.f32 %v3631_v32, %v1866_v30  ;;  %v1867_v51 = vmul.f32 0.0625, %v1849_v43  ;;  %1929 = vadd.xlane.f32.xlu1 %v1928_v59  ;;  %v1897_v49 = vmul.f32 %v3717_v28, %v3717_v28 }
 0x8de   :  { %v1852_v54 = vpop.xlane.xlu1 %1851 }
 0x8df   :  { %v3726_v38 = vsub.f32 %v3634_v58, %v1867_v51  ;;  %v1868_v21 = vmul.f32 0.0625, %v1852_v54  ;;  %v1937_v63 = vsel %vm162_vm0, %v1897_v49, 0.0  ;;  %v1898_v5 = vmul.f32 %v3721_v45, %v3721_v45 }
 0x8e0   :  { %1938 = vadd.xlane.f32.xlu0 %v1937_v63 }
 0x8e1   :  { %v3732_v52 = vsub.f32 %v3639_v3, %v1868_v21  ;;  %v1940_v32 = vsel %vm162_vm0, %v1898_v5, 0.0  ;;  %v1899_v1 = vmul.f32 %v3726_v38, %v3726_v38 }
 0x8e2   :  { %1941 = vadd.xlane.f32.xlu1 %v1940_v32 }
 0x8e3   :  { %v1943_v39 = vsel %vm162_vm0, %v1899_v1, 0.0  ;;  %v1900_v58 = vmul.f32 %v3732_v52, %v3732_v52 }
 0x8e4   :  { %1944 = vadd.xlane.f32.xlu0 %v1943_v39 }
 0x8e5   :  { %v1946_v6 = vsel %vm162_vm0, %v1900_v58, 0.0 }
 0x8e6   :  { %1947 = vadd.xlane.f32.xlu1 %v1946_v6 }
 0x954   :  { %v1909_v31 = vpop.xlane.xlu0 %1908 }
 0x955   :  { %v1951_v10 = vmul.f32 0.0625, %v1909_v31 }
 0x956   :  { %v1912_v16 = vpop.xlane.xlu1 %1911 }
 0x957   :  { %v1967_v3 = vadd.f32 1e-05, %v1951_v10  ;;  %v1952_v23 = vmul.f32 0.0625, %v1912_v16 }
 0x958   :  { %v1903_v34 = vpop.xlane.xlu0 %1902 }
 0x959   :  { %2541 = vrsqrt.f32 %v1967_v3  ;;  %v1968_v14 = vadd.f32 1e-05, %v1952_v23  ;;  %v1949_v9 = vmul.f32 0.0625, %v1903_v34 }
 0x95a   :  { %v1906_v2 = vpop.xlane.xlu1 %1905 }
 0x95b   :  { %2543 = vrsqrt.f32 %v1968_v14  ;;  %v1965_v27 = vadd.f32 1e-05, %v1949_v9  ;;  %v1950_v41 = vmul.f32 0.0625, %v1906_v2 }
 0x95c   :  { %v1921_v18 = vpop.xlane.xlu0 %1920 }
 0x95d   :  { %2545 = vrsqrt.f32 %v1965_v27  ;;  %v1966_v62 = vadd.f32 1e-05, %v1950_v41  ;;  %v1955_v46 = vmul.f32 0.0625, %v1921_v18 }
 0x95e   :  { %v1924_v13 = vpop.xlane.xlu1 %1923 }
 0x95f   :  { %2547 = vrsqrt.f32 %v1966_v62  ;;  %v1971_v50 = vadd.f32 1e-05, %v1955_v46  ;;  %v1956_v11 = vmul.f32 0.0625, %v1924_v13 }
 0x960   :  { %v1915_v55 = vpop.xlane.xlu0 %1914 }
 0x961   :  { %2549 = vrsqrt.f32 %v1971_v50  ;;  %v1972_v12 = vadd.f32 1e-05, %v1956_v11  ;;  %v1953_v22 = vmul.f32 0.0625, %v1915_v55 }
 0x962   :  { %v1918_v47 = vpop.xlane.xlu1 %1917 }
 0x963   :  { %v2542_v53 = vpop.eup %2541  ;;  %2551 = vrsqrt.f32 %v1972_v12  ;;  %v1969_v4 = vadd.f32 1e-05, %v1953_v22  ;;  %v1954_v7 = vmul.f32 0.0625, %v1918_v47 }
 0x964   :  { %v1999_v35 = vmul.f32 %v2542_v53, %v3646_v42  ;;  %v1933_v20 = vpop.xlane.xlu0 %1932 }
 0x965   :  { %v2544_v40 = vpop.eup %2543  ;;  %2553 = vrsqrt.f32 %v1969_v4  ;;  %v1970_v36 = vadd.f32 1e-05, %v1954_v7  ;;  %v1959_v30 = vmul.f32 0.0625, %v1933_v20 }
 0x966   :  { %v2019_v43 = vmul.f32 %v3743_v19, %v1999_v35  ;;  %v2000_v61 = vmul.f32 %v2544_v40, %v3649_v15  ;;  %v1936_v59 = vpop.xlane.xlu1 %1935 }
 0x967   :  { %v2546_v51 = vpop.eup %2545  ;;  %2555 = vrsqrt.f32 %v1970_v36  ;;  %v1975_v49 = vadd.f32 1e-05, %v1959_v30  ;;  %v1960_v54 = vmul.f32 0.0625, %v1936_v59 }
 0x968   :  { %v2039_v60 = vadd.f32 %v3747_v26, %v2019_v43  ;;  %v2020_v44 = vmul.f32 %v3743_v19, %v2000_v61  ;;  %v1997_v42 = vmul.f32 %v2546_v51, %v3654_v57  ;;  %v1927_v21 = vpop.xlane.xlu0 %1926 }
 0x969   :  { %v2548_v63 = vpop.eup %2547  ;;  %2557 = vrsqrt.f32 %v1975_v49  ;;  %v1976_v5 = vadd.f32 1e-05, %v1960_v54  ;;  %v1957_v32 = vmul.f32 0.0625, %v1927_v21 }
 0x96a   :  { %2055 = vst.msk [vmem:[#allocation11 + $0x10] sm:$0xff] %vm162_vm0, %v2039_v60  ;;  %v2040_v15 = vadd.f32 %v3747_v26, %v2020_v44  ;;  %v2017_v1 = vmul.f32 %v3743_v19, %v1997_v42  ;;  %v1998_v39 = vmul.f32 %v2548_v63, %v3660_v25  ;;  %v1930_v58 = vpop.xlane.xlu1 %1929 }
 0x96b   :  { %v2550_v6 = vpop.eup %2549  ;;  %2559 = vrsqrt.f32 %v1976_v5  ;;  %v1973_v31 = vadd.f32 1e-05, %v1957_v32  ;;  %v1958_v10 = vmul.f32 0.0625, %v1930_v58 }
 0x96c   :  { %2056 = vst.msk [vmem:[#allocation11 + $0x18] sm:$0xff] %vm162_vm0, %v2040_v15  ;;  %v2037_v57 = vadd.f32 %v3747_v26, %v2017_v1  ;;  %v2018_v16 = vmul.f32 %v3743_v19, %v1998_v39  ;;  %v2003_v3 = vmul.f32 %v2550_v6, %v3666_v33 }
 0x96d   :  { %v2552_v23 = vpop.eup %2551  ;;  %2561 = vrsqrt.f32 %v1973_v31  ;;  %v1974_v34 = vadd.f32 1e-05, %v1958_v10  ;;  %v1939_v14 = vpop.xlane.xlu0 %1938 }
 0x96e   :  { %2053 = vst.msk [vmem:[#allocation11] sm:$0xff] %vm162_vm0, %v2037_v57  ;;  %v2038_v25 = vadd.f32 %v3747_v26, %v2018_v16  ;;  %v2023_v9 = vmul.f32 %v3743_v19, %v2003_v3  ;;  %v2004_v2 = vmul.f32 %v2552_v23, %v3672_v29  ;;  %v1961_v27 = vmul.f32 0.0625, %v1939_v14 }
 0x96f   :  { %v2554_v41 = vpop.eup %2553  ;;  %2563 = vrsqrt.f32 %v1974_v34  ;;  %v1942_v18 = vpop.xlane.xlu1 %1941 }
 0x970   :  { %2054 = vst.msk [vmem:[#allocation11 + $0x8] sm:$0xff] %vm162_vm0, %v2038_v25  ;;  %v2043_v33 = vadd.f32 %v3747_v26, %v2023_v9  ;;  %v2024_v62 = vmul.f32 %v3743_v19, %v2004_v2  ;;  %v2001_v46 = vmul.f32 %v2554_v41, %v3678_v56  ;;  %v1977_v13 = vadd.f32 1e-05, %v1961_v27 }
 0x971   :  { %v2556_v8 = vpop.eup %2555  ;;  %v1962_v50 = vmul.f32 0.0625, %v1942_v18  ;;  %v1945_v11 = vpop.xlane.xlu0 %1944 }
 0x972   :  { %2059 = vst.msk [vmem:[#allocation11 + $0x30] sm:$0xff] %vm162_vm0, %v2043_v33  ;;  %v2044_v29 = vadd.f32 %v3747_v26, %v2024_v62  ;;  %v2021_v55 = vmul.f32 %v3743_v19, %v2001_v46  ;;  %v2002_v12 = vmul.f32 %v2556_v8, %v3684_v17  ;;  %2565 = vrsqrt.f32 %v1977_v13 }
 0x973   :  { %v2558_v22 = vpop.eup %2557  ;;  %v1978_v47 = vadd.f32 1e-05, %v1962_v50  ;;  %v1963_v53 = vmul.f32 0.0625, %v1945_v11  ;;  %v1948_v4 = vpop.xlane.xlu1 %1947 }
 0x974   :  { %2060 = vst.msk [vmem:[#allocation11 + $0x38] sm:$0xff] %vm162_vm0, %v2044_v29  ;;  %v2041_v56 = vadd.f32 %v3747_v26, %v2021_v55  ;;  %v2022_v7 = vmul.f32 %v3743_v19, %v2002_v12  ;;  %v2007_v35 = vmul.f32 %v2558_v22, %v3690_v24  ;;  %v1964_v20 = vmul.f32 0.0625, %v1948_v4 }
 0x975   :  { %v2560_v40 = vpop.eup %2559  ;;  %2567 = vrsqrt.f32 %v1978_v47  ;;  %v1979_v36 = vadd.f32 1e-05, %v1963_v53 }
 0x976   :  { %2057 = vst.msk [vmem:[#allocation11 + $0x20] sm:$0xff] %vm162_vm0, %v2041_v56  ;;  %v2042_v17 = vadd.f32 %v3747_v26, %v2022_v7  ;;  %v2027_v30 = vmul.f32 %v3743_v19, %v2007_v35  ;;  %v2008_v43 = vmul.f32 %v2560_v40, %v3696_v48  ;;  %v1980_v61 = vadd.f32 1e-05, %v1964_v20 }
 0x977   :  { %v2562_v59 = vpop.eup %2561  ;;  %2569 = vrsqrt.f32 %v1979_v36 }
 0x978   :  { %2058 = vst.msk [vmem:[#allocation11 + $0x28] sm:$0xff] %vm162_vm0, %v2042_v17  ;;  %v2047_v51 = vadd.f32 %v3747_v26, %v2027_v30  ;;  %v2028_v24 = vmul.f32 %v3743_v19, %v2008_v43  ;;  %v2005_v49 = vmul.f32 %v2562_v59, %v3702_v0  ;;  %2571 = vrsqrt.f32 %v1980_v61 }
 0x979   :  { %v2564_v54 = vpop.eup %2563 }
 0x97a   :  { %2063 = vst.msk [vmem:[#allocation11 + $0x50] sm:$0xff] %vm162_vm0, %v2047_v51  ;;  %v2048_v60 = vadd.f32 %v3747_v26, %v2028_v24  ;;  %v2025_v44 = vmul.f32 %v3743_v19, %v2005_v49  ;;  %v2006_v48 = vmul.f32 %v2564_v54, %v3708_v37 }
 0x97c   :  { %v2566_v42 = vpop.eup %2565  ;;  %2064 = vst.msk [vmem:[#allocation11 + $0x58] sm:$0xff] %vm162_vm0, %v2048_v60  ;;  %v2045_v21 = vadd.f32 %v3747_v26, %v2025_v44  ;;  %v2026_v63 = vmul.f32 %v3743_v19, %v2006_v48 }
 0x97d   :  { %v2009_v5 = vmul.f32 %v2566_v42, %v3717_v28 }
 0x97e   :  { %2061 = vst.msk [vmem:[#allocation11 + $0x40] sm:$0xff] %vm162_vm0, %v2045_v21  ;;  %v2046_v0 = vadd.f32 %v3747_v26, %v2026_v63 }
 0x97f   :  { %v2568_v32 = vpop.eup %2567  ;;  %v2029_v15 = vmul.f32 %v3743_v19, %v2009_v5 }
 0x980   :  { %2062 = vst.msk [vmem:[#allocation11 + $0x48] sm:$0xff] %vm162_vm0, %v2046_v0  ;;  %v2010_v37 = vmul.f32 %v2568_v32, %v3721_v45 }
 0x981   :  { %v2570_v1 = vpop.eup %2569  ;;  %v2049_v39 = vadd.f32 %v3747_v26, %v2029_v15 }
 0x982   :  { %v2572_v58 = vpop.eup %2571  ;;  %v2030_v6 = vmul.f32 %v3743_v19, %v2010_v37  ;;  %v2011_v31 = vmul.f32 %v2570_v1, %v3726_v38 }
 0x983   :  { %2065 = vst.msk [vmem:[#allocation11 + $0x60] sm:$0xff] %vm162_vm0, %v2049_v39  ;;  %v2012_v28 = vmul.f32 %v2572_v58, %v3732_v52 }
 0x984   :  { %v2050_v10 = vadd.f32 %v3747_v26, %v2030_v6  ;;  %v2031_v57 = vmul.f32 %v3743_v19, %v2011_v31 }
 0x985   :  { %v2032_v45 = vmul.f32 %v3743_v19, %v2012_v28 }
 0x986   :  { %2066 = vst.msk [vmem:[#allocation11 + $0x68] sm:$0xff] %vm162_vm0, %v2050_v10  ;;  %v2051_v16 = vadd.f32 %v3747_v26, %v2031_v57 }
 0x987   :  { %v2052_v3 = vadd.f32 %v3747_v26, %v2032_v45 }
 0x988   :  { %2067 = vst.msk [vmem:[#allocation11 + $0x70] sm:$0xff] %vm162_vm0, %v2051_v16 }
 0x989   :  { %2068 = vst.msk [vmem:[#allocation11 + $0x78] sm:$0xff] %vm162_vm0, %v2052_v3 }
 0x98a   :  { %2711 = shalt.err (!%p2708_p2)
}
 0x98b   :  { %s2712_s24 = scalar_lea.hbm %s3835_s7, 2048 }
 0x98c   :  { %p2713_p3 = scmp.ne.s32.totalorder %s3835_s7, %s2712_s24  ;;  %p2716_p4 = scmp.lt.u32.totalorder %s2712_s24, %s3835_s7 }
 0x98e   :  { %p2718_p5 = pnand %p2716_p4, %p2713_p3 }
 0x990   :  { %2721 = shalt.err (!%p2718_p5)
}
 0x991   :  { %2080 = dma.vmem_to_hbm [thread:$0]  %s2075_s2, 2048, %s3835_s7, [#allocation4], %s2735_s5, %s2735_s5, %s2736_s13  }
 0x992   :  { %2728 = dma.done.wait [#allocation4], 2048  }
 0x993   :  { %2729 = vsyncadd [#allocation4], 4294965248 }
 0x994   :  { %2084 = vsyncpa [#allocation3], 1 }
 0x995   :  { %2085 = vsyncpa [#allocation6], 1 }
 0x996   :  { %2086 = vsyncpa [#allocation9], 1 }
 0x997   :  { %2087 = vsyncpa [#allocation4], 1 }

// kernel: ltam_forward.3
= control target key start
LH: loop header
LB: loop body
LE: loop exit
PB: predicated region body
PF: predicated region fallthrough
CT: control target
= control target key end

     0   :  { %vm134_vm0 = vcmask 130048   ;;  %s3883_s0 = inlined_call_operand.vmem [shape: f32[512,16], index: 0, kind: input, shape index: {}]   ;;  %s3884_s1 = inlined_call_operand.vmem [shape: bf16[4,16,16], index: 1, kind: input, shape index: {}]   ;;  %s3885_s2 = inlined_call_operand.vmem [shape: f32[4,16], index: 2, kind: input, shape index: {}]   ;;  %s3886_s3 = inlined_call_operand.hbm [shape: f32[128,16], index: 3, kind: output, shape index: {}]  }
   0x1   :  { %v2352_v0 = vld [vmem:[%s3884_s1 + $0x8] sm:$0xff]   ;;  %v16_v1 = vld [vmem:[%s3883_s0] sm:$0xff]  ;;  %v18_v3 = vld [vmem:[%s3883_s0 + $0x10] sm:$0xff] }
   0x2   :  { %v17_v2 = vld [vmem:[%s3883_s0 + $0x8] sm:$0xff]  ;;  %2163 = vmatprep.subr.bf16.mxu0 %v2352_v0  ;;  %v19_v5 = vld [vmem:[%s3883_s0 + $0x18] sm:$0xff]  ;;  %v20_v6 = vld [vmem:[%s3883_s0 + $0x20] sm:$0xff]  ;;  %2331 = vmatprep.subr.bf16.mxu1 %v2352_v0 }
   0x3   :  { %v2528_v4 = vpack.c.bf16 %v17_v2, %v16_v1  ;;  %v21_v7 = vld [vmem:[%s3883_s0 + $0x28] sm:$0xff]  ;;  %2164 = vmatpush3.bf16.msra.mxu0 %v2352_v0  ;;  %v2539_v8 = vpack.c.bf16 %v19_v5, %v18_v3  ;;  %2332 = vmatpush3.bf16.msra.mxu1 %v2352_v0  ;;  %v22_v10 = vld [vmem:[%s3883_s0 + $0x30] sm:$0xff]  ;;  %v23_v11 = vld [vmem:[%s3883_s0 + $0x38] sm:$0xff] }
   0x4   :  { %v2541_v9 = vpack.c.bf16 %v21_v7, %v20_v6  ;;  %v24_v12 = vld [vmem:[%s3883_s0 + $0x40] sm:$0xff]  ;;  %v25_v13 = vld [vmem:[%s3883_s0 + $0x48] sm:$0xff]  ;;  %v2564_v15 = vpack.c.bf16 %v23_v11, %v22_v10  ;;  %v26_v17 = vld [vmem:[%s3883_s0 + $0x50] sm:$0xff] }
   0x5   :  { %2165 = vmatprep.mubr.msk.bf16.mxu0 %vm134_vm0, %v2528_v4  ;;  %v2353_v14 = vld [vmem:[%s3884_s1] sm:$0xff]   ;;  %v2566_v16 = vpack.c.bf16 %v25_v13, %v24_v12  ;;  %v27_v18 = vld [vmem:[%s3883_s0 + $0x58] sm:$0xff]  ;;  %v29_v20 = vld [vmem:[%s3883_s0 + $0x68] sm:$0xff] }
   0x6   :  { %2166 = vmatmul.mubr.msk.bf16.vlgmr.msra.gmra.mrb[0].mxu0 %vm134_vm0, %v2539_v8  ;;  %2295 = vmatprep.subr.bf16.mxu0 %v2353_v14  ;;  %v28_v19 = vld [vmem:[%s3883_s0 + $0x60] sm:$0xff]  ;;  %v2584_v21 = vpack.c.bf16 %v27_v18, %v26_v17  ;;  %v30_v24 = vld [vmem:[%s3883_s0 + $0x70] sm:$0xff]  ;;  %v73_v25 = vld [vmem:[%s3883_s0 + $0x1c8] sm:$0xff] }
   0x7   :  { %2169 = vmatprep.mubr.msk.bf16.mxu0 %vm134_vm0, %v2541_v9  ;;  %2296 = vmatpush3.bf16.msra.mxu0 %v2353_v14  ;;  %v2586_v22 = vpack.c.bf16 %v29_v20, %v28_v19  ;;  %v72_v23 = vld [vmem:[%s3883_s0 + $0x1c0] sm:$0xff]  ;;  %v74_v26 = vld [vmem:[%s3883_s0 + $0x1d0] sm:$0xff]  ;;  %v75_v27 = vld [vmem:[%s3883_s0 + $0x1d8] sm:$0xff] }
   0x8   :  { %v31_v28 = vld [vmem:[%s3883_s0 + $0x78] sm:$0xff]  ;;  %v2608_v29 = vpack.c.bf16 %v73_v25, %v72_v23  ;;  %v2610_v30 = vpack.c.bf16 %v75_v27, %v74_v26  ;;  %v76_v31 = vld [vmem:[%s3883_s0 + $0x1e0] sm:$0xff]  ;;  %v77_v32 = vld [vmem:[%s3883_s0 + $0x1e8] sm:$0xff] }
   0x9   :  { %v32_v33 = vld [vmem:[%s3883_s0 + $0x80] sm:$0xff]  ;;  %v2623_v34 = vpack.c.bf16 %v77_v32, %v76_v31  ;;  %v33_v35 = vld [vmem:[%s3883_s0 + $0x88] sm:$0xff]  ;;  %v2354_v36 = vld [vmem:[%s3884_s1 + $0x10] sm:$0xff]  }
   0xa   :  { %2221 = vmatprep.mubr.msk.bf16.mxu1 %vm134_vm0, %v2608_v29 }
   0xb   :  { %2222 = vmatmul.mubr.msk.bf16.vlgmr.msra.gmra.mrb[0].mxu1 %vm134_vm0, %v2610_v30 }
   0xe   :  { %2170 = vmatmul.mubr.msk.bf16.gmra.mrb[4].mxu0 %vm134_vm0, %v2564_v15 }
   0xf   :  { %2173 = vmatprep.mubr.msk.bf16.mxu0 %vm134_vm0, %v2566_v16 }
  0x16   :  { %2174 = vmatmul.mubr.msk.bf16.gmra.mrb[8].mxu0 %vm134_vm0, %v2584_v21 }
  0x17   :  { %2177 = vmatprep.mubr.msk.bf16.mxu0 %vm134_vm0, %v2586_v22 }
  0x18   :  { %8 = vsyncpa [#allocation3], 0  ;;  %v99_v37 = vpack.c.bf16 %v31_v28, %v30_v24  ;;  %2225 = vmatprep.mubr.msk.bf16.mxu1 %vm134_vm0, %v2623_v34  ;;  %v78_v38 = vld [vmem:[%s3883_s0 + $0x1f0] sm:$0xff]  ;;  %v79_v39 = vld [vmem:[%s3883_s0 + $0x1f8] sm:$0xff]  ;;  %2229 = vmatprep.subr.bf16.mxu1 %v2354_v36  ;;  %v100_v40 = vpack.c.bf16 %v33_v35, %v32_v33  ;;  %s2493_s12 = smov [#allocation2]  }
  0x19   :  { %2230 = vmatpush3.bf16.msra.mxu1 %v2354_v36  ;;  %v2643_v41 = vpack.c.bf16 %v79_v39, %v78_v38  ;;  %v34_v42 = vld [vmem:[%s3883_s0 + $0x90] sm:$0xff]  ;;  %v35_v43 = vld [vmem:[%s3883_s0 + $0x98] sm:$0xff]  ;;  %v36_v44 = vld [vmem:[%s3883_s0 + $0xa0] sm:$0xff]  ;;  %v124_v38 = vlaneseq  ;;  %s1842_s13 = sshll.u32 %s2493_s12, 4  ;;  %s1843_s13 = int_to_ptr.vmem [resolvable:$true] %s1842_s13 }
  0x1a   :  { %v37_v45 = vld [vmem:[%s3883_s0 + $0xa8] sm:$0xff]  ;;  %v101_v46 = vpack.c.bf16 %v35_v43, %v34_v42  ;;  %v38_v48 = vld [vmem:[%s3883_s0 + $0xb0] sm:$0xff]  ;;  %v39_v49 = vld [vmem:[%s3883_s0 + $0xb8] sm:$0xff]  ;;  %s2469_s20 = scalar_lea.vmem %s1843_s13, 2048  ;;  %p2474_p1 = scmp.lt.s32.totalorder %s1843_s13, %s1843_s13 }
  0x1b   :  { %2226 = vmatmul.mubr.msk.bf16.gmra.mrb[4].mxu1 %vm134_vm0, %v2643_v41  ;;  %v102_v47 = vpack.c.bf16 %v37_v45, %v36_v44  ;;  %v40_v50 = vld [vmem:[%s3883_s0 + $0xc0] sm:$0xff]  ;;  %v41_v51 = vld [vmem:[%s3883_s0 + $0xc8] sm:$0xff]  ;;  %v103_v52 = vpack.c.bf16 %v39_v49, %v38_v48  ;;  %v42_v54 = vld [vmem:[%s3883_s0 + $0xd0] sm:$0xff]  ;;  %v2857_v39 = vshrl.u32 %v124_v38, 7  ;;  %p2470_p0 = scmp.ne.s32.totalorder %s1843_s13, %s2469_s20  ;;  %p2475_p2 = scmp.lt.s32.totalorder %s2469_s20, %s2469_s20 }
  0x1c   :  { %2231 = vmatprep.mubr.msk.bf16.mxu1 %vm134_vm0, %v2528_v4  ;;  %v2681_v53 = vpack.c.bf16 %v41_v51, %v40_v50  ;;  %v43_v55 = vld [vmem:[%s3883_s0 + $0xd8] sm:$0xff]  ;;  %v44_v56 = vld [vmem:[%s3883_s0 + $0xe0] sm:$0xff]  ;;  %v45_v57 = vld [vmem:[%s3883_s0 + $0xe8] sm:$0xff] }
  0x1d   :  { %v2700_v58 = vpack.c.bf16 %v43_v55, %v42_v54  ;;  %v2704_v59 = vpack.c.bf16 %v45_v57, %v44_v56  ;;  %v46_v60 = vld [vmem:[%s3883_s0 + $0xf0] sm:$0xff]  ;;  %v47_v61 = vld [vmem:[%s3883_s0 + $0xf8] sm:$0xff]  ;;  %v48_v62 = vld [vmem:[%s3883_s0 + $0x100] sm:$0xff]  ;;  %3899 = vst [vmem:[#allocation5_spill] sm:$0xff] %v2857_v39  ;;  %p2476_p3 = por %p2475_p2, %p2474_p1 }
  0x1e   :  { %2178 = vmatmul.mubr.msk.bf16.gmra.mrb[12].mxu0 %vm134_vm0, %v99_v37  ;;  %v49_v63 = vld [vmem:[%s3883_s0 + $0x108] sm:$0xff]  ;;  %v2724_v0 = vpack.c.bf16 %v47_v61, %v46_v60  ;;  %v50_v2 = vld [vmem:[%s3883_s0 + $0x110] sm:$0xff]  ;;  %v51_v3 = vld [vmem:[%s3883_s0 + $0x118] sm:$0xff] }
  0x1f   :  { %2181 = vmatprep.mubr.msk.bf16.mxu0 %vm134_vm0, %v100_v40  ;;  %v108_v1 = vpack.c.bf16 %v49_v63, %v48_v62  ;;  %v52_v4 = vld [vmem:[%s3883_s0 + $0x120] sm:$0xff]  ;;  %v53_v5 = vld [vmem:[%s3883_s0 + $0x128] sm:$0xff]  ;;  %v109_v6 = vpack.c.bf16 %v51_v3, %v50_v2  ;;  %v58_v14 = vld [vmem:[%s3883_s0 + $0x150] sm:$0xff]  ;;  %p2477_p4 = pnand %p2476_p3, %p2470_p0 }
  0x20   :  { %v110_v7 = vpack.c.bf16 %v53_v5, %v52_v4  ;;  %v56_v10 = vld [vmem:[%s3883_s0 + $0x140] sm:$0xff]  ;;  %v57_v11 = vld [vmem:[%s3883_s0 + $0x148] sm:$0xff]  ;;  %v62_v20 = vld [vmem:[%s3883_s0 + $0x170] sm:$0xff] }
  0x21   :  { %v112_v13 = vpack.c.bf16 %v57_v11, %v56_v10  ;;  %v61_v17 = vld [vmem:[%s3883_s0 + $0x168] sm:$0xff]  ;;  %v66_v26 = vld [vmem:[%s3883_s0 + $0x190] sm:$0xff]  ;;  %v67_v27 = vld [vmem:[%s3883_s0 + $0x198] sm:$0xff] }
  0x22   :  { %v65_v23 = vld [vmem:[%s3883_s0 + $0x188] sm:$0xff]  ;;  %v68_v28 = vld [vmem:[%s3883_s0 + $0x1a0] sm:$0xff]  ;;  %v117_v32 = vpack.c.bf16 %v67_v27, %v66_v26  ;;  %v70_v35 = vld [vmem:[%s3883_s0 + $0x1b0] sm:$0xff] }
  0x23   :  { %2232 = vmatmul.mubr.msk.bf16.vlgmr.msra.gmra.mrb[8].mxu1 %vm134_vm0, %v2539_v8  ;;  %v54_v8 = vld [vmem:[%s3883_s0 + $0x130] sm:$0xff]  ;;  %v69_v31 = vld [vmem:[%s3883_s0 + $0x1a8] sm:$0xff]  ;;  %v71_v36 = vld [vmem:[%s3883_s0 + $0x1b8] sm:$0xff] }
  0x24   :  { %2235 = vmatprep.mubr.msk.bf16.mxu1 %vm134_vm0, %v2541_v9  ;;  %v55_v9 = vld [vmem:[%s3883_s0 + $0x138] sm:$0xff]  ;;  %v118_v33 = vpack.c.bf16 %v69_v31, %v68_v28  ;;  %v2863_v42 = vld [vmem:[%s3885_s2] sm:$0xf] }
  0x25   :  { %v111_v12 = vpack.c.bf16 %v55_v9, %v54_v8 }
  0x26   :  { %2182 = vmatmul.mubr.msk.bf16.gmra.mrb[16].mxu0 %vm134_vm0, %v101_v46 }
  0x27   :  { %2185 = vmatprep.mubr.msk.bf16.mxu0 %vm134_vm0, %v102_v47 }
  0x2b   :  { %2236 = vmatmul.mubr.msk.bf16.gmra.mrb[12].mxu1 %vm134_vm0, %v2564_v15  ;;  %v59_v15 = vld [vmem:[%s3883_s0 + $0x158] sm:$0xff] }
  0x2c   :  { %2239 = vmatprep.mubr.msk.bf16.mxu1 %vm134_vm0, %v2566_v16  ;;  %v60_v16 = vld [vmem:[%s3883_s0 + $0x160] sm:$0xff]  ;;  %v113_v18 = vpack.c.bf16 %v59_v15, %v58_v14 }
  0x2d   :  { %v114_v19 = vpack.c.bf16 %v61_v17, %v60_v16 }
  0x2e   :  { %2186 = vmatmul.mubr.msk.bf16.gmra.mrb[20].mxu0 %vm134_vm0, %v103_v52 }
  0x2f   :  { %2189 = vmatprep.mubr.msk.bf16.mxu0 %vm134_vm0, %v2681_v53 }
  0x33   :  { %2240 = vmatmul.mubr.msk.bf16.gmra.mrb[16].mxu1 %vm134_vm0, %v2584_v21  ;;  %v63_v21 = vld [vmem:[%s3883_s0 + $0x178] sm:$0xff] }
  0x34   :  { %2243 = vmatprep.mubr.msk.bf16.mxu1 %vm134_vm0, %v2586_v22  ;;  %v64_v22 = vld [vmem:[%s3883_s0 + $0x180] sm:$0xff]  ;;  %v115_v24 = vpack.c.bf16 %v63_v21, %v62_v20 }
  0x35   :  { %v116_v25 = vpack.c.bf16 %v65_v23, %v64_v22 }
  0x36   :  { %2190 = vmatmul.mubr.msk.bf16.gmra.mrb[24].mxu0 %vm134_vm0, %v2700_v58 }
  0x37   :  { %2193 = vmatprep.mubr.msk.bf16.mxu0 %vm134_vm0, %v2704_v59 }
  0x3b   :  { %2244 = vmatmul.mubr.msk.bf16.gmra.mrb[20].mxu1 %vm134_vm0, %v99_v37  ;;  %v119_v37 = vpack.c.bf16 %v71_v36, %v70_v35 }
  0x3c   :  { %2247 = vmatprep.mubr.msk.bf16.mxu1 %vm134_vm0, %v100_v40  ;;  %v126_v40 = vsub.s32 1, %v2857_v39 }
  0x3e   :  { %2194 = vmatmul.mubr.msk.bf16.gmra.mrb[28].mxu0 %vm134_vm0, %v2724_v0 }
  0x3f   :  { %2197 = vmatprep.mubr.msk.bf16.mxu0 %vm134_vm0, %v108_v1 }
  0x43   :  { %2248 = vmatmul.mubr.msk.bf16.gmra.mrb[24].mxu1 %vm134_vm0, %v101_v46 }
  0x44   :  { %2251 = vmatprep.mubr.msk.bf16.mxu1 %vm134_vm0, %v102_v47 }
  0x46   :  { %2198 = vmatmul.mubr.msk.bf16.gmra.mrb[32].mxu0 %vm134_vm0, %v109_v6 }
  0x47   :  { %2201 = vmatprep.mubr.msk.bf16.mxu0 %vm134_vm0, %v110_v7 }
  0x4b   :  { %2252 = vmatmul.mubr.msk.bf16.gmra.mrb[28].mxu1 %vm134_vm0, %v103_v52 }
  0x4c   :  { %2255 = vmatprep.mubr.msk.bf16.mxu1 %vm134_vm0, %v2681_v53 }
  0x4e   :  { %2202 = vmatmul.mubr.msk.bf16.gmra.mrb[36].mxu0 %vm134_vm0, %v111_v12 }
  0x4f   :  { %2205 = vmatprep.mubr.msk.bf16.mxu0 %vm134_vm0, %v112_v13 }
  0x53   :  { %2256 = vmatmul.mubr.msk.bf16.gmra.mrb[32].mxu1 %vm134_vm0, %v2700_v58 }
  0x54   :  { %2259 = vmatprep.mubr.msk.bf16.mxu1 %vm134_vm0, %v2704_v59 }
  0x56   :  { %2206 = vmatmul.mubr.msk.bf16.gmra.mrb[40].mxu0 %vm134_vm0, %v113_v18 }
  0x57   :  { %2209 = vmatprep.mubr.msk.bf16.mxu0 %vm134_vm0, %v114_v19 }
  0x5b   :  { %2260 = vmatmul.mubr.msk.bf16.gmra.mrb[36].mxu1 %vm134_vm0, %v2724_v0 }
  0x5c   :  { %2263 = vmatprep.mubr.msk.bf16.mxu1 %vm134_vm0, %v108_v1 }
  0x5e   :  { %2210 = vmatmul.mubr.msk.bf16.gmra.mrb[44].mxu0 %vm134_vm0, %v115_v24 }
  0x5f   :  { %2213 = vmatprep.mubr.msk.bf16.mxu0 %vm134_vm0, %v116_v25 }
  0x63   :  { %2264 = vmatmul.mubr.msk.bf16.gmra.mrb[40].mxu1 %vm134_vm0, %v109_v6 }
  0x64   :  { %2267 = vmatprep.mubr.msk.bf16.mxu1 %vm134_vm0, %v110_v7 }
  0x66   :  { %2214 = vmatmul.mubr.msk.bf16.gmra.mrb[48].mxu0 %vm134_vm0, %v117_v32 }
  0x67   :  { %2217 = vmatprep.mubr.msk.bf16.mxu0 %vm134_vm0, %v118_v33 }
  0x6b   :  { %2268 = vmatmul.mubr.msk.bf16.gmra.mrb[44].mxu1 %vm134_vm0, %v111_v12 }
  0x6c   :  { %2271 = vmatprep.mubr.msk.bf16.mxu1 %vm134_vm0, %v112_v13 }
  0x6e   :  { %2218 = vmatmul.mubr.msk.bf16.gmra.mrb[52].mxu0 %vm134_vm0, %v119_v37 }
  0x6f   :  { %2297 = vmatprep.mubr.msk.bf16.mxu0 %vm134_vm0, %v2681_v53 }
  0x73   :  { %2272 = vmatmul.mubr.msk.bf16.gmra.mrb[48].mxu1 %vm134_vm0, %v113_v18 }
  0x74   :  { %2275 = vmatprep.mubr.msk.bf16.mxu1 %vm134_vm0, %v114_v19 }
  0x76   :  { %2298 = vmatmul.mubr.msk.bf16.vlgmr.msra.gmra.mrb[56].mxu0 %vm134_vm0, %v2700_v58 }
  0x77   :  { %2301 = vmatprep.mubr.msk.bf16.mxu0 %vm134_vm0, %v2704_v59 }
  0x7b   :  { %2276 = vmatmul.mubr.msk.bf16.gmra.mrb[52].mxu1 %vm134_vm0, %v115_v24 }
  0x7c   :  { %2279 = vmatprep.mubr.msk.bf16.mxu1 %vm134_vm0, %v116_v25 }
  0x7e   :  { %2302 = vmatmul.mubr.msk.bf16.gmra.mrb[60].mxu0 %vm134_vm0, %v2724_v0 }
  0x7f   :  { %2305 = vmatprep.mubr.msk.bf16.mxu0 %vm134_vm0, %v2608_v29 }
  0x83   :  { %2280 = vmatmul.mubr.msk.bf16.gmra.mrb[56].mxu1 %vm134_vm0, %v117_v32 }
  0x84   :  { %2283 = vmatprep.mubr.msk.bf16.mxu1 %vm134_vm0, %v118_v33 }
  0x86   :  { %2306 = vmatmul.mubr.msk.bf16.gmra.mrb[64].mxu0 %vm134_vm0, %v2610_v30 }
  0x87   :  { %2309 = vmatprep.mubr.msk.bf16.mxu0 %vm134_vm0, %v2623_v34 }
  0x8b   :  { %2284 = vmatmul.mubr.msk.bf16.gmra.mrb[60].mxu1 %vm134_vm0, %v119_v37 }
  0x8c   :  { %2287 = vmatprep.mubr.msk.bf16.mxu1 %vm134_vm0, %v2608_v29  ;;  %v2866_v29 = vrot.slane %v2863_v42, %v126_v40 }
  0x8e   :  { %2310 = vmatmul.mubr.msk.bf16.gmra.mrb[68].mxu0 %vm134_vm0, %v2643_v41 }
  0x93   :  { %2288 = vmatmul.mubr.msk.bf16.gmra.mrb[64].mxu1 %vm134_vm0, %v2610_v30 }
  0x94   :  { %2291 = vmatprep.mubr.msk.bf16.mxu1 %vm134_vm0, %v2623_v34 }
  0x9b   :  { %2292 = vmatmul.mubr.msk.bf16.gmra.mrb[68].mxu1 %vm134_vm0, %v2643_v41 }
  0xd9   :  { %v2167_v30 = vpop.f32.mrb[0].mxu0 }
  0xda   :  { %v265_v43 = vpop.f32.mrb[1].mxu0  ;;  %v2869_v34 = vadd.f32 %v2167_v30, %v2866_v29 }
  0xdb   :  { %v2168_v44 = vpop.f32.mrb[2].mxu0  ;;  %v2875_v46 = vadd.f32 %v265_v43, %v2866_v29 }
  0xdc   :  { %v2872_v41 = vadd.f32 %v2168_v44, %v2866_v29  ;;  %v268_v45 = vpop.f32.mrb[3].mxu0 }
  0xdd   :  { %v2878_v47 = vadd.f32 %v268_v45, %v2866_v29 }
  0xde   :  { %v947_v48 = vpack.c.bf16 %v2872_v41, %v2869_v34  ;;  %v2223_v2 = vpop.f32.mrb[0].mxu1 }
  0xdf   :  { %v946_v49 = vpack.c.bf16 %v2878_v47, %v2875_v46  ;;  %v2913_v5 = vadd.f32 %v2223_v2, %v2866_v29  ;;  %v489_v6 = vpop.f32.mrb[1].mxu1 }
  0xe0   :  { %v2918_v8 = vadd.f32 %v489_v6, %v2866_v29  ;;  %v2224_v9 = vpop.f32.mrb[2].mxu1 }
  0xe1   :  { %v2171_v50 = vpop.f32.mrb[4].mxu0  ;;  %v2923_v11 = vadd.f32 %v2224_v9, %v2866_v29  ;;  %v492_v12 = vpop.f32.mrb[3].mxu1 }
  0xe2   :  { %v281_v51 = vpop.f32.mrb[5].mxu0  ;;  %v2885_v53 = vadd.f32 %v2171_v50, %v2866_v29  ;;  %v2926_v13 = vadd.f32 %v492_v12, %v2866_v29 }
  0xe3   :  { %v2172_v52 = vpop.f32.mrb[6].mxu0  ;;  %v2891_v56 = vadd.f32 %v281_v51, %v2866_v29 }
  0xe4   :  { %v2888_v54 = vadd.f32 %v2172_v52, %v2866_v29  ;;  %v284_v55 = vpop.f32.mrb[7].mxu0 }
  0xe5   :  { %v2894_v57 = vadd.f32 %v284_v55, %v2866_v29  ;;  %v975_v55 = vsel %vm134_vm0, %v946_v49, 0  ;;  %v978_v49 = vsel %vm134_vm0, %v947_v48, 0 }
  0xe6   :  { %v949_v58 = vpack.c.bf16 %v2888_v54, %v2885_v53 }
  0xe7   :  { %v948_v59 = vpack.c.bf16 %v2894_v57, %v2891_v56 }
  0xe9   :  { %v2175_v60 = vpop.f32.mrb[8].mxu0  ;;  %v981_v41 = vsel %vm134_vm0, %v948_v59, 0 }
  0xea   :  { %v297_v61 = vpop.f32.mrb[9].mxu0  ;;  %v2901_v63 = vadd.f32 %v2175_v60, %v2866_v29 }
  0xeb   :  { %v2176_v62 = vpop.f32.mrb[10].mxu0  ;;  %v2907_v3 = vadd.f32 %v297_v61, %v2866_v29 }
  0xec   :  { %v2904_v0 = vadd.f32 %v2176_v62, %v2866_v29  ;;  %v300_v1 = vpop.f32.mrb[11].mxu0 }
  0xed   :  { %v2910_v4 = vadd.f32 %v300_v1, %v2866_v29 }
  0xee   :  { %v951_v7 = vpack.c.bf16 %v2904_v0, %v2901_v63  ;;  %v2227_v24 = vpop.f32.mrb[4].mxu1 }
  0xef   :  { %v950_v10 = vpack.c.bf16 %v2910_v4, %v2907_v3  ;;  %v505_v26 = vpop.f32.mrb[5].mxu1  ;;  %v2949_v33 = vadd.f32 %v2227_v24, %v2866_v29 }
  0xf0   :  { %v2952_v35 = vadd.f32 %v505_v26, %v2866_v29  ;;  %v2228_v36 = vpop.f32.mrb[6].mxu1 }
  0xf1   :  { %v2179_v14 = vpop.f32.mrb[12].mxu0  ;;  %v508_v30 = vpop.f32.mrb[7].mxu1  ;;  %v2959_v45 = vadd.f32 %v2228_v36, %v2866_v29 }
  0xf2   :  { %v313_v16 = vpop.f32.mrb[13].mxu0  ;;  %v2933_v19 = vadd.f32 %v2179_v14, %v2866_v29  ;;  %v2962_v46 = vadd.f32 %v508_v30, %v2866_v29 }
  0xf3   :  { %v2180_v18 = vpop.f32.mrb[14].mxu0  ;;  %v2939_v22 = vadd.f32 %v313_v16, %v2866_v29 }
  0xf4   :  { %v2936_v20 = vadd.f32 %v2180_v18, %v2866_v29  ;;  %v316_v21 = vpop.f32.mrb[15].mxu0 }
  0xf5   :  { %v2942_v23 = vadd.f32 %v316_v21, %v2866_v29 }
  0xf6   :  { %v953_v25 = vpack.c.bf16 %v2936_v20, %v2933_v19  ;;  %v2984_v34 = vpop.f32.mrb[8].mxu1 }
  0xf7   :  { %v952_v27 = vpack.c.bf16 %v2942_v23, %v2939_v22 }
  0xf9   :  { %v2183_v28 = vpop.f32.mrb[16].mxu0 }
  0xfa   :  { %v329_v31 = vpop.f32.mrb[17].mxu0  ;;  %v338_v37 = vadd.f32 %v2183_v28, %v2866_v29 }
  0xfb   :  { %v2184_v32 = vpop.f32.mrb[18].mxu0  ;;  %v330_v43 = vadd.f32 %v329_v31, %v2866_v29 }
  0xfc   :  { %v341_v38 = vadd.f32 %v2184_v32, %v2866_v29  ;;  %v332_v40 = vpop.f32.mrb[19].mxu0 }
  0xfd   :  { %v333_v44 = vadd.f32 %v332_v40, %v2866_v29  ;;  %v564_v40 = vpop.f32.mrb[9].mxu1 }
  0xfe   :  { %v955_v47 = vpack.c.bf16 %v341_v38, %v338_v37 }
  0xff   :  { %v954_v50 = vpack.c.bf16 %v333_v44, %v330_v43  ;;  %v2990_v43 = vpop.f32.mrb[10].mxu1 }
 0x101   :  { %2333 = vmatprep.subr.msk.bf16.mxu1 %vm134_vm0, %v954_v50  ;;  %v2187_v60 = vpop.f32.mrb[20].mxu0 }
 0x102   :  { %2027 = vmatpush3.bf16.xpose.msra.mxu1 %v975_v55  ;;  %v345_v61 = vpop.f32.mrb[21].mxu0  ;;  %v354_v1 = vadd.f32 %v2187_v60, %v2866_v29 }
 0x103   :  { %2334 = vmatprep.subr.msk.bf16.mxu1 %vm134_vm0, %v955_v47  ;;  %v2188_v62 = vpop.f32.mrb[22].mxu0  ;;  %v346_v9 = vadd.f32 %v345_v61, %v2866_v29  ;;  %v567_v47 = vpop.f32.mrb[11].mxu1 }
 0x104   :  { %v357_v2 = vadd.f32 %v2188_v62, %v2866_v29  ;;  %v348_v6 = vpop.f32.mrb[23].mxu0  ;;  %v2999_v56 = vpop.f32.mrb[12].mxu1 }
 0x105   :  { %v349_v12 = vadd.f32 %v348_v6, %v2866_v29  ;;  %v3007_v61 = vpop.f32.mrb[13].mxu1 }
 0x106   :  { %v957_v14 = vpack.c.bf16 %v357_v2, %v354_v1  ;;  %v3011_v1 = vpop.f32.mrb[14].mxu1 }
 0x107   :  { %v956_v16 = vpack.c.bf16 %v349_v12, %v346_v9  ;;  %v3015_v6 = vpop.f32.mrb[15].mxu1  ;;  %v984_v12 = vsel %vm134_vm0, %v949_v58, 0 }
 0x108   :  { %v3017_v9 = vpop.f32.mrb[16].mxu1 }
 0x109   :  { %v2191_v18 = vpop.f32.mrb[24].mxu0 }
 0x10a   :  { %2029 = vmatpush3.bf16.xpose.msra.mxu1 %v978_v49  ;;  %v361_v21 = vpop.f32.mrb[25].mxu0  ;;  %v370_v26 = vadd.f32 %v2191_v18, %v2866_v29 }
 0x10b   :  { %2335 = vmatprep.subr.msk.bf16.mxu1 %vm134_vm0, %v956_v16  ;;  %v2192_v24 = vpop.f32.mrb[26].mxu0  ;;  %v362_v32 = vadd.f32 %v361_v21, %v2866_v29  ;;  %v3023_v16 = vpop.f32.mrb[17].mxu1 }
 0x10c   :  { %v373_v28 = vadd.f32 %v2192_v24, %v2866_v29  ;;  %v364_v31 = vpop.f32.mrb[27].mxu0  ;;  %v3025_v18 = vpop.f32.mrb[18].mxu1 }
 0x10d   :  { %v365_v36 = vadd.f32 %v364_v31, %v2866_v29  ;;  %v3028_v24 = vpop.f32.mrb[19].mxu1 }
 0x10e   :  { %v959_v37 = vpack.c.bf16 %v373_v28, %v370_v26  ;;  %v3036_v54 = vpop.f32.mrb[20].mxu1 }
 0x10f   :  { %v958_v38 = vpack.c.bf16 %v365_v36, %v362_v32  ;;  %v3044_v32 = vpop.f32.mrb[21].mxu1 }
 0x111   :  { %v2195_v48 = vpop.f32.mrb[28].mxu0 }
 0x112   :  { %2031 = vmatpush3.bf16.xpose.msra.mxu1 %v981_v41  ;;  %v377_v30 = vpop.f32.mrb[29].mxu0  ;;  %v2994_v50 = vadd.f32 %v2195_v48, %v2866_v29 }
 0x113   :  { %2336 = vmatprep.subr.msk.bf16.mxu1 %vm134_vm0, %v957_v14  ;;  %v2196_v44 = vpop.f32.mrb[30].mxu0  ;;  %v3002_v57 = vadd.f32 %v377_v30, %v2866_v29  ;;  %v522_v30 = vsub.s32 2, %v2857_v39 }
 0x114   :  { %v2997_v55 = vadd.f32 %v2196_v44, %v2866_v29  ;;  %v380_v60 = vpop.f32.mrb[31].mxu0 }
 0x115   :  { %v3005_v59 = vadd.f32 %v380_v60, %v2866_v29  ;;  %v987_v60 = vsel %vm134_vm0, %v950_v10, 0 }
 0x116   :  { %v961_v62 = vpack.c.bf16 %v2997_v55, %v2994_v50 }
 0x117   :  { %v960_v2 = vpack.c.bf16 %v3005_v59, %v3002_v57 }
 0x119   :  { %v2199_v14 = vpop.f32.mrb[32].mxu0 }
 0x11a   :  { %2033 = vmatpush3.bf16.xpose.msra.mxu1 %v984_v12  ;;  %v393_v49 = vpop.f32.mrb[33].mxu0  ;;  %v3031_v26 = vadd.f32 %v2199_v14, %v2866_v29  ;;  %v3060_v14 = vrot.slane %v2863_v42, %v522_v30 }
 0x11b   :  { %2337 = vmatprep.subr.msk.bf16.mxu1 %vm134_vm0, %v958_v38  ;;  %v2200_v21 = vpop.f32.mrb[34].mxu0  ;;  %v3039_v58 = vadd.f32 %v393_v49, %v2866_v29  ;;  %v3048_v38 = vpop.f32.mrb[22].mxu1 }
 0x11c   :  { %v3034_v28 = vadd.f32 %v2200_v21, %v2866_v29  ;;  %v396_v53 = vpop.f32.mrb[35].mxu0  ;;  %v3052_v48 = vpop.f32.mrb[23].mxu1  ;;  %v568_v15 = vadd.f32 %v567_v47, %v3060_v14 }
 0x11d   :  { %v3042_v31 = vadd.f32 %v396_v53, %v2866_v29  ;;  %v2249_v44 = vpop.f32.mrb[24].mxu1 }
 0x11e   :  { %v628_v59 = vpop.f32.mrb[25].mxu1 }
 0x11f   :  { %v1308_v41 = vpack.c.bf16 %v3042_v31, %v3039_v58  ;;  %v2250_v49 = vpop.f32.mrb[26].mxu1  ;;  %v629_v4 = vadd.f32 %v628_v59, %v3060_v14 }
 0x120   :  { %v631_v53 = vpop.f32.mrb[27].mxu1 }
 0x121   :  { %v2203_v57 = vpop.f32.mrb[36].mxu0  ;;  %v632_v10 = vadd.f32 %v631_v53, %v3060_v14  ;;  %v637_v53 = vadd.f32 %v2249_v44, %v3060_v14  ;;  %v2253_v36 = vpop.f32.mrb[28].mxu1 }
 0x122   :  { %2035 = vmatpush3.bf16.xpose.msra.mxu1 %v987_v60  ;;  %v409_v12 = vpop.f32.mrb[37].mxu0  ;;  %v3064_v51 = vadd.f32 %v2203_v57, %v2866_v29 }
 0x123   :  { %2338 = vmatprep.subr.msk.bf16.mxu1 %vm134_vm0, %v959_v37  ;;  %v2204_v21 = vpop.f32.mrb[38].mxu0  ;;  %v3072_v60 = vadd.f32 %v409_v12, %v2866_v29  ;;  %v565_v37 = vadd.f32 %v564_v40, %v3060_v14  ;;  %v640_v12 = vadd.f32 %v2250_v49, %v3060_v14  ;;  %v990_v40 = vsel %vm134_vm0, %v951_v7, 0 }
 0x124   :  { %v3067_v52 = vadd.f32 %v2204_v21, %v2866_v29  ;;  %v412_v3 = vpop.f32.mrb[39].mxu0  ;;  %v1231_v21 = vpack.c.bf16 %v632_v10, %v629_v4  ;;  %v576_v4 = vadd.f32 %v2990_v43, %v3060_v14  ;;  %v644_v10 = vpop.f32.mrb[29].mxu1 }
 0x125   :  { %v3075_v30 = vadd.f32 %v412_v3, %v2866_v29  ;;  %v1223_v59 = vpack.c.bf16 %v568_v15, %v565_v37  ;;  %v573_v3 = vadd.f32 %v2984_v34, %v3060_v14  ;;  %v1232_v44 = vpack.c.bf16 %v640_v12, %v637_v53  ;;  %v2254_v49 = vpop.f32.mrb[30].mxu1 }
 0x126   :  { %2050 = vmatprep.subr.bf16.mxu0 %v1231_v21  ;;  %v647_v34 = vpop.f32.mrb[31].mxu1  ;;  %v3111_v53 = vadd.f32 %v3011_v1, %v3060_v14 }
 0x127   :  { %v1310_v17 = vpack.c.bf16 %v3075_v30, %v3072_v60  ;;  %2051 = vmatpush3.bf16.msra.mxu0 %v1223_v59  ;;  %v1224_v7 = vpack.c.bf16 %v576_v4, %v573_v3  ;;  %v3105_v59 = vadd.f32 %v2999_v56, %v3060_v14  ;;  %v2257_v12 = vpop.f32.mrb[32].mxu1  ;;  %v3120_v3 = vadd.f32 %v3017_v9, %v3060_v14 }
 0x128   :  { %2052 = vmatprep.subr.bf16.mxu0 %v1232_v44  ;;  %v3124_v56 = vadd.f32 %v3023_v16, %v3060_v14  ;;  %v648_v22 = vadd.f32 %v647_v34, %v3060_v14 }
 0x129   :  { %v2207_v47 = vpop.f32.mrb[40].mxu0  ;;  %v1226_v4 = vpack.c.bf16 %v3111_v53, %v3105_v59  ;;  %v3154_v59 = vadd.f32 %v3048_v38, %v3060_v14  ;;  %v653_v53 = vadd.f32 %v2253_v36, %v3060_v14 }
 0x12a   :  { %2037 = vmatpush3.bf16.xpose.msra.mxu1 %v990_v40  ;;  %v425_v15 = vpop.f32.mrb[41].mxu0  ;;  %v3095_v37 = vadd.f32 %v2207_v47, %v2866_v29  ;;  %v584_v47 = vadd.f32 %v3015_v6, %v3060_v14  ;;  %v3136_v6 = vadd.f32 %v3028_v24, %v3060_v14 }
 0x12b   :  { %2339 = vmatprep.subr.msk.bf16.mxu1 %vm134_vm0, %v960_v2  ;;  %v3098_v63 = vadd.f32 %v425_v15, %v2866_v29  ;;  %v2208_v0 = vpop.f32.mrb[42].mxu0  ;;  %v581_v2 = vadd.f32 %v3007_v61, %v3060_v14  ;;  %2053 = vmatpush3.bf16.msra.mxu0 %v1224_v7  ;;  %v660_v61 = vpop.f32.mrb[33].mxu1  ;;  %v3132_v15 = vadd.f32 %v3025_v18, %v3060_v14 }
 0x12c   :  { %v3101_v21 = vadd.f32 %v2208_v0, %v2866_v29  ;;  %v428_v43 = vpop.f32.mrb[43].mxu0  ;;  %v2258_v9 = vpop.f32.mrb[34].mxu1  ;;  %v3142_v0 = vadd.f32 %v3036_v54, %v3060_v14  ;;  %v3146_v7 = vadd.f32 %v3044_v32, %v3060_v14  ;;  %v1227_v24 = vpack.c.bf16 %v3136_v6, %v3124_v56 }
 0x12d   :  { %v3114_v40 = vadd.f32 %v428_v43, %v2866_v29  ;;  %v1225_v44 = vpack.c.bf16 %v584_v47, %v581_v2  ;;  %v663_v43 = vpop.f32.mrb[35].mxu1  ;;  %v1228_v18 = vpack.c.bf16 %v3132_v15, %v3120_v3  ;;  %v993_v54 = vsel %vm134_vm0, %v952_v27, 0 }
 0x12e   :  { %v3162_v32 = vadd.f32 %v3052_v48, %v3060_v14  ;;  %v645_v47 = vadd.f32 %v644_v10, %v3060_v14  ;;  %v1230_v38 = vpack.c.bf16 %v3154_v59, %v3142_v0  ;;  %v656_v6 = vadd.f32 %v2254_v49, %v3060_v14  ;;  %v2261_v55 = vpop.f32.mrb[36].mxu1 }
 0x12f   :  { %v669_v48 = vadd.f32 %v2257_v12, %v3060_v14  ;;  %v661_v10 = vadd.f32 %v660_v61, %v3060_v14  ;;  %v672_v50 = vadd.f32 %v2258_v9, %v3060_v14  ;;  %v664_v16 = vadd.f32 %v663_v43, %v3060_v14  ;;  %v676_v61 = vpop.f32.mrb[37].mxu1 }
 0x130   :  { %v1229_v36 = vpack.c.bf16 %v3162_v32, %v3146_v7  ;;  %v1233_v1 = vpack.c.bf16 %v648_v22, %v645_v47  ;;  %v3193_v12 = vadd.f32 %v2261_v55, %v3060_v14  ;;  %v677_v9 = vadd.f32 %v676_v61, %v3060_v14  ;;  %v2262_v47 = vpop.f32.mrb[38].mxu1 }
 0x131   :  { %v2211_v2 = vpop.f32.mrb[44].mxu0  ;;  %v688_v22 = vadd.f32 %v2262_v47, %v3060_v14  ;;  %v679_v43 = vpop.f32.mrb[39].mxu1 }
 0x132   :  { %2039 = vmatpush3.bf16.xpose.msra.mxu1 %v993_v54  ;;  %v441_v56 = vpop.f32.mrb[45].mxu0  ;;  %v3175_v23 = vadd.f32 %v2211_v2, %v2866_v29  ;;  %v1234_v54 = vpack.c.bf16 %v656_v6, %v653_v53  ;;  %2054 = vmatprep.subr.bf16.mxu0 %v1233_v1  ;;  %v1236_v53 = vpack.c.bf16 %v672_v50, %v669_v48  ;;  %v996_v1 = vsel %vm134_vm0, %v953_v25, 0 }
 0x133   :  { %2340 = vmatprep.subr.msk.bf16.mxu1 %vm134_vm0, %v961_v62  ;;  %v2212_v27 = vpop.f32.mrb[46].mxu0  ;;  %v3186_v62 = vadd.f32 %v441_v56, %v2866_v29  ;;  %2055 = vmatpush3.bf16.msra.mxu0 %v1225_v44  ;;  %v1235_v6 = vpack.c.bf16 %v664_v16, %v661_v10  ;;  %v1238_v50 = vpack.c.bf16 %v688_v22, %v3193_v12 }
 0x134   :  { %v3182_v49 = vadd.f32 %v2212_v27, %v2866_v29  ;;  %v444_v34 = vpop.f32.mrb[47].mxu0  ;;  %2056 = vmatprep.subr.bf16.mxu0 %v1234_v54 }
 0x135   :  { %v3189_v2 = vadd.f32 %v444_v34, %v2866_v29  ;;  %v680_v34 = vadd.f32 %v679_v43, %v3060_v14 }
 0x136   :  { %v2265_v54 = vpop.f32.mrb[40].mxu1 }
 0x137   :  { %v1237_v61 = vpack.c.bf16 %v680_v34, %v677_v9  ;;  %2057 = vmatpush3.bf16.msra.mxu0 %v1226_v4  ;;  %v3216_v25 = vadd.f32 %v2265_v54, %v3060_v14  ;;  %v692_v12 = vpop.f32.mrb[41].mxu1 }
 0x138   :  { %2058 = vmatprep.subr.bf16.mxu0 %v1235_v6  ;;  %v3221_v9 = vadd.f32 %v692_v12, %v3060_v14  ;;  %v2266_v47 = vpop.f32.mrb[42].mxu1 }
 0x139   :  { %v2215_v48 = vpop.f32.mrb[48].mxu0  ;;  %v3224_v6 = vadd.f32 %v2266_v47, %v3060_v14  ;;  %v695_v22 = vpop.f32.mrb[43].mxu1 }
 0x13a   :  { %2041 = vmatpush3.bf16.xpose.msra.mxu1 %v996_v1  ;;  %v457_v55 = vpop.f32.mrb[49].mxu0  ;;  %v3208_v16 = vadd.f32 %v2215_v48, %v2866_v29  ;;  %v3227_v43 = vadd.f32 %v695_v22, %v3060_v14 }
 0x13b   :  { %v2216_v27 = vpop.f32.mrb[50].mxu0  ;;  %v458_v19 = vadd.f32 %v457_v55, %v2866_v29  ;;  %2059 = vmatpush3.bf16.msra.mxu0 %v1227_v24  ;;  %v821_v55 = vsub.s32 0, %v2857_v39 }
 0x13c   :  { %v3211_v44 = vadd.f32 %v2216_v27, %v2866_v29  ;;  %v460_v10 = vpop.f32.mrb[51].mxu0  ;;  %2060 = vmatprep.subr.bf16.mxu0 %v1236_v53 }
 0x13d   :  { %v461_v20 = vadd.f32 %v460_v10, %v2866_v29 }
 0x13e   :  { %v1317_v4 = vpack.c.bf16 %v3211_v44, %v3208_v16 }
 0x13f   :  { %v1316_v27 = vpack.c.bf16 %v461_v20, %v458_v19  ;;  %2061 = vmatpush3.bf16.msra.mxu0 %v1228_v18  ;;  %v2269_v20 = vpop.f32.mrb[44].mxu1  ;;  %v3256_v18 = vrot.slane %v2863_v42, %v821_v55 }
 0x140   :  { %2062 = vmatprep.subr.bf16.mxu0 %v1237_v61  ;;  %v708_v3 = vpop.f32.mrb[45].mxu1 }
 0x141   :  { %v2219_v34 = vpop.f32.mrb[52].mxu0  ;;  %2341 = vmatprep.subr.msk.bf16.mxu1 %vm134_vm0, %v1316_v27  ;;  %v3251_v27 = vadd.f32 %v2269_v20, %v3060_v14  ;;  %v3259_v22 = vadd.f32 %v708_v3, %v3060_v14  ;;  %v2270_v61 = vpop.f32.mrb[46].mxu1 }
 0x142   :  { %v473_v48 = vpop.f32.mrb[53].mxu0  ;;  %v3239_v53 = vadd.f32 %v2219_v34, %v2866_v29 }
 0x143   :  { %v2220_v10 = vpop.f32.mrb[54].mxu0  ;;  %v3245_v12 = vadd.f32 %v473_v48, %v2866_v29  ;;  %2063 = vmatpush3.bf16.msra.mxu0 %v1229_v36  ;;  %v711_v48 = vpop.f32.mrb[47].mxu1 }
 0x144   :  { %v3242_v54 = vadd.f32 %v2220_v10, %v2866_v29  ;;  %v476_v19 = vpop.f32.mrb[55].mxu0  ;;  %2064 = vmatprep.subr.bf16.mxu0 %v1238_v50  ;;  %v3270_v10 = vadd.f32 %v711_v48, %v3060_v14 }
 0x145   :  { %v3248_v47 = vadd.f32 %v476_v19, %v2866_v29  ;;  %v3267_v29 = vadd.f32 %v2270_v61, %v3060_v14 }
 0x146   :  { %v1319_v15 = vpack.c.bf16 %v3242_v54, %v3239_v53  ;;  %v2273_v61 = vpop.f32.mrb[48].mxu1 }
 0x147   :  { %v1318_v34 = vpack.c.bf16 %v3248_v47, %v3245_v12  ;;  %2065 = vmatpush3.bf16.msra.mxu0 %v1230_v38  ;;  %v3284_v55 = vadd.f32 %v2273_v61, %v3060_v14 }
 0x149   :  { %v2299_v42 = vpop.f32.mrb[56].mxu0  ;;  %3900 = vst [vmem:[#allocation6_spill] sm:$0xff] %v3284_v55 }
 0x14a   :  { %v872_v19 = vadd.f32 %v2299_v42, %v3256_v18  ;;  %v863_v20 = vpop.f32.mrb[57].mxu0  ;;  %v724_v42 = vpop.f32.mrb[49].mxu1 }
 0x14b   :  { %v864_v7 = vadd.f32 %v863_v20, %v3256_v18  ;;  %v2300_v32 = vpop.f32.mrb[58].mxu0  ;;  %v3287_v3 = vadd.f32 %v724_v42, %v3060_v14  ;;  %v2274_v20 = vpop.f32.mrb[50].mxu1 }
 0x14c   :  { %v875_v36 = vadd.f32 %v2300_v32, %v3256_v18  ;;  %v866_v50 = vpop.f32.mrb[59].mxu0  ;;  %v928_v1 = vmul.f32 0.25, %v872_v19  ;;  %v3290_v0 = vadd.f32 %v2274_v20, %v3060_v14  ;;  %v727_v59 = vpop.f32.mrb[51].mxu1 }
 0x14d   :  { %v867_v48 = vadd.f32 %v866_v50, %v3256_v18  ;;  %v926_v56 = vmul.f32 0.25, %v864_v7  ;;  %v3293_v32 = vadd.f32 %v727_v59, %v3060_v14 }
 0x14e   :  { %v929_v24 = vmul.f32 0.25, %v875_v36  ;;  %3901 = vst [vmem:[#allocation7_spill] sm:$0xff] %v3290_v0  ;;  %v2277_v59 = vpop.f32.mrb[52].mxu1 }
 0x14f   :  { %v927_v57 = vmul.f32 0.25, %v867_v48 }
 0x150   :  { %v943_v38 = vpack.c.bf16 %v929_v24, %v928_v1 }
 0x151   :  { %v942_v50 = vpack.c.bf16 %v927_v57, %v926_v56  ;;  %v2303_v61 = vpop.f32.mrb[60].mxu0  ;;  %v1337_v57 = vsel %vm134_vm0, %v1308_v41, 0 }
 0x152   :  { %v888_v36 = vadd.f32 %v2303_v61, %v3256_v18  ;;  %v879_v42 = vpop.f32.mrb[61].mxu0 }
 0x153   :  { %2042 = vmatprep.mubr.msk.bf16.mxu1 %vm134_vm0, %v942_v50  ;;  %v880_v48 = vadd.f32 %v879_v42, %v3256_v18  ;;  %v2304_v20 = vpop.f32.mrb[62].mxu0  ;;  %v3311_v42 = vadd.f32 %v2277_v59, %v3060_v14 }
 0x154   :  { %2043 = vmatmul.mubr.msk.bf16.vlgmr.msra.gmra.mrb[72].mxu1 %vm134_vm0, %v942_v50  ;;  %v932_v56 = vmul.f32 0.25, %v888_v36  ;;  %v891_v1 = vadd.f32 %v2304_v20, %v3256_v18  ;;  %v882_v24 = vpop.f32.mrb[63].mxu0  ;;  %v740_v50 = vpop.f32.mrb[53].mxu1 }
 0x155   :  { %2091 = vmatpush3.bf16.xpose.msra.mxu1 %v1337_v57  ;;  %v930_v61 = vmul.f32 0.25, %v880_v48  ;;  %2044 = vmatprep.mubr.msk.bf16.mxu1 %vm134_vm0, %v943_v38  ;;  %v883_v19 = vadd.f32 %v882_v24, %v3256_v18  ;;  %3902 = vst [vmem:[#allocation8_spill] sm:$0xff] %v3311_v42  ;;  %v3318_v58 = vadd.f32 %v740_v50, %v3060_v14  ;;  %v2278_v31 = vpop.f32.mrb[54].mxu1 }
 0x156   :  { %v933_v7 = vmul.f32 0.25, %v891_v1  ;;  %2342 = vmatprep.subr.msk.bf16.mxu1 %vm134_vm0, %v1317_v4  ;;  %v3321_v36 = vadd.f32 %v2278_v31, %v3060_v14  ;;  %v743_v48 = vpop.f32.mrb[55].mxu1 }
 0x157   :  { %3903 = vst [vmem:[#allocation9_spill] sm:$0xff] %v3318_v58  ;;  %v931_v41 = vmul.f32 0.25, %v883_v19  ;;  %v3326_v57 = vadd.f32 %v743_v48, %v3060_v14  ;;  %v2281_v48 = vpop.f32.mrb[56].mxu1 }
 0x158   :  { %3904 = vst [vmem:[#allocation10_spill] sm:$0xff] %v3321_v36  ;;  %v3323_v20 = vpack.c.bf16 %v933_v7, %v932_v56  ;;  %v3906_v7 = vpack.c.bf16 %v3034_v28, %v3031_v26 }
 0x159   :  { %3905 = vst [vmem:[#allocation11_spill] sm:$0xff] %v3326_v57  ;;  %v944_v1 = vpack.c.bf16 %v931_v41, %v930_v61  ;;  %v2307_v24 = vpop.f32.mrb[64].mxu0 }
 0x15a   :  { %v904_v44 = vadd.f32 %v2307_v24, %v3256_v18  ;;  %v895_v4 = vpop.f32.mrb[65].mxu0  ;;  %v1340_v56 = vsel %vm134_vm0, %v3906_v7, 0 }
 0x15b   :  { %v896_v59 = vadd.f32 %v895_v4, %v3256_v18  ;;  %v2308_v50 = vpop.f32.mrb[66].mxu0  ;;  %v3343_v4 = vadd.f32 %v2281_v48, %v3060_v14 }
 0x15c   :  { %2045 = vmatmul.mubr.msk.bf16.gmra.mrb[76].mxu1 %vm134_vm0, %v943_v38  ;;  %v936_v61 = vmul.f32 0.25, %v904_v44  ;;  %v907_v31 = vadd.f32 %v2308_v50, %v3256_v18  ;;  %v898_v41 = vpop.f32.mrb[67].mxu0  ;;  %v756_v38 = vpop.f32.mrb[57].mxu1 }
 0x15d   :  { %2093 = vmatpush3.bf16.xpose.msra.mxu1 %v1340_v56  ;;  %2046 = vmatprep.mubr.msk.bf16.mxu1 %vm134_vm0, %v944_v1  ;;  %v934_v24 = vmul.f32 0.25, %v896_v59  ;;  %v899_v16 = vadd.f32 %v898_v41, %v3256_v18  ;;  %v757_v28 = vadd.f32 %v756_v38, %v3060_v14  ;;  %v2282_v44 = vpop.f32.mrb[58].mxu1 }
 0x15e   :  { %2343 = vmatprep.subr.msk.bf16.mxu1 %vm134_vm0, %v1318_v34  ;;  %v937_v26 = vmul.f32 0.25, %v907_v31  ;;  %v3351_v7 = vadd.f32 %v2282_v44, %v3060_v14  ;;  %v759_v59 = vpop.f32.mrb[59].mxu1 }
 0x15f   :  { %v935_v50 = vmul.f32 0.25, %v899_v16  ;;  %v760_v41 = vadd.f32 %v759_v59, %v3060_v14 }
 0x160   :  { %v3353_v56 = vpack.c.bf16 %v937_v26, %v936_v61  ;;  %v1343_v61 = vsel %vm134_vm0, %v1310_v17, 0 }
 0x161   :  { %v3356_v48 = vpack.c.bf16 %v935_v50, %v934_v24  ;;  %v2311_v19 = vpop.f32.mrb[68].mxu0  ;;  %v1593_v31 = vpack.c.bf16 %v760_v41, %v757_v28  ;;  %v2285_v50 = vpop.f32.mrb[60].mxu1 }
 0x162   :  { %v920_v47 = vadd.f32 %v2311_v19, %v3256_v18  ;;  %v911_v34 = vpop.f32.mrb[69].mxu0  ;;  %v772_v59 = vpop.f32.mrb[61].mxu1 }
 0x163   :  { %v912_v16 = vadd.f32 %v911_v34, %v3256_v18  ;;  %v2312_v38 = vpop.f32.mrb[70].mxu0  ;;  %2114 = vmatprep.subr.bf16.mxu0 %v1593_v31  ;;  %v3379_v60 = vadd.f32 %v772_v59, %v3060_v14  ;;  %v2286_v30 = vpop.f32.mrb[62].mxu1 }
 0x164   :  { %2047 = vmatmul.mubr.msk.bf16.gmra.mrb[80].mxu1 %vm134_vm0, %v944_v1  ;;  %v940_v24 = vmul.f32 0.25, %v920_v47  ;;  %v923_v26 = vadd.f32 %v2312_v38, %v3256_v18  ;;  %v914_v44 = vpop.f32.mrb[71].mxu0  ;;  %v3372_v1 = vadd.f32 %v2285_v50, %v3060_v14  ;;  %v3382_v47 = vadd.f32 %v2286_v30, %v3060_v14  ;;  %v775_v34 = vpop.f32.mrb[63].mxu1 }
 0x165   :  { %2095 = vmatpush3.bf16.xpose.msra.mxu1 %v1343_v61  ;;  %2048 = vmatprep.mubr.msk.bf16.mxu1 %vm134_vm0, %v3323_v20  ;;  %v938_v19 = vmul.f32 0.25, %v912_v16  ;;  %v915_v28 = vadd.f32 %v914_v44, %v3256_v18  ;;  %v3385_v31 = vadd.f32 %v775_v34, %v3060_v14  ;;  %v3909_v44 = vpack.c.bf16 %v2926_v13, %v2918_v8 }
 0x166   :  { %2344 = vmatprep.subr.msk.bf16.mxu1 %vm134_vm0, %v1319_v15  ;;  %v941_v17 = vmul.f32 0.25, %v923_v26  ;;  %v3907_v15 = vpack.c.bf16 %v3067_v52, %v3064_v51  ;;  %v2289_v61 = vpop.f32.mrb[64].mxu1  ;;  %v3910_v8 = vpack.c.bf16 %v3114_v40, %v3098_v63  ;;  %v3912_v34 = vpack.c.bf16 %v2923_v11, %v2913_v5 }
 0x167   :  { %v939_v41 = vmul.f32 0.25, %v915_v28  ;;  %v788_v26 = vpop.f32.mrb[65].mxu1  ;;  %v3916_v5 = vpack.c.bf16 %v3101_v21, %v3095_v37  ;;  %v3920_v37 = vpack.c.bf16 %v3182_v49, %v3175_v23 }
 0x168   :  { %v1307_v18 = vpack.c.bf16 %v941_v17, %v940_v24  ;;  %v1346_v38 = vsel %vm134_vm0, %v3907_v15, 0  ;;  %v3400_v24 = vadd.f32 %v2289_v61, %v3060_v14  ;;  %v2290_v51 = vpop.f32.mrb[66].mxu1  ;;  %v1349_v13 = vsel %vm134_vm0, %v3910_v8, 0 }
 0x169   :  { %v1306_v16 = vpack.c.bf16 %v939_v41, %v938_v19  ;;  %v3410_v52 = vadd.f32 %v2290_v51, %v3060_v14  ;;  %v791_v50 = vpop.f32.mrb[67].mxu1  ;;  %v1352_v11 = vsel %vm134_vm0, %v3916_v5, 0  ;;  %v3917_v51 = vpack.c.bf16 %v2962_v46, %v2952_v35 }
 0x16a   :  { %3908 = vst [vmem:[#allocation12_spill] sm:$0xff] %v3400_v24  ;;  %v3413_v19 = vadd.f32 %v791_v50, %v3060_v14  ;;  %v3919_v8 = vpack.c.bf16 %v2959_v45, %v2949_v33  ;;  %v1358_v21 = vsel %vm134_vm0, %v3920_v37, 0 }
 0x16c   :  { %2049 = vmatmul.mubr.msk.bf16.gmra.mrb[84].mxu1 %vm134_vm0, %v3323_v20  ;;  %v3407_v20 = vadd.f32 %v788_v26, %v3060_v14 }
 0x16d   :  { %2097 = vmatpush3.bf16.xpose.msra.mxu1 %v1346_v38  ;;  %2106 = vmatprep.mubr.msk.bf16.mxu1 %vm134_vm0, %v3356_v48 }
 0x16e   :  { %2345 = vmatprep.subr.msk.bf16.mxu1 %vm134_vm0, %v3909_v44  ;;  %v2293_v17 = vpop.f32.mrb[68].mxu1 }
 0x16f   :  { %v3424_v30 = vadd.f32 %v2293_v17, %v3060_v14  ;;  %v804_v41 = vpop.f32.mrb[69].mxu1 }
 0x170   :  { %v3431_v15 = vadd.f32 %v804_v41, %v3060_v14  ;;  %v2294_v38 = vpop.f32.mrb[70].mxu1 }
 0x171   :  { %3911 = vst [vmem:[#allocation13_spill] sm:$0xff] %v3424_v30  ;;  %v3434_v61 = vadd.f32 %v2294_v38, %v3060_v14  ;;  %v807_v63 = vpop.f32.mrb[71].mxu1 }
 0x172   :  { %3913 = vst [vmem:[#allocation14_spill] sm:$0xff] %v3431_v15  ;;  %v3437_v40 = vadd.f32 %v807_v63, %v3060_v14  ;;  %v3918_v14 = vpack.c.bf16 %v3189_v2, %v3186_v62 }
 0x173   :  { %3914 = vst [vmem:[#allocation15_spill] sm:$0xff] %v3434_v61 }
 0x174   :  { %3915 = vst [vmem:[#allocation16_spill] sm:$0xff] %v3437_v40  ;;  %v1355_v50 = vsel %vm134_vm0, %v3918_v14, 0 }
 0x175   :  { %2099 = vmatpush3.bf16.xpose.msra.mxu1 %v1349_v13 }
 0x176   :  { %2346 = vmatprep.subr.msk.bf16.mxu1 %vm134_vm0, %v3912_v34 }
 0x17d   :  { %2101 = vmatpush3.bf16.xpose.msra.mxu1 %v1352_v11 }
 0x17e   :  { %2347 = vmatprep.subr.msk.bf16.mxu1 %vm134_vm0, %v3917_v51 }
 0x185   :  { %2103 = vmatpush3.bf16.xpose.msra.mxu1 %v1355_v50 }
 0x186   :  { %2348 = vmatprep.subr.msk.bf16.mxu1 %vm134_vm0, %v3919_v8 }
 0x18d   :  { %2105 = vmatpush3.bf16.xpose.msra.mxu1 %v1358_v21 }
 0x194   :  { %2107 = vmatmul.mubr.msk.bf16.vlgmr.msra.gmra.mrb[88].mxu1 %vm134_vm0, %v3356_v48 }
 0x195   :  { %2108 = vmatprep.mubr.msk.bf16.mxu1 %vm134_vm0, %v3353_v56 }
 0x19c   :  { %2109 = vmatmul.mubr.msk.bf16.gmra.mrb[92].mxu1 %vm134_vm0, %v3353_v56 }
 0x19d   :  { %2110 = vmatprep.mubr.msk.bf16.mxu1 %vm134_vm0, %v1306_v16 }
 0x1a4   :  { %2111 = vmatmul.mubr.msk.bf16.gmra.mrb[96].mxu1 %vm134_vm0, %v1306_v16 }
 0x1a5   :  { %2112 = vmatprep.mubr.msk.bf16.mxu1 %vm134_vm0, %v1307_v18 }
 0x1ac   :  { %2113 = vmatmul.mubr.msk.bf16.gmra.mrb[100].mxu1 %vm134_vm0, %v1307_v18 }
 0x227   :  { %v3473_v33 = vpop.f32.mrb[72].mxu1 }
 0x228   :  { %v3475_v35 = vpop.f32.mrb[73].mxu1 }
 0x229   :  { %v1095_v45 = vmax.f32 %v3473_v33, %v3475_v35  ;;  %v3479_v46 = vpop.f32.mrb[74].mxu1 }
 0x22a   :  { %v3481_v23 = vpop.f32.mrb[75].mxu1 }
 0x22b   :  { %1096 = vmax.xlane.f32.xlu0 %v1095_v45  ;;  %v1098_v49 = vmax.f32 %v3479_v46, %v3481_v23 }
 0x22f   :  { %1099 = vmax.xlane.f32.xlu0 %v1098_v49  ;;  %v3485_v62 = vpop.f32.mrb[76].mxu1 }
 0x230   :  { %v3487_v2 = vpop.f32.mrb[77].mxu1 }
 0x231   :  { %v1101_v56 = vmax.f32 %v3485_v62, %v3487_v2  ;;  %v3491_v48 = vpop.f32.mrb[78].mxu1 }
 0x232   :  { %v3493_v18 = vpop.f32.mrb[79].mxu1 }
 0x233   :  { %1102 = vmax.xlane.f32.xlu1 %v1101_v56  ;;  %v1104_v16 = vmax.f32 %v3491_v48, %v3493_v18 }
 0x237   :  { %1105 = vmax.xlane.f32.xlu1 %v1104_v16  ;;  %v3497_v13 = vpop.f32.mrb[80].mxu1 }
 0x238   :  { %v3499_v17 = vpop.f32.mrb[81].mxu1 }
 0x239   :  { %v3501_v41 = vpop.f32.mrb[82].mxu1  ;;  %v1107_v34 = vmax.f32 %v3497_v13, %v3499_v17 }
 0x23a   :  { %v3505_v38 = vpop.f32.mrb[83].mxu1 }
 0x23b   :  { %1108 = vmax.xlane.f32.xlu0 %v1107_v34  ;;  %v1110_v63 = vmax.f32 %v3501_v41, %v3505_v38 }
 0x23d   :  { %1111 = vmax.xlane.f32.xlu1 %v1110_v63 }
 0x23f   :  { %v3509_v5 = vpop.f32.mrb[84].mxu1 }
 0x240   :  { %v3511_v11 = vpop.f32.mrb[85].mxu1 }
 0x241   :  { %v3513_v51 = vpop.f32.mrb[86].mxu1  ;;  %v1113_v14 = vmax.f32 %v3509_v5, %v3511_v11 }
 0x242   :  { %v3517_v50 = vpop.f32.mrb[87].mxu1 }
 0x243   :  { %1114 = vmax.xlane.f32.xlu0 %v1113_v14  ;;  %v1116_v8 = vmax.f32 %v3513_v51, %v3517_v50 }
 0x245   :  { %1117 = vmax.xlane.f32.xlu1 %v1116_v8 }
 0x267   :  { %v3521_v37 = vpop.f32.mrb[88].mxu1 }
 0x268   :  { %v3523_v21 = vpop.f32.mrb[89].mxu1 }
 0x269   :  { %v3525_v45 = vpop.f32.mrb[90].mxu1  ;;  %v1457_v49 = vmax.f32 %v3521_v37, %v3523_v21 }
 0x26a   :  { %v3529_v56 = vpop.f32.mrb[91].mxu1 }
 0x26b   :  { %1458 = vmax.xlane.f32.xlu0 %v1457_v49  ;;  %v1460_v16 = vmax.f32 %v3525_v45, %v3529_v56 }
 0x26d   :  { %1461 = vmax.xlane.f32.xlu1 %v1460_v16 }
 0x26f   :  { %v3533_v34 = vpop.f32.mrb[92].mxu1 }
 0x270   :  { %v3535_v63 = vpop.f32.mrb[93].mxu1 }
 0x271   :  { %v3537_v14 = vpop.f32.mrb[94].mxu1  ;;  %v1463_v8 = vmax.f32 %v3533_v34, %v3535_v63 }
 0x272   :  { %v3541_v26 = vpop.f32.mrb[95].mxu1 }
 0x273   :  { %1464 = vmax.xlane.f32.xlu0 %v1463_v8  ;;  %v1466_v44 = vmax.f32 %v3537_v14, %v3541_v26 }
 0x275   :  { %1467 = vmax.xlane.f32.xlu1 %v1466_v44 }
 0x277   :  { %v3545_v49 = vpop.f32.mrb[96].mxu1 }
 0x278   :  { %v3547_v28 = vpop.f32.mrb[97].mxu1 }
 0x279   :  { %v3549_v16 = vpop.f32.mrb[98].mxu1  ;;  %v1469_v59 = vmax.f32 %v3545_v49, %v3547_v28 }
 0x27a   :  { %v3553_v53 = vpop.f32.mrb[99].mxu1 }
 0x27b   :  { %1470 = vmax.xlane.f32.xlu0 %v1469_v59  ;;  %v1472_v54 = vmax.f32 %v3549_v16, %v3553_v53 }
 0x27d   :  { %1473 = vmax.xlane.f32.xlu1 %v1472_v54 }
 0x27f   :  { %v3557_v8 = vpop.f32.mrb[100].mxu1 }
 0x280   :  { %v3559_v12 = vpop.f32.mrb[101].mxu1 }
 0x281   :  { %v3561_v44 = vpop.f32.mrb[102].mxu1  ;;  %v1475_v39 = vmax.f32 %v3557_v8, %v3559_v12 }
 0x282   :  { %v3565_v42 = vpop.f32.mrb[103].mxu1 }
 0x283   :  { %v1478_v36 = vmax.f32 %v3561_v44, %v3565_v42  ;;  %1476 = vmax.xlane.f32.xlu0 %v1475_v39 }
 0x285   :  { %1479 = vmax.xlane.f32.xlu1 %v1478_v36 }
 0x2b8   :  { %v1097_v59 = vpop.xlane.xlu0 %1096 }
 0x2b9   :  { %v1119_v30 = vsub.f32 %v3473_v33, %v1097_v59  ;;  %v1120_v54 = vsub.f32 %v3475_v35, %v1097_v59 }
 0x2bb   :  { %v1135_v61 = vmul.f32 1.442695, %v1119_v30  ;;  %v1137_v58 = vmul.f32 1.442695, %v1120_v54 }
 0x2bc   :  { %v1100_v57 = vpop.xlane.xlu0 %1099 }
 0x2bd   :  { %2356 = vpow2.f32 %v1135_v61  ;;  %v1121_v15 = vsub.f32 %v3479_v46, %v1100_v57  ;;  %v1122_v40 = vsub.f32 %v3481_v23, %v1100_v57 }
 0x2be   :  { %2358 = vpow2.f32 %v1137_v58 }
 0x2bf   :  { %v1139_v55 = vmul.f32 1.442695, %v1121_v15  ;;  %v1141_v0 = vmul.f32 1.442695, %v1122_v40 }
 0x2c0   :  { %v1103_v24 = vpop.xlane.xlu1 %1102 }
 0x2c1   :  { %2360 = vpow2.f32 %v1139_v55  ;;  %v1123_v39 = vsub.f32 %v3485_v62, %v1103_v24  ;;  %v1124_v36 = vsub.f32 %v3487_v2, %v1103_v24 }
 0x2c2   :  { %2362 = vpow2.f32 %v1141_v0 }
 0x2c3   :  { %v1143_v33 = vmul.f32 1.442695, %v1123_v39  ;;  %v1145_v35 = vmul.f32 1.442695, %v1124_v36 }
 0x2c4   :  { %v1106_v30 = vpop.xlane.xlu1 %1105 }
 0x2c5   :  { %2364 = vpow2.f32 %v1143_v33  ;;  %v1125_v61 = vsub.f32 %v3491_v48, %v1106_v30  ;;  %v1126_v46 = vsub.f32 %v3493_v18, %v1106_v30 }
 0x2c6   :  { %2366 = vpow2.f32 %v1145_v35 }
 0x2c7   :  { %v3577_v57 = vpop.eup %2356  ;;  %v1147_v58 = vmul.f32 1.442695, %v1125_v61  ;;  %v1149_v15 = vmul.f32 1.442695, %v1126_v46 }
 0x2c8   :  { %v3579_v40 = vpop.eup %2358  ;;  %v1109_v55 = vpop.xlane.xlu0 %1108 }
 0x2c9   :  { %2368 = vpow2.f32 %v1147_v58  ;;  %v1127_v24 = vsub.f32 %v3497_v13, %v1109_v55  ;;  %v1128_v0 = vsub.f32 %v3499_v17, %v1109_v55  ;;  %v1167_v23 = vadd.f32 %v3579_v40, %v3577_v57 }
 0x2ca   :  { %2370 = vpow2.f32 %v1149_v15  ;;  %v1112_v62 = vpop.xlane.xlu1 %1111 }
 0x2cb   :  { %v3585_v2 = vpop.eup %2360  ;;  %v1151_v48 = vmul.f32 1.442695, %v1127_v24  ;;  %v1153_v18 = vmul.f32 1.442695, %v1128_v0  ;;  %v1129_v59 = vsub.f32 %v3501_v41, %v1112_v62  ;;  %v1130_v54 = vsub.f32 %v3505_v38, %v1112_v62  ;;  %1168 = vadd.xlane.f32.xlu0 %v1167_v23 }
 0x2cc   :  { %v3589_v39 = vpop.eup %2362 }
 0x2cd   :  { %2372 = vpow2.f32 %v1151_v48  ;;  %v1155_v13 = vmul.f32 1.442695, %v1129_v59  ;;  %v1157_v36 = vmul.f32 1.442695, %v1130_v54  ;;  %v1170_v17 = vadd.f32 %v3589_v39, %v3585_v2 }
 0x2ce   :  { %2374 = vpow2.f32 %v1153_v18 }
 0x2cf   :  { %v3593_v33 = vpop.eup %2364  ;;  %2376 = vpow2.f32 %v1155_v13  ;;  %1171 = vadd.xlane.f32.xlu1 %v1170_v17 }
 0x2d0   :  { %v3595_v35 = vpop.eup %2366  ;;  %2378 = vpow2.f32 %v1157_v36  ;;  %v1115_v41 = vpop.xlane.xlu0 %1114 }
 0x2d1   :  { %v1131_v38 = vsub.f32 %v3509_v5, %v1115_v41  ;;  %v1132_v30 = vsub.f32 %v3511_v11, %v1115_v41  ;;  %v1173_v61 = vadd.f32 %v3595_v35, %v3593_v33 }
 0x2d2   :  { %v1118_v46 = vpop.xlane.xlu1 %1117 }
 0x2d3   :  { %v3601_v58 = vpop.eup %2368  ;;  %v1159_v15 = vmul.f32 1.442695, %v1131_v38  ;;  %v1161_v55 = vmul.f32 1.442695, %v1132_v30  ;;  %1174 = vadd.xlane.f32.xlu0 %v1173_v61  ;;  %v1133_v24 = vsub.f32 %v3513_v51, %v1118_v46  ;;  %v1134_v0 = vsub.f32 %v3517_v50, %v1118_v46 }
 0x2d4   :  { %v3605_v23 = vpop.eup %2370 }
 0x2d5   :  { %2380 = vpow2.f32 %v1159_v15  ;;  %v1163_v62 = vmul.f32 1.442695, %v1133_v24  ;;  %v1165_v5 = vmul.f32 1.442695, %v1134_v0  ;;  %v1176_v11 = vadd.f32 %v3605_v23, %v3601_v58 }
 0x2d6   :  { %2382 = vpow2.f32 %v1161_v55 }
 0x2d7   :  { %v3609_v48 = vpop.eup %2372  ;;  %2384 = vpow2.f32 %v1163_v62  ;;  %1177 = vadd.xlane.f32.xlu1 %v1176_v11 }
 0x2d8   :  { %v3611_v18 = vpop.eup %2374  ;;  %2386 = vpow2.f32 %v1165_v5 }
 0x2d9   :  { %v3613_v59 = vpop.eup %2376  ;;  %v1179_v51 = vadd.f32 %v3611_v18, %v3609_v48 }
 0x2da   :  { %v3617_v50 = vpop.eup %2378 }
 0x2db   :  { %1180 = vadd.xlane.f32.xlu0 %v1179_v51  ;;  %v1182_v54 = vadd.f32 %v3617_v50, %v3613_v59 }
 0x2dd   :  { %1183 = vadd.xlane.f32.xlu1 %v1182_v54 }
 0x2df   :  { %v3621_v13 = vpop.eup %2380 }
 0x2e0   :  { %v3623_v36 = vpop.eup %2382 }
 0x2e1   :  { %v3625_v17 = vpop.eup %2384  ;;  %v1185_v41 = vadd.f32 %v3623_v36, %v3621_v13 }
 0x2e2   :  { %v3629_v38 = vpop.eup %2386 }
 0x2e3   :  { %1186 = vadd.xlane.f32.xlu0 %v1185_v41  ;;  %v1188_v30 = vadd.f32 %v3629_v38, %v3625_v17 }
 0x2e5   :  { %1189 = vadd.xlane.f32.xlu1 %v1188_v30 }
 0x2f8   :  { %v1459_v61 = vpop.xlane.xlu0 %1458 }
 0x2f9   :  { %v1481_v46 = vsub.f32 %v3521_v37, %v1459_v61  ;;  %v1482_v15 = vsub.f32 %v3523_v21, %v1459_v61 }
 0x2fa   :  { %v1462_v55 = vpop.xlane.xlu1 %1461 }
 0x2fb   :  { %v1497_v24 = vmul.f32 1.442695, %v1481_v46  ;;  %v1499_v0 = vmul.f32 1.442695, %v1482_v15  ;;  %v1483_v62 = vsub.f32 %v3525_v45, %v1462_v55  ;;  %v1484_v5 = vsub.f32 %v3529_v56, %v1462_v55 }
 0x2fd   :  { %2388 = vpow2.f32 %v1497_v24  ;;  %v1501_v11 = vmul.f32 1.442695, %v1483_v62  ;;  %v1503_v51 = vmul.f32 1.442695, %v1484_v5 }
 0x2fe   :  { %2390 = vpow2.f32 %v1499_v0 }
 0x2ff   :  { %2392 = vpow2.f32 %v1501_v11 }
 0x300   :  { %2394 = vpow2.f32 %v1503_v51  ;;  %v1465_v54 = vpop.xlane.xlu0 %1464 }
 0x301   :  { %v1485_v41 = vsub.f32 %v3533_v34, %v1465_v54  ;;  %v1486_v37 = vsub.f32 %v3535_v63, %v1465_v54 }
 0x302   :  { %v1468_v30 = vpop.xlane.xlu1 %1467 }
 0x303   :  { %v1505_v21 = vmul.f32 1.442695, %v1485_v41  ;;  %v1507_v61 = vmul.f32 1.442695, %v1486_v37  ;;  %v1487_v46 = vsub.f32 %v3537_v14, %v1468_v30  ;;  %v1488_v45 = vsub.f32 %v3541_v26, %v1468_v30 }
 0x305   :  { %2396 = vpow2.f32 %v1505_v21  ;;  %v1509_v56 = vmul.f32 1.442695, %v1487_v46  ;;  %v1511_v15 = vmul.f32 1.442695, %v1488_v45 }
 0x306   :  { %2398 = vpow2.f32 %v1507_v61 }
 0x307   :  { %v3641_v55 = vpop.eup %2388  ;;  %2400 = vpow2.f32 %v1509_v56 }
 0x308   :  { %v3643_v24 = vpop.eup %2390  ;;  %2402 = vpow2.f32 %v1511_v15  ;;  %v1471_v34 = vpop.xlane.xlu0 %1470 }
 0x309   :  { %v3645_v0 = vpop.eup %2392  ;;  %v1489_v63 = vsub.f32 %v3545_v49, %v1471_v34  ;;  %v1490_v62 = vsub.f32 %v3547_v28, %v1471_v34  ;;  %v1529_v26 = vadd.f32 %v3643_v24, %v3641_v55 }
 0x30a   :  { %v3651_v14 = vpop.eup %2394  ;;  %v1474_v5 = vpop.xlane.xlu1 %1473 }
 0x30b   :  { %v1513_v11 = vmul.f32 1.442695, %v1489_v63  ;;  %v1515_v51 = vmul.f32 1.442695, %v1490_v62  ;;  %1530 = vadd.xlane.f32.xlu0 %v1529_v26  ;;  %v1491_v54 = vsub.f32 %v3549_v16, %v1474_v5  ;;  %v1492_v41 = vsub.f32 %v3553_v53, %v1474_v5 }
 0x30c   :  { %v1532_v37 = vadd.f32 %v3651_v14, %v3645_v0 }
 0x30d   :  { %2404 = vpow2.f32 %v1513_v11  ;;  %v1517_v49 = vmul.f32 1.442695, %v1491_v54  ;;  %v1519_v30 = vmul.f32 1.442695, %v1492_v41 }
 0x30e   :  { %2406 = vpow2.f32 %v1515_v51  ;;  %1533 = vadd.xlane.f32.xlu1 %v1532_v37 }
 0x30f   :  { %v3657_v28 = vpop.eup %2396  ;;  %2408 = vpow2.f32 %v1517_v49 }
 0x310   :  { %v3659_v21 = vpop.eup %2398  ;;  %2410 = vpow2.f32 %v1519_v30  ;;  %v1477_v61 = vpop.xlane.xlu0 %1476 }
 0x311   :  { %v3661_v46 = vpop.eup %2400  ;;  %v1493_v16 = vsub.f32 %v3557_v8, %v1477_v61  ;;  %v1494_v53 = vsub.f32 %v3559_v12, %v1477_v61  ;;  %v1535_v45 = vadd.f32 %v3659_v21, %v3657_v28 }
 0x312   :  { %v3667_v56 = vpop.eup %2402  ;;  %v1480_v15 = vpop.xlane.xlu1 %1479 }
 0x313   :  { %v1521_v34 = vmul.f32 1.442695, %v1493_v16  ;;  %v1523_v63 = vmul.f32 1.442695, %v1494_v53  ;;  %1536 = vadd.xlane.f32.xlu0 %v1535_v45  ;;  %v1495_v62 = vsub.f32 %v3561_v44, %v1480_v15  ;;  %v1496_v26 = vsub.f32 %v3565_v42, %v1480_v15 }
 0x314   :  { %v1538_v5 = vadd.f32 %v3667_v56, %v3661_v46 }
 0x315   :  { %2412 = vpow2.f32 %v1521_v34  ;;  %v1525_v8 = vmul.f32 1.442695, %v1495_v62  ;;  %v1527_v11 = vmul.f32 1.442695, %v1496_v26 }
 0x316   :  { %2414 = vpow2.f32 %v1523_v63  ;;  %1539 = vadd.xlane.f32.xlu1 %v1538_v5 }
 0x317   :  { %v3673_v12 = vpop.eup %2404  ;;  %2416 = vpow2.f32 %v1525_v8 }
 0x318   :  { %v3675_v51 = vpop.eup %2406  ;;  %2418 = vpow2.f32 %v1527_v11 }
 0x319   :  { %v3677_v54 = vpop.eup %2408  ;;  %v1541_v44 = vadd.f32 %v3675_v51, %v3673_v12 }
 0x31a   :  { %v3681_v42 = vpop.eup %2410 }
 0x31b   :  { %1542 = vadd.xlane.f32.xlu0 %v1541_v44  ;;  %v1544_v41 = vadd.f32 %v3681_v42, %v3677_v54 }
 0x31d   :  { %1545 = vadd.xlane.f32.xlu1 %v1544_v41 }
 0x31f   :  { %v3685_v37 = vpop.eup %2412 }
 0x320   :  { %v3687_v49 = vpop.eup %2414 }
 0x321   :  { %v3689_v30 = vpop.eup %2416  ;;  %v1547_v61 = vadd.f32 %v3687_v49, %v3685_v37 }
 0x322   :  { %v3693_v16 = vpop.eup %2418 }
 0x323   :  { %1548 = vadd.xlane.f32.xlu0 %v1547_v61  ;;  %v1550_v53 = vadd.f32 %v3693_v16, %v3689_v30 }
 0x325   :  { %1551 = vadd.xlane.f32.xlu1 %v1550_v53 }
 0x358   :  { %v1169_v45 = vpop.xlane.xlu0 %1168 }
 0x359   :  { %2420 = vrcp.f32 %v1169_v45 }
 0x35c   :  { %v1172_v15 = vpop.xlane.xlu1 %1171 }
 0x35d   :  { %2422 = vrcp.f32 %v1172_v15 }
 0x360   :  { %v1175_v34 = vpop.xlane.xlu0 %1174 }
 0x361   :  { %2424 = vrcp.f32 %v1175_v34  ;;  %v3921_v34 = vpack.c.bf16 %v3227_v43, %v3221_v9 }
 0x363   :  { %v2421_v62 = vpop.eup %2420 }
 0x364   :  { %v1178_v63 = vpop.xlane.xlu1 %1177  ;;  %v1199_v5 = vmul.f32 %v2421_v62, %v3577_v57  ;;  %v1200_v44 = vmul.f32 %v2421_v62, %v3579_v40 }
 0x365   :  { %2426 = vrcp.f32 %v1178_v63 }
 0x367   :  { %v2423_v26 = vpop.eup %2422 }
 0x368   :  { %v1201_v8 = vmul.f32 %v2423_v26, %v3585_v2  ;;  %v1181_v11 = vpop.xlane.xlu0 %1180  ;;  %v1202_v41 = vmul.f32 %v2423_v26, %v3589_v39  ;;  %v3922_v2 = vpack.c.bf16 %v3351_v7, %v3343_v4  ;;  %v3924_v4 = vpack.c.bf16 %v3385_v31, %v3379_v60 }
 0x369   :  { %2428 = vrcp.f32 %v1181_v11 }
 0x36a   :  { %v1184_v61 = vpop.xlane.xlu1 %1183  ;;  %v1216_v53 = vpack.c.bf16 %v1202_v41, %v1200_v44  ;;  %v1215_v45 = vpack.c.bf16 %v1201_v8, %v1199_v5  ;;  %v3923_v5 = vpack.c.bf16 %v3224_v6, %v3216_v25  ;;  %v3926_v6 = vpack.c.bf16 %v3382_v47, %v3372_v1  ;;  %v3933_v41 = vld [vmem:[#allocation6_spill] sm:$0xff] }
 0x36b   :  { %2430 = vrcp.f32 %v1184_v61  ;;  %v2425_v15 = vpop.eup %2424  ;;  %v3929_v1 = vpack.c.bf16 %v3293_v32, %v3287_v3  ;;  %v3935_v3 = vld [vmem:[#allocation16_spill] sm:$0xff]  ;;  %v3936_v32 = vld [vmem:[#allocation14_spill] sm:$0xff] }
 0x36c   :  { %1271 = vmatprep.mubr.bf16.mxu0 %v1216_v53  ;;  %v1204_v39 = vmul.f32 %v2425_v15, %v3595_v35  ;;  %v1203_v62 = vmul.f32 %v2425_v15, %v3593_v33  ;;  %v3925_v33 = vpack.c.bf16 %v3270_v10, %v3259_v22  ;;  %v3928_v10 = vpack.c.bf16 %v3413_v19, %v3407_v20  ;;  %v3932_v19 = vld [vmem:[#allocation7_spill] sm:$0xff] }
 0x36d   :  { %1272 = vmatmul.mubr.bf16.vlgmr.msra.gmra.mrb[72].mxu0 %v1215_v45  ;;  %v3934_v61 = vpack.c.bf16 %v3932_v19, %v3933_v41  ;;  %v3937_v53 = vpack.c.bf16 %v3935_v3, %v3936_v32  ;;  %v3939_v45 = vld [vmem:[#allocation9_spill] sm:$0xff]  ;;  %v3941_v15 = vld [vmem:[#allocation15_spill] sm:$0xff] }
 0x36e   :  { %2115 = vmatpush3.bf16.msra.mxu0 %v3921_v34 }
 0x36f   :  { %v2427_v57 = vpop.eup %2426  ;;  %2116 = vmatprep.subr.bf16.mxu0 %v3922_v2 }
 0x370   :  { %v1187_v40 = vpop.xlane.xlu0 %1186  ;;  %v1206_v63 = vmul.f32 %v2427_v57, %v3605_v23  ;;  %v1205_v26 = vmul.f32 %v2427_v57, %v3601_v58  ;;  %v3927_v23 = vpack.c.bf16 %v3267_v29, %v3251_v27  ;;  %v3930_v27 = vld [vmem:[#allocation12_spill] sm:$0xff] }
 0x371   :  { %2432 = vrcp.f32 %v1187_v40  ;;  %v3931_v29 = vpack.c.bf16 %v3410_v52, %v3930_v27  ;;  %v3945_v57 = vld [vmem:[#allocation8_spill] sm:$0xff] }
 0x372   :  { %2117 = vmatpush3.bf16.msra.mxu0 %v3923_v5  ;;  %v1190_v9 = vpop.xlane.xlu1 %1189  ;;  %v1218_v43 = vpack.c.bf16 %v1206_v63, %v1204_v39  ;;  %v1217_v8 = vpack.c.bf16 %v1205_v26, %v1203_v62 }
 0x373   :  { %v2429_v11 = vpop.eup %2428  ;;  %2118 = vmatprep.subr.bf16.mxu0 %v3924_v4  ;;  %2434 = vrcp.f32 %v1190_v9 }
 0x374   :  { %1279 = vmatprep.mubr.bf16.mxu0 %v1218_v43  ;;  %v1208_v35 = vmul.f32 %v2429_v11, %v3611_v18  ;;  %v1207_v31 = vmul.f32 %v2429_v11, %v3609_v48 }
 0x375   :  { %v2431_v7 = vpop.eup %2430  ;;  %1280 = vmatmul.mubr.bf16.gmra.mrb[76].mxu0 %v1217_v8 }
 0x376   :  { %2119 = vmatpush3.bf16.msra.mxu0 %v3925_v33  ;;  %v1210_v25 = vmul.f32 %v2431_v7, %v3617_v50  ;;  %v1209_v58 = vmul.f32 %v2431_v7, %v3613_v59 }
 0x377   :  { %2120 = vmatprep.subr.bf16.mxu0 %v3926_v6 }
 0x378   :  { %v1220_v60 = vpack.c.bf16 %v1210_v25, %v1208_v35  ;;  %v1219_v18 = vpack.c.bf16 %v1209_v58, %v1207_v31 }
 0x37a   :  { %2121 = vmatpush3.bf16.msra.mxu0 %v3927_v23  ;;  %1287 = vmatprep.mubr.bf16.mxu0 %v1220_v60 }
 0x37b   :  { %v2433_v22 = vpop.eup %2432  ;;  %2122 = vmatprep.subr.bf16.mxu0 %v3928_v10 }
 0x37c   :  { %v1212_v47 = vmul.f32 %v2433_v22, %v3623_v36  ;;  %v1211_v20 = vmul.f32 %v2433_v22, %v3621_v13  ;;  %v3944_v13 = vld [vmem:[#allocation10_spill] sm:$0xff] }
 0x37d   :  { %v2435_v50 = vpop.eup %2434  ;;  %1288 = vmatmul.mubr.bf16.gmra.mrb[80].mxu0 %v1219_v18  ;;  %v3946_v2 = vpack.c.bf16 %v3944_v13, %v3945_v57 }
 0x37e   :  { %2123 = vmatpush3.bf16.msra.mxu0 %v3929_v1  ;;  %v1214_v48 = vmul.f32 %v2435_v50, %v3629_v38  ;;  %v1213_v59 = vmul.f32 %v2435_v50, %v3625_v17  ;;  %v3938_v38 = vld [vmem:[#allocation11_spill] sm:$0xff]  ;;  %v3942_v17 = vld [vmem:[#allocation13_spill] sm:$0xff] }
 0x37f   :  { %2124 = vmatprep.subr.bf16.mxu0 %v3931_v29  ;;  %v3940_v52 = vpack.c.bf16 %v3938_v38, %v3939_v45  ;;  %v3943_v34 = vpack.c.bf16 %v3941_v15, %v3942_v17 }
 0x380   :  { %v1222_v44 = vpack.c.bf16 %v1214_v48, %v1212_v47  ;;  %v1221_v36 = vpack.c.bf16 %v1213_v59, %v1211_v20 }
 0x382   :  { %2125 = vmatpush3.bf16.msra.mxu0 %v3934_v61  ;;  %1295 = vmatprep.mubr.bf16.mxu0 %v1222_v44 }
 0x383   :  { %2126 = vmatprep.subr.bf16.mxu0 %v3937_v53 }
 0x385   :  { %1296 = vmatmul.mubr.bf16.gmra.mrb[84].mxu0 %v1221_v36 }
 0x386   :  { %2127 = vmatpush3.bf16.msra.mxu0 %v3940_v52 }
 0x387   :  { %2128 = vmatprep.subr.bf16.mxu0 %v3943_v34 }
 0x38a   :  { %2129 = vmatpush3.bf16.msra.mxu0 %v3946_v2 }
 0x398   :  { %v1531_v40 = vpop.xlane.xlu0 %1530 }
 0x399   :  { %2436 = vrcp.f32 %v1531_v40 }
 0x39b   :  { %v1534_v39 = vpop.xlane.xlu1 %1533 }
 0x39c   :  { %2438 = vrcp.f32 %v1534_v39 }
 0x3a0   :  { %v1537_v63 = vpop.xlane.xlu0 %1536 }
 0x3a1   :  { %2440 = vrcp.f32 %v1537_v63 }
 0x3a3   :  { %v1540_v62 = vpop.xlane.xlu1 %1539  ;;  %v2437_v26 = vpop.eup %2436 }
 0x3a4   :  { %2442 = vrcp.f32 %v1540_v62  ;;  %v1561_v9 = vmul.f32 %v2437_v26, %v3641_v55  ;;  %v1562_v8 = vmul.f32 %v2437_v26, %v3643_v24 }
 0x3a6   :  { %v2439_v5 = vpop.eup %2438 }
 0x3a7   :  { %v1563_v43 = vmul.f32 %v2439_v5, %v3645_v0  ;;  %v1564_v11 = vmul.f32 %v2439_v5, %v3651_v14 }
 0x3a8   :  { %v1543_v4 = vpop.xlane.xlu0 %1542 }
 0x3a9   :  { %2444 = vrcp.f32 %v1543_v4  ;;  %v1578_v7 = vpack.c.bf16 %v1564_v11, %v1562_v8  ;;  %v1577_v33 = vpack.c.bf16 %v1563_v43, %v1561_v9 }
 0x3aa   :  { %v1546_v35 = vpop.xlane.xlu1 %1545 }
 0x3ab   :  { %1633 = vmatprep.mubr.bf16.mxu0 %v1578_v7  ;;  %2446 = vrcp.f32 %v1546_v35  ;;  %v2441_v25 = vpop.eup %2440 }
 0x3ac   :  { %1634 = vmatmul.mubr.bf16.vlgmr.msra.gmra.mrb[88].mxu0 %v1577_v33  ;;  %v1566_v58 = vmul.f32 %v2441_v25, %v3659_v21  ;;  %v1565_v0 = vmul.f32 %v2441_v25, %v3657_v28 }
 0x3ae   :  { %v2443_v6 = vpop.eup %2442 }
 0x3af   :  { %v1568_v55 = vmul.f32 %v2443_v6, %v3667_v56  ;;  %v1567_v24 = vmul.f32 %v2443_v6, %v3661_v46 }
 0x3b0   :  { %v1549_v60 = vpop.xlane.xlu0 %1548 }
 0x3b1   :  { %2448 = vrcp.f32 %v1549_v60  ;;  %v1580_v14 = vpack.c.bf16 %v1568_v55, %v1566_v58  ;;  %v1579_v31 = vpack.c.bf16 %v1567_v24, %v1565_v0 }
 0x3b2   :  { %v1552_v23 = vpop.xlane.xlu1 %1551 }
 0x3b3   :  { %v2445_v22 = vpop.eup %2444  ;;  %1641 = vmatprep.mubr.bf16.mxu0 %v1580_v14  ;;  %2450 = vrcp.f32 %v1552_v23 }
 0x3b4   :  { %1642 = vmatmul.mubr.bf16.gmra.mrb[92].mxu0 %v1579_v31  ;;  %v1570_v18 = vmul.f32 %v2445_v22, %v3675_v51  ;;  %v1569_v56 = vmul.f32 %v2445_v22, %v3673_v12  ;;  %v2355_v12 = vld [vmem:[%s3884_s1 + $0x18] sm:$0xff]  }
 0x3b5   :  { %v2447_v10 = vpop.eup %2446  ;;  %2313 = vmatprep.subr.bf16.mxu0 %v2355_v12 }
 0x3b6   :  { %v1572_v21 = vmul.f32 %v2447_v10, %v3681_v42  ;;  %v1571_v28 = vmul.f32 %v2447_v10, %v3677_v54  ;;  %2314 = vmatpush3.bf16.msra.mxu0 %v2355_v12 }
 0x3b8   :  { %v1582_v50 = vpack.c.bf16 %v1572_v21, %v1570_v18  ;;  %v1581_v46 = vpack.c.bf16 %v1571_v28, %v1569_v56 }
 0x3ba   :  { %1649 = vmatprep.mubr.bf16.mxu0 %v1582_v50 }
 0x3bb   :  { %v2449_v1 = vpop.eup %2448 }
 0x3bc   :  { %1650 = vmatmul.mubr.bf16.gmra.mrb[96].mxu0 %v1581_v46  ;;  %v1574_v48 = vmul.f32 %v2449_v1, %v3687_v49  ;;  %v1573_v29 = vmul.f32 %v2449_v1, %v3685_v37 }
 0x3bd   :  { %v2451_v47 = vpop.eup %2450 }
 0x3be   :  { %v1576_v27 = vmul.f32 %v2451_v47, %v3693_v16  ;;  %v1575_v51 = vmul.f32 %v2451_v47, %v3689_v30  ;;  %v3947_v47 = vld [vmem:[#allocation5_spill] sm:$0xff] }
 0x3c0   :  { %v1584_v59 = vpack.c.bf16 %v1576_v27, %v1574_v48  ;;  %v1583_v42 = vpack.c.bf16 %v1575_v51, %v1573_v29  ;;  %v1676_v48 = vsub.s32 3, %v3947_v47  ;;  %v2452_v27 = vld [vmem:[%s3885_s2] sm:$0xf]  ;;  %v2467_v47 = vld [vmem:[%s3883_s0 + $0x1f8] sm:$0xff] }
 0x3c2   :  { %1657 = vmatprep.mubr.bf16.mxu0 %v1584_v59  ;;  %v3789_v29 = vrot.slane %v2452_v27, %v1676_v48  ;;  %v2468_v27 = vld [vmem:[%s3883_s0 + $0x1e8] sm:$0xff] }
 0x3c4   :  { %1658 = vmatmul.mubr.bf16.gmra.mrb[100].mxu0 %v1583_v42 }
 0x440   :  { %v2066_v54 = vpop.f32.mrb[72].mxu0 }
 0x441   :  { %v2067_v44 = vpop.f32.mrb[73].mxu0 }
 0x442   :  { %v2068_v20 = vadd.f32 %v2067_v44, %v2066_v54  ;;  %v2069_v49 = vpop.f32.mrb[74].mxu0  ;;  %v2453_v44 = vld [vmem:[%s3883_s0 + $0xd0] sm:$0xff] }
 0x443   :  { %v2070_v19 = vpop.f32.mrb[75].mxu0 }
 0x444   :  { %v2071_v16 = vadd.f32 %v2070_v19, %v2069_v49 }
 0x446   :  { %v1666_v41 = vpack.c.bf16 %v2071_v16, %v2068_v20  ;;  %v2454_v16 = vld [vmem:[%s3883_s0 + $0xc0] sm:$0xff] }
 0x448   :  { %v2072_v37 = vpop.f32.mrb[76].mxu0  ;;  %2315 = vmatprep.mubr.msk.bf16.mxu0 %vm134_vm0, %v1666_v41 }
 0x449   :  { %v2073_v30 = vpop.f32.mrb[77].mxu0 }
 0x44a   :  { %v2074_v61 = vadd.f32 %v2073_v30, %v2072_v37  ;;  %v2075_v3 = vpop.f32.mrb[78].mxu0  ;;  %v2455_v30 = vld [vmem:[%s3883_s0 + $0xd8] sm:$0xff] }
 0x44b   :  { %v2076_v32 = vpop.f32.mrb[79].mxu0 }
 0x44c   :  { %v2077_v53 = vadd.f32 %v2076_v32, %v2075_v3  ;;  %v2456_v3 = vld [vmem:[%s3883_s0 + $0xc8] sm:$0xff] }
 0x44e   :  { %v1667_v36 = vpack.c.bf16 %v2077_v53, %v2074_v61 }
 0x450   :  { %v2078_v38 = vpop.f32.mrb[80].mxu0  ;;  %2316 = vmatmul.mubr.msk.bf16.vlgmr.msra.gmra.mrb[104].mxu0 %vm134_vm0, %v1667_v36 }
 0x451   :  { %v2079_v45 = vpop.f32.mrb[81].mxu0 }
 0x452   :  { %v2080_v52 = vadd.f32 %v2079_v45, %v2078_v38  ;;  %v2081_v15 = vpop.f32.mrb[82].mxu0 }
 0x453   :  { %v2082_v17 = vpop.f32.mrb[83].mxu0 }
 0x454   :  { %v2083_v34 = vadd.f32 %v2082_v17, %v2081_v15  ;;  %v2457_v15 = vld [vmem:[%s3883_s0 + $0xf0] sm:$0xff] }
 0x456   :  { %v1668_v13 = vpack.c.bf16 %v2083_v34, %v2080_v52 }
 0x458   :  { %v2084_v57 = vpop.f32.mrb[84].mxu0  ;;  %2319 = vmatprep.mubr.msk.bf16.mxu0 %vm134_vm0, %v1668_v13 }
 0x459   :  { %v2085_v2 = vpop.f32.mrb[85].mxu0 }
 0x45a   :  { %v2086_v40 = vadd.f32 %v2085_v2, %v2084_v57  ;;  %v2087_v39 = vpop.f32.mrb[86].mxu0  ;;  %v2458_v57 = vld [vmem:[%s3883_s0 + $0xe0] sm:$0xff] }
 0x45b   :  { %v2088_v63 = vpop.f32.mrb[87].mxu0 }
 0x45c   :  { %v2089_v62 = vadd.f32 %v2088_v63, %v2087_v39  ;;  %v2459_v39 = vld [vmem:[%s3883_s0 + $0xf8] sm:$0xff] }
 0x45e   :  { %v1669_v26 = vpack.c.bf16 %v2089_v62, %v2086_v40  ;;  %v2460_v62 = vld [vmem:[%s3883_s0 + $0xe8] sm:$0xff] }
 0x460   :  { %2320 = vmatmul.mubr.msk.bf16.gmra.mrb[108].mxu0 %vm134_vm0, %v1669_v26 }
 0x47f   :  { %v2130_v5 = vpop.f32.mrb[88].mxu0 }
 0x480   :  { %v2131_v9 = vpop.f32.mrb[89].mxu0 }
 0x481   :  { %v2132_v43 = vadd.f32 %v2131_v9, %v2130_v5  ;;  %v2133_v8 = vpop.f32.mrb[90].mxu0 }
 0x482   :  { %v2134_v11 = vpop.f32.mrb[91].mxu0 }
 0x483   :  { %v2135_v4 = vadd.f32 %v2134_v11, %v2133_v8 }
 0x485   :  { %v1670_v7 = vpack.c.bf16 %v2135_v4, %v2132_v43  ;;  %v2461_v4 = vld [vmem:[%s3883_s0 + $0x1d0] sm:$0xff] }
 0x487   :  { %v2136_v33 = vpop.f32.mrb[92].mxu0  ;;  %2323 = vmatprep.mubr.msk.bf16.mxu0 %vm134_vm0, %v1670_v7 }
 0x488   :  { %v2137_v35 = vpop.f32.mrb[93].mxu0 }
 0x489   :  { %v2138_v25 = vadd.f32 %v2137_v35, %v2136_v33  ;;  %v2139_v6 = vpop.f32.mrb[94].mxu0 }
 0x48a   :  { %v2140_v58 = vpop.f32.mrb[95].mxu0 }
 0x48b   :  { %v2141_v55 = vadd.f32 %v2140_v58, %v2139_v6 }
 0x48d   :  { %v1671_v0 = vpack.c.bf16 %v2141_v55, %v2138_v25  ;;  %v2462_v25 = vld [vmem:[%s3883_s0 + $0x1c0] sm:$0xff]  ;;  %v2463_v55 = vld [vmem:[%s3883_s0 + $0x1d8] sm:$0xff] }
 0x48f   :  { %v2142_v24 = vpop.f32.mrb[96].mxu0  ;;  %2324 = vmatmul.mubr.msk.bf16.gmra.mrb[112].mxu0 %vm134_vm0, %v1671_v0 }
 0x490   :  { %v2143_v60 = vpop.f32.mrb[97].mxu0 }
 0x491   :  { %v2144_v14 = vadd.f32 %v2143_v60, %v2142_v24  ;;  %v2145_v31 = vpop.f32.mrb[98].mxu0  ;;  %v2464_v24 = vld [vmem:[%s3883_s0 + $0x1c8] sm:$0xff] }
 0x492   :  { %v2146_v23 = vpop.f32.mrb[99].mxu0 }
 0x493   :  { %v2147_v22 = vadd.f32 %v2146_v23, %v2145_v31 }
 0x495   :  { %v1672_v10 = vpack.c.bf16 %v2147_v22, %v2144_v14 }
 0x497   :  { %v2148_v18 = vpop.f32.mrb[100].mxu0  ;;  %2327 = vmatprep.mubr.msk.bf16.mxu0 %vm134_vm0, %v1672_v10 }
 0x498   :  { %v2149_v21 = vpop.f32.mrb[101].mxu0 }
 0x499   :  { %v2150_v56 = vadd.f32 %v2149_v21, %v2148_v18  ;;  %v2151_v28 = vpop.f32.mrb[102].mxu0  ;;  %v2465_v18 = vld [vmem:[%s3883_s0 + $0x1f0] sm:$0xff] }
 0x49a   :  { %v2152_v50 = vpop.f32.mrb[103].mxu0 }
 0x49b   :  { %v2153_v46 = vadd.f32 %v2152_v50, %v2151_v28  ;;  %v2466_v50 = vld [vmem:[%s3883_s0 + $0x1e0] sm:$0xff] }
 0x49d   :  { %v1673_v1 = vpack.c.bf16 %v2153_v46, %v2150_v56 }
 0x49f   :  { %2328 = vmatmul.mubr.msk.bf16.gmra.mrb[116].mxu0 %vm134_vm0, %v1673_v1 }
 0x523   :  { %v2317_v51 = vpop.f32.mrb[104].mxu0 }
 0x524   :  { %v1751_v59 = vadd.f32 %v2317_v51, %v3789_v29  ;;  %v1742_v42 = vpop.f32.mrb[105].mxu0 }
 0x525   :  { %v1743_v12 = vadd.f32 %v1742_v42, %v3789_v29  ;;  %v2318_v54 = vpop.f32.mrb[106].mxu0 }
 0x526   :  { %v1807_v20 = vadd.f32 %v2453_v44, %v1751_v59  ;;  %v1754_v49 = vadd.f32 %v2318_v54, %v3789_v29  ;;  %v1745_v19 = vpop.f32.mrb[107].mxu0 }
 0x527   :  { %v1805_v41 = vadd.f32 %v2454_v16, %v1743_v12  ;;  %v1746_v37 = vadd.f32 %v1745_v19, %v3789_v29 }
 0x528   :  { %1823 = vst.msk [vmem:[#allocation2 + $0x10] sm:$0xff] %vm134_vm0, %v1807_v20  ;;  %v1808_v61 = vadd.f32 %v2455_v30, %v1754_v49 }
 0x529   :  { %1821 = vst.msk [vmem:[#allocation2] sm:$0xff] %vm134_vm0, %v1805_v41  ;;  %v1806_v32 = vadd.f32 %v2456_v3, %v1746_v37 }
 0x52a   :  { %1824 = vst.msk [vmem:[#allocation2 + $0x18] sm:$0xff] %vm134_vm0, %v1808_v61 }
 0x52b   :  { %1822 = vst.msk [vmem:[#allocation2 + $0x8] sm:$0xff] %vm134_vm0, %v1806_v32 }
 0x533   :  { %v2321_v53 = vpop.f32.mrb[108].mxu0 }
 0x534   :  { %v1767_v36 = vadd.f32 %v2321_v53, %v3789_v29  ;;  %v1758_v38 = vpop.f32.mrb[109].mxu0 }
 0x535   :  { %v1759_v45 = vadd.f32 %v1758_v38, %v3789_v29  ;;  %v2322_v52 = vpop.f32.mrb[110].mxu0 }
 0x536   :  { %v1811_v17 = vadd.f32 %v2457_v15, %v1767_v36  ;;  %v1770_v34 = vadd.f32 %v2322_v52, %v3789_v29  ;;  %v1761_v13 = vpop.f32.mrb[111].mxu0 }
 0x537   :  { %v1809_v2 = vadd.f32 %v2458_v57, %v1759_v45  ;;  %v1762_v40 = vadd.f32 %v1761_v13, %v3789_v29 }
 0x538   :  { %1827 = vst.msk [vmem:[#allocation2 + $0x30] sm:$0xff] %vm134_vm0, %v1811_v17  ;;  %v1812_v63 = vadd.f32 %v2459_v39, %v1770_v34 }
 0x539   :  { %1825 = vst.msk [vmem:[#allocation2 + $0x20] sm:$0xff] %vm134_vm0, %v1809_v2  ;;  %v1810_v26 = vadd.f32 %v2460_v62, %v1762_v40 }
 0x53a   :  { %1828 = vst.msk [vmem:[#allocation2 + $0x38] sm:$0xff] %vm134_vm0, %v1812_v63 }
 0x53b   :  { %1826 = vst.msk [vmem:[#allocation2 + $0x28] sm:$0xff] %vm134_vm0, %v1810_v26 }
 0x562   :  { %v2325_v5 = vpop.f32.mrb[112].mxu0 }
 0x563   :  { %v1783_v9 = vadd.f32 %v2325_v5, %v3789_v29  ;;  %v1774_v43 = vpop.f32.mrb[113].mxu0 }
 0x564   :  { %v1775_v8 = vadd.f32 %v1774_v43, %v3789_v29  ;;  %v2326_v11 = vpop.f32.mrb[114].mxu0 }
 0x565   :  { %v1815_v7 = vadd.f32 %v2461_v4, %v1783_v9  ;;  %v1786_v33 = vadd.f32 %v2326_v11, %v3789_v29  ;;  %v1777_v35 = vpop.f32.mrb[115].mxu0 }
 0x566   :  { %v1813_v6 = vadd.f32 %v2462_v25, %v1775_v8  ;;  %v1778_v58 = vadd.f32 %v1777_v35, %v3789_v29 }
 0x567   :  { %1831 = vst.msk [vmem:[#allocation2 + $0x50] sm:$0xff] %vm134_vm0, %v1815_v7  ;;  %v1816_v0 = vadd.f32 %v2463_v55, %v1786_v33 }
 0x568   :  { %1829 = vst.msk [vmem:[#allocation2 + $0x40] sm:$0xff] %vm134_vm0, %v1813_v6  ;;  %v1814_v60 = vadd.f32 %v2464_v24, %v1778_v58 }
 0x569   :  { %1832 = vst.msk [vmem:[#allocation2 + $0x58] sm:$0xff] %vm134_vm0, %v1816_v0 }
 0x56a   :  { %1830 = vst.msk [vmem:[#allocation2 + $0x48] sm:$0xff] %vm134_vm0, %v1814_v60 }
 0x572   :  { %v2329_v14 = vpop.f32.mrb[116].mxu0 }
 0x573   :  { %v1799_v31 = vadd.f32 %v2329_v14, %v3789_v29  ;;  %v1790_v23 = vpop.f32.mrb[117].mxu0 }
 0x574   :  { %v1791_v22 = vadd.f32 %v1790_v23, %v3789_v29  ;;  %v2330_v10 = vpop.f32.mrb[118].mxu0 }
 0x575   :  { %v1819_v21 = vadd.f32 %v2465_v18, %v1799_v31  ;;  %v1802_v56 = vadd.f32 %v2330_v10, %v3789_v29  ;;  %v1793_v28 = vpop.f32.mrb[119].mxu0 }
 0x576   :  { %v1817_v46 = vadd.f32 %v2466_v50, %v1791_v22  ;;  %v1794_v1 = vadd.f32 %v1793_v28, %v3789_v29 }
 0x577   :  { %1835 = vst.msk [vmem:[#allocation2 + $0x70] sm:$0xff] %vm134_vm0, %v1819_v21  ;;  %v1820_v48 = vadd.f32 %v2467_v47, %v1802_v56 }
 0x578   :  { %1833 = vst.msk [vmem:[#allocation2 + $0x60] sm:$0xff] %vm134_vm0, %v1817_v46  ;;  %v1818_v51 = vadd.f32 %v2468_v27, %v1794_v1 }
 0x579   :  { %1836 = vst.msk [vmem:[#allocation2 + $0x78] sm:$0xff] %vm134_vm0, %v1820_v48 }
 0x57a   :  { %1834 = vst.msk [vmem:[#allocation2 + $0x68] sm:$0xff] %vm134_vm0, %v1818_v51 }
 0x57b   :  { %2480 = shalt.err (!%p2477_p4)
}
 0x57c   :  { %s2481_s23 = scalar_lea.hbm %s3886_s3, 2048 }
 0x57d   :  { %p2482_p5 = scmp.ne.s32.totalorder %s3886_s3, %s2481_s23  ;;  %p2485_p6 = scmp.lt.u32.totalorder %s2481_s23, %s3886_s3 }
 0x57f   :  { %p2487_p7 = pnand %p2485_p6, %p2482_p5 }
 0x581   :  { %2490 = shalt.err (!%p2487_p7)
}
 0x582   :  { %s2494_s27 = smov 128   ;;  %s2495_s28 = smov 8  }
 0x583   :  { %1848 = dma.vmem_to_hbm [thread:$0]  %s1843_s13, 2048, %s3886_s3, [#allocation3], %s2494_s27, %s2494_s27, %s2495_s28  }
 0x584   :  { %2491 = dma.done.wait [#allocation3], 2048  }
 0x585   :  { %2492 = vsyncadd [#allocation3], 4294965248 }
 0x586   :  { %1852 = vsyncpa [#allocation3], 1 }

</bundles_post_ra>
